<compile_context>
chip_gen: v5e
topology: v5e:2x2
jax: 0.10.0
libtpu: 0.0.40
codegen_flags: <defaults>
</compile_context>

<pallas_src>
import jax
import jax.numpy as jnp
from jax.experimental import pallas as pl
from jax.experimental.pallas import tpu as pltpu

BN_EPS = 1e-5


def conv_bn_kernel(w_ref, x_ref, gb_ref, o_ref):
    # 1x1 conv == one MXU matmul: (Cout, Cin) @ (Cin, P) -> (Cout, P), f32 acc.
    y = jnp.dot(w_ref[...], x_ref[...], preferred_element_type=jnp.float32)
    # BatchNorm2d (training-mode): biased batch statistics over P = N*H*W,
    # per channel (rows); the lane-axis reductions go through the XLU.
    p = y.shape[1]
    inv_p = 1.0 / p
    mean = jnp.sum(y, axis=1, keepdims=True) * inv_p
    centered = y - mean
    var = jnp.sum(centered * centered, axis=1, keepdims=True) * inv_p
    inv = jax.lax.rsqrt(var + BN_EPS)               # EUP rsqrt (free slot)
    gb = gb_ref[...]                                # (Cout, 2): [:,0]=gamma, [:,1]=beta
    scale = inv * gb[:, 0:1]                        # fold gamma into inv-std
    o_ref[...] = (centered * scale + gb[:, 1:2]).astype(o_ref.dtype)


def pack_gamma_beta(gamma, beta):
    """Pack BN affine params once (hoisted out of the per-forward path)."""
    return jnp.stack(
        [gamma.astype(jnp.float32), beta.astype(jnp.float32)], axis=-1
    )  # (Cout, 2)


def conv2d_batchnorm(x_nchw, weight, gb):
    """Fused 1x1 Conv2d (no bias) + training-mode BatchNorm2d.

    x_nchw: (N, Cin, H, W), f32 or bf16 — consumed at its native dtype.
    weight: (Cout, Cin, 1, 1), same dtype family as x.
    gb:     (Cout, 2) pre-packed [gamma, beta] (see pack_gamma_beta).
    """
    N, Cin, H, W = x_nchw.shape
    Cout = weight.shape[0]
    P = N * H * W

    # Channel-major input: free reshape for N == 1 (the module's case).
    if N == 1:
        x2d = x_nchw.reshape(Cin, P)
    else:
        # TODO(synk): for N > 1, fold N into an 'arbitrary' grid axis and
        # accumulate sum / sum-of-squares in VMEM instead of this XLA transpose.
        x2d = jnp.transpose(x_nchw, (1, 0, 2, 3)).reshape(Cin, P)

    w2d = weight.reshape(Cout, Cin)

    itemsize = jnp.dtype(x2d.dtype).itemsize
    cost = pl.CostEstimate(
        flops=2 * P * Cin * Cout,
        transcendentals=Cout,
        bytes_accessed=itemsize * (P * Cin + Cin * Cout + Cout * P) + 4 * 2 * Cout,
    )

    # Single invocation (no grid): whole operands live in VMEM, no pointless
    # double-buffering at one grid step.
    vmem = pl.BlockSpec(memory_space=pltpu.MemorySpace.VMEM)
    out2d = pl.pallas_call(
        conv_bn_kernel,
        out_shape=jax.ShapeDtypeStruct((Cout, P), x_nchw.dtype),
        in_specs=[vmem, vmem, vmem],
        out_specs=vmem,
        cost_estimate=cost,
    )(w2d, x2d, gb)

    # TODO(synk): P=196 is lane-sparse (128+68 lanes); if the upstream producer
    # can zero-pad H*W to a multiple of 128, switch BN to sum / sum-of-squares
    # with the true count so stores/loads become unmasked (producer-side change).

    # Channel-major output: free reshape back to NCHW for N == 1.
    if N == 1:
        return out2d.reshape(1, Cout, H, W)
    return jnp.transpose(out2d.reshape(Cout, N, H, W), (1, 0, 2, 3))


def reference(x_nchw, weight, gamma, beta):
    # Plain-JAX reference for the sanity check (f32 throughout).
    N, Cin, H, W = x_nchw.shape
    Cout = weight.shape[0]
    x2d = jnp.transpose(x_nchw, (0, 2, 3, 1)).reshape(-1, Cin)
    y = x2d @ weight.reshape(Cout, Cin).T
    mean = y.mean(axis=0, keepdims=True)
    var = ((y - mean) ** 2).mean(axis=0, keepdims=True)
    out = (y - mean) / jnp.sqrt(var + BN_EPS) * gamma + beta
    return jnp.transpose(out.reshape(N, H, W, Cout), (0, 3, 1, 2))


if __name__ == "__main__":
    key = jax.random.PRNGKey(0)
    k_x, k_w = jax.random.split(key)

    # Shapes implied by the module's forward: x348 = (1, 960, 14, 14) -> (1, 160, 14, 14).
    N, Cin, H, W = 1, 960, 14, 14
    Cout = 160

    x = jax.random.normal(k_x, (N, Cin, H, W), dtype=jnp.float32)
    weight = jax.random.normal(k_w, (Cout, Cin, 1, 1), dtype=jnp.float32) * 0.05
    gamma = jnp.ones((Cout,), dtype=jnp.float32)   # PyTorch BN default affine init
    beta = jnp.zeros((Cout,), dtype=jnp.float32)

    # Pack gamma/beta once, outside the per-call path.
    gb = pack_gamma_beta(gamma, beta)

    # f32 path (matches the PyTorch module's inputs exactly).
    out = jax.block_until_ready(conv2d_batchnorm(x, weight, gb))
    ref = jax.block_until_ready(reference(x, weight, gamma, beta))
    assert out.shape == (N, Cout, H, W), out.shape
    assert jnp.allclose(out, ref, atol=1e-3, rtol=1e-3), "f32 mismatch vs reference"

    # bf16-producer path: inputs arrive already in bf16 (no wrapper cast inside
    # conv2d_batchnorm) -> native bf16 MXU path, ~half the dominant HBM reads.
    x_bf16 = x.astype(jnp.bfloat16)
    w_bf16 = weight.astype(jnp.bfloat16)
    out_bf16 = jax.block_until_ready(conv2d_batchnorm(x_bf16, w_bf16, gb))
    assert out_bf16.shape == (N, Cout, H, W), out_bf16.shape
    assert jnp.allclose(out_bf16.astype(jnp.float32), ref, atol=1e-1, rtol=1e-1), \
        "bf16 mismatch vs reference"

    print("KERNEL_OK")
</pallas_src>

<mosaic_0001>
module attributes {stable_mosaic.version = 11 : i64} {
  func.func @conv_bn_kernel(%arg0: memref<160x960xf32, #tpu.memory_space<vmem>>, %arg1: memref<960x196xf32, #tpu.memory_space<vmem>>, %arg2: memref<160x2xf32, #tpu.memory_space<vmem>>, %arg3: memref<160x196xf32, #tpu.memory_space<vmem>>) attributes {dimension_semantics = [], scalar_prefetch = 0 : i64, scratch_operands = 0 : i64, tpu.core_type = #tpu.core_type<tc>} {
    %c0 = arith.constant 0 : index
    %c0_0 = arith.constant 0 : index
    %0 = vector.load %arg0[%c0, %c0_0] : memref<160x960xf32, #tpu.memory_space<vmem>>, vector<160x960xf32>
    %c0_1 = arith.constant 0 : index
    %c0_2 = arith.constant 0 : index
    %1 = vector.load %arg1[%c0_1, %c0_2] : memref<960x196xf32, #tpu.memory_space<vmem>>, vector<960x196xf32>
    %cst = arith.constant dense<0.000000e+00> : vector<160x196xf32>
    %2 = tpu.matmul %0, %1, %cst {dimension_numbers = #tpu.dot_dimension_numbers<[1], [0], [0], [1], [0, 0, 1, 1], [], []>} : vector<160x960xf32>, vector<960x196xf32>, vector<160x196xf32> -> vector<160x196xf32>
    %cst_3 = arith.constant dense<0.000000e+00> : vector<160xf32>
    %3 = vector.multi_reduction <add>, %2, %cst_3 [1] : vector<160x196xf32> to vector<160xf32>
    %4 = vector.shape_cast %3 : vector<160xf32> to vector<160x1xf32>
    %cst_4 = arith.constant 0.00510204071 : f32
    %5 = vector.broadcast %cst_4 : f32 to vector<160x1xf32>
    %6 = arith.mulf %4, %5 : vector<160x1xf32>
    %7 = vector.broadcast %6 : vector<160x1xf32> to vector<160x196xf32>
    %8 = arith.subf %2, %7 : vector<160x196xf32>
    %9 = arith.mulf %8, %8 : vector<160x196xf32>
    %cst_5 = arith.constant dense<0.000000e+00> : vector<160xf32>
    %10 = vector.multi_reduction <add>, %9, %cst_5 [1] : vector<160x196xf32> to vector<160xf32>
    %11 = vector.shape_cast %10 : vector<160xf32> to vector<160x1xf32>
    %cst_6 = arith.constant 0.00510204071 : f32
    %12 = vector.broadcast %cst_6 : f32 to vector<160x1xf32>
    %13 = arith.mulf %11, %12 : vector<160x1xf32>
    %cst_7 = arith.constant 9.99999974E-6 : f32
    %14 = vector.broadcast %cst_7 : f32 to vector<160x1xf32>
    %15 = arith.addf %13, %14 : vector<160x1xf32>
    %16 = math.rsqrt %15 : vector<160x1xf32>
    %c0_8 = arith.constant 0 : index
    %c0_9 = arith.constant 0 : index
    %17 = vector.load %arg2[%c0_8, %c0_9] : memref<160x2xf32, #tpu.memory_space<vmem>>, vector<160x2xf32>
    %18 = vector.extract_strided_slice %17 {offsets = [0, 0], sizes = [160, 1], strides = [1, 1]} : vector<160x2xf32> to vector<160x1xf32>
    %19 = arith.mulf %16, %18 : vector<160x1xf32>
    %20 = vector.broadcast %19 : vector<160x1xf32> to vector<160x196xf32>
    %21 = arith.mulf %8, %20 : vector<160x196xf32>
    %22 = vector.extract_strided_slice %17 {offsets = [0, 1], sizes = [160, 1], strides = [1, 1]} : vector<160x2xf32> to vector<160x1xf32>
    %23 = vector.broadcast %22 : vector<160x1xf32> to vector<160x196xf32>
    %24 = arith.addf %21, %23 : vector<160x196xf32>
    %c0_10 = arith.constant 0 : index
    %c0_11 = arith.constant 0 : index
    %25 = vector.load %arg3[%c0_10, %c0_11] : memref<160x196xf32, #tpu.memory_space<vmem>>, vector<160x196xf32>
    tpu.vector_store %arg3[%c0_10, %c0_11], %24 {strides = array<i32>} : memref<160x196xf32, #tpu.memory_space<vmem>>, vector<160x196xf32>,
    return
  }
}

</mosaic_0001>

<bundles_post_ra>
// kernel: tpu_custom_call.1
= control target key start
LH: loop header
LB: loop body
LE: loop exit
PB: predicated region body
PF: predicated region fallthrough
CT: control target
= control target key end

     0   :  { %s5419_s0 = inlined_call_operand.vmem [shape: f32[160,960], index: 0, kind: input, shape index: {}]   ;;  %s5420_s1 = inlined_call_operand.vmem [shape: f32[960,196], index: 1, kind: input, shape index: {}]   ;;  %s5421_s2 = inlined_call_operand.vmem [shape: f32[160,2], index: 2, kind: input, shape index: {}]   ;;  %s5422_s3 = inlined_call_operand.hbm [shape: f32[160,196], index: 3, kind: output, shape index: {}]  }
   0x1   :  { %v205_v0 = vld [vmem:[%s5420_s1 + $0xf0] sm:$0xff]  ;;  %v203_v2 = vld [vmem:[%s5420_s1 + $0xe0] sm:$0xff] }
   0x2   :  { %v269_v1 = vld [vmem:[%s5420_s1 + $0x2f0] sm:$0xff]  ;;  %476 = vmatpush.msra.mxu0 %v205_v0  ;;  %v267_v4 = vld [vmem:[%s5420_s1 + $0x2e0] sm:$0xff] }
   0x3   :  { %630 = vmatpush.msra.mxu2 %v269_v1  ;;  %v237_v3 = vld [vmem:[%s5420_s1 + $0x1f0] sm:$0xff]  ;;  %v235_v7 = vld [vmem:[%s5420_s1 + $0x1e0] sm:$0xff] }
   0x4   :  { %v301_v5 = vld [vmem:[%s5420_s1 + $0x3f0] sm:$0xff]  ;;  %553 = vmatpush.msra.mxu1 %v237_v3  ;;  %477 = vmatpush.msra.mxu0 %v203_v2  ;;  %v299_v9 = vld [vmem:[%s5420_s1 + $0x3e0] sm:$0xff]  ;;  %v16_v3 = vld [vmem:[%s5419_s0 + $0x8] sm:$0xff] }
   0x5   :  { %707 = vmatpush.msra.mxu3 %v301_v5  ;;  %v201_v6 = vld [vmem:[%s5420_s1 + $0xd0] sm:$0xff]  ;;  %631 = vmatpush.msra.mxu2 %v267_v4  ;;  %v199_v11 = vld [vmem:[%s5420_s1 + $0xc0] sm:$0xff] }
   0x6   :  { %v265_v8 = vld [vmem:[%s5420_s1 + $0x2d0] sm:$0xff]  ;;  %554 = vmatpush.msra.mxu1 %v235_v7  ;;  %v263_v12 = vld [vmem:[%s5420_s1 + $0x2c0] sm:$0xff]  ;;  %478 = vmatpush.msra.mxu0 %v201_v6 }
   0x7   :  { %v233_v10 = vld [vmem:[%s5420_s1 + $0x1d0] sm:$0xff]  ;;  %708 = vmatpush.msra.mxu3 %v299_v9  ;;  %632 = vmatpush.msra.mxu2 %v265_v8  ;;  %v231_v14 = vld [vmem:[%s5420_s1 + $0x1c0] sm:$0xff] }
   0x8   :  { %v297_v13 = vld [vmem:[%s5420_s1 + $0x3d0] sm:$0xff]  ;;  %v295_v15 = vld [vmem:[%s5420_s1 + $0x3c0] sm:$0xff]  ;;  %555 = vmatpush.msra.mxu1 %v233_v10  ;;  %479 = vmatpush.msra.mxu0 %v199_v11 }
   0x9   :  { %709 = vmatpush.msra.mxu3 %v297_v13  ;;  %v197_v16 = vld [vmem:[%s5420_s1 + $0xb0] sm:$0xff]  ;;  %633 = vmatpush.msra.mxu2 %v263_v12  ;;  %v195_v20 = vld [vmem:[%s5420_s1 + $0xa0] sm:$0xff] }
   0xa   :  { %v261_v17 = vld [vmem:[%s5420_s1 + $0x2b0] sm:$0xff]  ;;  %556 = vmatpush.msra.mxu1 %v231_v14  ;;  %v259_v21 = vld [vmem:[%s5420_s1 + $0x2a0] sm:$0xff]  ;;  %480 = vmatpush.msra.mxu0 %v197_v16 }
   0xb   :  { %v229_v18 = vld [vmem:[%s5420_s1 + $0x1b0] sm:$0xff]  ;;  %710 = vmatpush.msra.mxu3 %v295_v15  ;;  %634 = vmatpush.msra.mxu2 %v261_v17  ;;  %v227_v22 = vld [vmem:[%s5420_s1 + $0x1a0] sm:$0xff] }
   0xc   :  { %v293_v19 = vld [vmem:[%s5420_s1 + $0x3b0] sm:$0xff]  ;;  %v291_v23 = vld [vmem:[%s5420_s1 + $0x3a0] sm:$0xff]  ;;  %557 = vmatpush.msra.mxu1 %v229_v18  ;;  %481 = vmatpush.msra.mxu0 %v195_v20 }
   0xd   :  { %711 = vmatpush.msra.mxu3 %v293_v19  ;;  %v193_v24 = vld [vmem:[%s5420_s1 + $0x90] sm:$0xff]  ;;  %635 = vmatpush.msra.mxu2 %v259_v21  ;;  %v191_v28 = vld [vmem:[%s5420_s1 + $0x80] sm:$0xff] }
   0xe   :  { %v257_v25 = vld [vmem:[%s5420_s1 + $0x290] sm:$0xff]  ;;  %558 = vmatpush.msra.mxu1 %v227_v22  ;;  %v255_v29 = vld [vmem:[%s5420_s1 + $0x280] sm:$0xff]  ;;  %482 = vmatpush.msra.mxu0 %v193_v24 }
   0xf   :  { %v225_v26 = vld [vmem:[%s5420_s1 + $0x190] sm:$0xff]  ;;  %712 = vmatpush.msra.mxu3 %v291_v23  ;;  %636 = vmatpush.msra.mxu2 %v257_v25  ;;  %v223_v30 = vld [vmem:[%s5420_s1 + $0x180] sm:$0xff] }
  0x10   :  { %v289_v27 = vld [vmem:[%s5420_s1 + $0x390] sm:$0xff]  ;;  %v287_v31 = vld [vmem:[%s5420_s1 + $0x380] sm:$0xff]  ;;  %559 = vmatpush.msra.mxu1 %v225_v26  ;;  %483 = vmatpush.msra.mxu0 %v191_v28 }
  0x11   :  { %713 = vmatpush.msra.mxu3 %v289_v27  ;;  %v189_v32 = vld [vmem:[%s5420_s1 + $0x70] sm:$0xff]  ;;  %637 = vmatpush.msra.mxu2 %v255_v29  ;;  %v187_v36 = vld [vmem:[%s5420_s1 + $0x60] sm:$0xff] }
  0x12   :  { %v253_v33 = vld [vmem:[%s5420_s1 + $0x270] sm:$0xff]  ;;  %560 = vmatpush.msra.mxu1 %v223_v30  ;;  %v251_v37 = vld [vmem:[%s5420_s1 + $0x260] sm:$0xff]  ;;  %484 = vmatpush.msra.mxu0 %v189_v32 }
  0x13   :  { %v221_v34 = vld [vmem:[%s5420_s1 + $0x170] sm:$0xff]  ;;  %714 = vmatpush.msra.mxu3 %v287_v31  ;;  %638 = vmatpush.msra.mxu2 %v253_v33  ;;  %v219_v38 = vld [vmem:[%s5420_s1 + $0x160] sm:$0xff] }
  0x14   :  { %v285_v35 = vld [vmem:[%s5420_s1 + $0x370] sm:$0xff]  ;;  %v283_v39 = vld [vmem:[%s5420_s1 + $0x360] sm:$0xff]  ;;  %561 = vmatpush.msra.mxu1 %v221_v34  ;;  %485 = vmatpush.msra.mxu0 %v187_v36 }
  0x15   :  { %715 = vmatpush.msra.mxu3 %v285_v35  ;;  %v185_v40 = vld [vmem:[%s5420_s1 + $0x50] sm:$0xff]  ;;  %639 = vmatpush.msra.mxu2 %v251_v37  ;;  %v183_v44 = vld [vmem:[%s5420_s1 + $0x40] sm:$0xff] }
  0x16   :  { %v249_v41 = vld [vmem:[%s5420_s1 + $0x250] sm:$0xff]  ;;  %562 = vmatpush.msra.mxu1 %v219_v38  ;;  %v247_v45 = vld [vmem:[%s5420_s1 + $0x240] sm:$0xff]  ;;  %486 = vmatpush.msra.mxu0 %v185_v40 }
  0x17   :  { %v217_v42 = vld [vmem:[%s5420_s1 + $0x150] sm:$0xff]  ;;  %716 = vmatpush.msra.mxu3 %v283_v39  ;;  %640 = vmatpush.msra.mxu2 %v249_v41  ;;  %v215_v46 = vld [vmem:[%s5420_s1 + $0x140] sm:$0xff] }
  0x18   :  { %v281_v43 = vld [vmem:[%s5420_s1 + $0x350] sm:$0xff]  ;;  %v279_v47 = vld [vmem:[%s5420_s1 + $0x340] sm:$0xff]  ;;  %563 = vmatpush.msra.mxu1 %v217_v42  ;;  %487 = vmatpush.msra.mxu0 %v183_v44 }
  0x19   :  { %717 = vmatpush.msra.mxu3 %v281_v43  ;;  %v181_v48 = vld [vmem:[%s5420_s1 + $0x30] sm:$0xff]  ;;  %641 = vmatpush.msra.mxu2 %v247_v45  ;;  %v179_v52 = vld [vmem:[%s5420_s1 + $0x20] sm:$0xff] }
  0x1a   :  { %v245_v49 = vld [vmem:[%s5420_s1 + $0x230] sm:$0xff]  ;;  %564 = vmatpush.msra.mxu1 %v215_v46  ;;  %v243_v53 = vld [vmem:[%s5420_s1 + $0x220] sm:$0xff]  ;;  %488 = vmatpush.msra.mxu0 %v181_v48 }
  0x1b   :  { %v213_v50 = vld [vmem:[%s5420_s1 + $0x130] sm:$0xff]  ;;  %718 = vmatpush.msra.mxu3 %v279_v47  ;;  %642 = vmatpush.msra.mxu2 %v245_v49  ;;  %v211_v54 = vld [vmem:[%s5420_s1 + $0x120] sm:$0xff] }
  0x1c   :  { %v277_v51 = vld [vmem:[%s5420_s1 + $0x330] sm:$0xff]  ;;  %v275_v55 = vld [vmem:[%s5420_s1 + $0x320] sm:$0xff]  ;;  %565 = vmatpush.msra.mxu1 %v213_v50  ;;  %489 = vmatpush.msra.mxu0 %v179_v52 }
  0x1d   :  { %719 = vmatpush.msra.mxu3 %v277_v51  ;;  %v177_v56 = vld [vmem:[%s5420_s1 + $0x10] sm:$0xff]  ;;  %643 = vmatpush.msra.mxu2 %v243_v53  ;;  %v175_v60 = vld [vmem:[%s5420_s1] sm:$0xff] }
  0x1e   :  { %v241_v57 = vld [vmem:[%s5420_s1 + $0x210] sm:$0xff]  ;;  %566 = vmatpush.msra.mxu1 %v211_v54  ;;  %v239_v61 = vld [vmem:[%s5420_s1 + $0x200] sm:$0xff]  ;;  %490 = vmatpush.msra.mxu0 %v177_v56 }
  0x1f   :  { %v209_v58 = vld [vmem:[%s5420_s1 + $0x110] sm:$0xff]  ;;  %720 = vmatpush.msra.mxu3 %v275_v55  ;;  %644 = vmatpush.msra.mxu2 %v241_v57  ;;  %v15_v62 = vld [vmem:[%s5419_s0] sm:$0xff] }
  0x20   :  { %v273_v59 = vld [vmem:[%s5420_s1 + $0x310] sm:$0xff]  ;;  %567 = vmatpush.msra.mxu1 %v209_v58  ;;  %v207_v1 = vld [vmem:[%s5420_s1 + $0x100] sm:$0xff]  ;;  %491 = vmatpush.msra.mxu0 %v175_v60 }
  0x21   :  { %v17_v63 = vld [vmem:[%s5419_s0 + $0x10] sm:$0xff]  ;;  %721 = vmatpush.msra.mxu3 %v273_v59  ;;  %645 = vmatpush.msra.mxu2 %v239_v61  ;;  %v271_v2 = vld [vmem:[%s5420_s1 + $0x300] sm:$0xff] }
  0x22   :  { %v397_v0 = vld [vmem:[%s5420_s1 + $0x6f0] sm:$0xff] }
  0x23   :  { %8 = vsyncpa [#allocation3], 0  ;;  %492 = vmatmul.f32.vlgmr.msra.gmra.mxu0 %v15_v62  ;;  %646 = vmatmul.f32.vlgmr.msra.gmra.mxu2 %v17_v63  ;;  %v18_v4 = vld [vmem:[%s5419_s0 + $0x18] sm:$0xff]  ;;  %v333_v5 = vld [vmem:[%s5420_s1 + $0x4f0] sm:$0xff]  ;;  %vm415_vm0 = vcmask 523264   ;;  %vm1708_vm1 = vcmask 556032  }
  0x24   :  { %938 = vmatpush.msrb.mxu2 %v397_v0  ;;  %568 = vmatpush.msra.mxu1 %v207_v1  ;;  %v413_v6 = vld [vmem:[%s5420_s1 + $0x770] sm:$0xff]  ;;  %v395_v8 = vld [vmem:[%s5420_s1 + $0x6e0] sm:$0xff]  ;;  %v24_v18 = vld [vmem:[%s5419_s0 + $0x48] sm:$0xff]  ;;  %s2575_s9 = sshll.u32 %s5422_s3, 4  ;;  %s2887_s10 = smov 256   ;;  %s2576_s9 = int_to_ptr.hbm [resolvable:$true] %s2575_s9 }
  0x25   :  { %v365_v7 = vld [vmem:[%s5420_s1 + $0x5f0] sm:$0xff]  ;;  %722 = vmatpush.msra.mxu3 %v271_v2  ;;  %569 = vmatmul.f32.vlgmr.msra.gmra.mxu1 %v16_v3  ;;  %v331_v9 = vld [vmem:[%s5420_s1 + $0x4e0] sm:$0xff]  ;;  %v26_v20 = vld [vmem:[%s5419_s0 + $0x58] sm:$0xff]  ;;  %s2888_s11 = smov 16  }
  0x26   :  { %723 = vmatmul.f32.vlgmr.msra.gmra.mxu3 %v18_v4  ;;  %784 = vmatpush.msrb.mxu0 %v333_v5  ;;  %v363_v10 = vld [vmem:[%s5420_s1 + $0x5e0] sm:$0xff]  ;;  %v393_v12 = vld [vmem:[%s5420_s1 + $0x6d0] sm:$0xff]  ;;  %v32_v28 = vld [vmem:[%s5419_s0 + $0x88] sm:$0xff] }
  0x27   :  { %v411_v11 = vld [vmem:[%s5420_s1 + $0x760] sm:$0xff]  ;;  %1023 = vmatpush.msrb.mxu3 %v413_v6  ;;  %861 = vmatpush.msrb.mxu1 %v365_v7  ;;  %v329_v13 = vld [vmem:[%s5420_s1 + $0x4d0] sm:$0xff]  ;;  %v34_v29 = vld [vmem:[%s5419_s0 + $0x98] sm:$0xff] }
  0x28   :  { %v23_v14 = vld [vmem:[%s5419_s0 + $0x40] sm:$0xff]  ;;  %v25_v15 = vld [vmem:[%s5419_s0 + $0x50] sm:$0xff]  ;;  %939 = vmatpush.msrb.mxu2 %v395_v8  ;;  %785 = vmatpush.msrb.mxu0 %v331_v9  ;;  %v40_v35 = vld [vmem:[%s5419_s0 + $0xc8] sm:$0xff] }
  0x29   :  { %862 = vmatpush.msrb.mxu1 %v363_v10  ;;  %1024 = vmatpush.msrb.mxu3 %v411_v11  ;;  %v361_v16 = vld [vmem:[%s5420_s1 + $0x5d0] sm:$0xff]  ;;  %v391_v17 = vld [vmem:[%s5420_s1 + $0x6c0] sm:$0xff]  ;;  %v42_v36 = vld [vmem:[%s5419_s0 + $0xd8] sm:$0xff] }
  0x2a   :  { %940 = vmatpush.msrb.mxu2 %v393_v12  ;;  %786 = vmatpush.msrb.mxu0 %v329_v13  ;;  %v327_v19 = vld [vmem:[%s5420_s1 + $0x4c0] sm:$0xff]  ;;  %v389_v22 = vld [vmem:[%s5420_s1 + $0x6b0] sm:$0xff]  ;;  %v48_v42 = vld [vmem:[%s5419_s0 + $0x108] sm:$0xff] }
  0x2b   :  { %495 = vmatmul.f32.gmra.mxu0 %v23_v14  ;;  %649 = vmatmul.f32.gmra.mxu2 %v25_v15  ;;  %v359_v21 = vld [vmem:[%s5420_s1 + $0x5c0] sm:$0xff]  ;;  %v325_v23 = vld [vmem:[%s5420_s1 + $0x4b0] sm:$0xff]  ;;  %v50_v43 = vld [vmem:[%s5419_s0 + $0x118] sm:$0xff] }
  0x2c   :  { %863 = vmatpush.msrb.mxu1 %v361_v16  ;;  %941 = vmatpush.msrb.mxu2 %v391_v17  ;;  %v409_v24 = vld [vmem:[%s5420_s1 + $0x750] sm:$0xff]  ;;  %v31_v26 = vld [vmem:[%s5419_s0 + $0x80] sm:$0xff]  ;;  %v56_v48 = vld [vmem:[%s5419_s0 + $0x148] sm:$0xff] }
  0x2d   :  { %572 = vmatmul.f32.gmra.mxu1 %v24_v18  ;;  %787 = vmatpush.msrb.mxu0 %v327_v19  ;;  %v357_v25 = vld [vmem:[%s5420_s1 + $0x5b0] sm:$0xff]  ;;  %v387_v30 = vld [vmem:[%s5420_s1 + $0x6a0] sm:$0xff]  ;;  %v58_v49 = vld [vmem:[%s5419_s0 + $0x158] sm:$0xff] }
  0x2e   :  { %726 = vmatmul.f32.gmra.mxu3 %v26_v20  ;;  %864 = vmatpush.msrb.mxu1 %v359_v21  ;;  %v33_v27 = vld [vmem:[%s5419_s0 + $0x90] sm:$0xff]  ;;  %v323_v31 = vld [vmem:[%s5420_s1 + $0x4a0] sm:$0xff]  ;;  %v64_v54 = vld [vmem:[%s5419_s0 + $0x188] sm:$0xff] }
  0x2f   :  { %942 = vmatpush.msrb.mxu2 %v389_v22  ;;  %788 = vmatpush.msrb.mxu0 %v325_v23  ;;  %v355_v32 = vld [vmem:[%s5420_s1 + $0x5a0] sm:$0xff]  ;;  %v41_v34 = vld [vmem:[%s5419_s0 + $0xd0] sm:$0xff]  ;;  %v66_v55 = vld [vmem:[%s5419_s0 + $0x198] sm:$0xff] }
  0x30   :  { %1025 = vmatpush.msrb.mxu3 %v409_v24  ;;  %865 = vmatpush.msrb.mxu1 %v357_v25  ;;  %v39_v33 = vld [vmem:[%s5419_s0 + $0xc0] sm:$0xff]  ;;  %v385_v37 = vld [vmem:[%s5420_s1 + $0x690] sm:$0xff]  ;;  %v72_v62 = vld [vmem:[%s5419_s0 + $0x1c8] sm:$0xff] }
  0x31   :  { %943 = vmatpush.msrb.mxu2 %v387_v30  ;;  %789 = vmatpush.msrb.mxu0 %v323_v31  ;;  %v321_v38 = vld [vmem:[%s5420_s1 + $0x490] sm:$0xff]  ;;  %v407_v39 = vld [vmem:[%s5420_s1 + $0x740] sm:$0xff]  ;;  %v74_v63 = vld [vmem:[%s5419_s0 + $0x1d8] sm:$0xff] }
  0x32   :  { %866 = vmatpush.msrb.mxu1 %v355_v32  ;;  %v47_v40 = vld [vmem:[%s5419_s0 + $0x100] sm:$0xff]  ;;  %v49_v41 = vld [vmem:[%s5419_s0 + $0x110] sm:$0xff]  ;;  %1026 = vmatpush.msrb.mxu3 %v407_v39  ;;  %v80_v5 = vld [vmem:[%s5419_s0 + $0x208] sm:$0xff] }
  0x33   :  { %498 = vmatmul.f32.gmra.mxu0 %v31_v26  ;;  %652 = vmatmul.f32.gmra.mxu2 %v33_v27  ;;  %v353_v44 = vld [vmem:[%s5420_s1 + $0x590] sm:$0xff]  ;;  %v383_v45 = vld [vmem:[%s5420_s1 + $0x680] sm:$0xff]  ;;  %v82_v6 = vld [vmem:[%s5419_s0 + $0x218] sm:$0xff] }
  0x34   :  { %944 = vmatpush.msrb.mxu2 %v385_v37  ;;  %790 = vmatpush.msrb.mxu0 %v321_v38  ;;  %v55_v46 = vld [vmem:[%s5419_s0 + $0x140] sm:$0xff]  ;;  %v57_v47 = vld [vmem:[%s5419_s0 + $0x150] sm:$0xff]  ;;  %v88_v12 = vld [vmem:[%s5419_s0 + $0x248] sm:$0xff] }
  0x35   :  { %575 = vmatmul.f32.gmra.mxu1 %v32_v28  ;;  %v319_v50 = vld [vmem:[%s5420_s1 + $0x480] sm:$0xff]  ;;  %v65_v53 = vld [vmem:[%s5419_s0 + $0x190] sm:$0xff]  ;;  %v90_v13 = vld [vmem:[%s5419_s0 + $0x258] sm:$0xff] }
  0x36   :  { %729 = vmatmul.f32.gmra.mxu3 %v34_v29  ;;  %867 = vmatpush.msrb.mxu1 %v353_v44  ;;  %v351_v51 = vld [vmem:[%s5420_s1 + $0x580] sm:$0xff]  ;;  %v381_v56 = vld [vmem:[%s5420_s1 + $0x670] sm:$0xff]  ;;  %v96_v18 = vld [vmem:[%s5419_s0 + $0x288] sm:$0xff] }
  0x37   :  { %945 = vmatpush.msrb.mxu2 %v383_v45  ;;  %791 = vmatpush.msrb.mxu0 %v319_v50  ;;  %v63_v52 = vld [vmem:[%s5419_s0 + $0x180] sm:$0xff]  ;;  %v317_v57 = vld [vmem:[%s5420_s1 + $0x470] sm:$0xff]  ;;  %v98_v19 = vld [vmem:[%s5419_s0 + $0x298] sm:$0xff] }
  0x38   :  { %868 = vmatpush.msrb.mxu1 %v351_v51  ;;  %v405_v58 = vld [vmem:[%s5420_s1 + $0x730] sm:$0xff]  ;;  %v71_v60 = vld [vmem:[%s5419_s0 + $0x1c0] sm:$0xff]  ;;  %v104_v24 = vld [vmem:[%s5419_s0 + $0x2c8] sm:$0xff] }
  0x39   :  { %946 = vmatpush.msrb.mxu2 %v381_v56  ;;  %v349_v59 = vld [vmem:[%s5420_s1 + $0x570] sm:$0xff]  ;;  %792 = vmatpush.msrb.mxu0 %v317_v57  ;;  %v379_v0 = vld [vmem:[%s5420_s1 + $0x660] sm:$0xff]  ;;  %v106_v25 = vld [vmem:[%s5419_s0 + $0x2d8] sm:$0xff] }
  0x3a   :  { %1027 = vmatpush.msrb.mxu3 %v405_v58  ;;  %v73_v61 = vld [vmem:[%s5419_s0 + $0x1d0] sm:$0xff]  ;;  %869 = vmatpush.msrb.mxu1 %v349_v59  ;;  %v315_v1 = vld [vmem:[%s5420_s1 + $0x460] sm:$0xff]  ;;  %v112_v32 = vld [vmem:[%s5419_s0 + $0x308] sm:$0xff] }
  0x3b   :  { %501 = vmatmul.f32.gmra.mxu0 %v39_v33  ;;  %655 = vmatmul.f32.gmra.mxu2 %v41_v34  ;;  %v347_v2 = vld [vmem:[%s5420_s1 + $0x560] sm:$0xff]  ;;  %v81_v4 = vld [vmem:[%s5419_s0 + $0x210] sm:$0xff]  ;;  %v114_v33 = vld [vmem:[%s5419_s0 + $0x318] sm:$0xff] }
  0x3c   :  { %947 = vmatpush.msrb.mxu2 %v379_v0  ;;  %793 = vmatpush.msrb.mxu0 %v315_v1  ;;  %v79_v3 = vld [vmem:[%s5419_s0 + $0x200] sm:$0xff]  ;;  %v377_v7 = vld [vmem:[%s5420_s1 + $0x650] sm:$0xff]  ;;  %v120_v38 = vld [vmem:[%s5419_s0 + $0x348] sm:$0xff] }
  0x3d   :  { %578 = vmatmul.f32.gmra.mxu1 %v40_v35  ;;  %v313_v8 = vld [vmem:[%s5420_s1 + $0x450] sm:$0xff]  ;;  %v403_v9 = vld [vmem:[%s5420_s1 + $0x720] sm:$0xff]  ;;  %v128_v44 = vld [vmem:[%s5419_s0 + $0x388] sm:$0xff] }
  0x3e   :  { %732 = vmatmul.f32.gmra.mxu3 %v42_v36  ;;  %870 = vmatpush.msrb.mxu1 %v347_v2  ;;  %v87_v10 = vld [vmem:[%s5419_s0 + $0x240] sm:$0xff]  ;;  %v89_v11 = vld [vmem:[%s5419_s0 + $0x250] sm:$0xff]  ;;  %v136_v51 = vld [vmem:[%s5419_s0 + $0x3c8] sm:$0xff] }
  0x3f   :  { %948 = vmatpush.msrb.mxu2 %v377_v7  ;;  %794 = vmatpush.msrb.mxu0 %v313_v8  ;;  %v345_v14 = vld [vmem:[%s5420_s1 + $0x550] sm:$0xff]  ;;  %v375_v15 = vld [vmem:[%s5420_s1 + $0x640] sm:$0xff]  ;;  %v206_v1 = vld [vmem:[%s5420_s1 + $0xf8] sm:$0xff] }
  0x40   :  { %1028 = vmatpush.msrb.mxu3 %v403_v9  ;;  %871 = vmatpush.msrb.mxu1 %v345_v14  ;;  %v95_v16 = vld [vmem:[%s5419_s0 + $0x280] sm:$0xff]  ;;  %v97_v17 = vld [vmem:[%s5419_s0 + $0x290] sm:$0xff]  ;;  %v302_v2 = vld [vmem:[%s5420_s1 + $0x3f8] sm:$0xff] }
  0x41   :  { %949 = vmatpush.msrb.mxu2 %v375_v15  ;;  %v311_v20 = vld [vmem:[%s5420_s1 + $0x440] sm:$0xff]  ;;  %v105_v23 = vld [vmem:[%s5419_s0 + $0x2d0] sm:$0xff]  ;;  %v268_v15 = vld [vmem:[%s5420_s1 + $0x2e8] sm:$0xff] }
  0x42   :  { %795 = vmatpush.msrb.mxu0 %v311_v20  ;;  %v343_v21 = vld [vmem:[%s5420_s1 + $0x540] sm:$0xff]  ;;  %v373_v26 = vld [vmem:[%s5420_s1 + $0x630] sm:$0xff] }
  0x43   :  { %504 = vmatmul.f32.gmra.mxu0 %v47_v40  ;;  %658 = vmatmul.f32.gmra.mxu2 %v49_v41  ;;  %v103_v22 = vld [vmem:[%s5419_s0 + $0x2c0] sm:$0xff]  ;;  %v309_v27 = vld [vmem:[%s5420_s1 + $0x430] sm:$0xff]  ;;  %v122_v40 = vld [vmem:[%s5419_s0 + $0x358] sm:$0xff] }
  0x44   :  { %872 = vmatpush.msrb.mxu1 %v343_v21  ;;  %950 = vmatpush.msrb.mxu2 %v373_v26  ;;  %v401_v28 = vld [vmem:[%s5420_s1 + $0x710] sm:$0xff]  ;;  %v111_v30 = vld [vmem:[%s5419_s0 + $0x300] sm:$0xff]  ;;  %v236_v26 = vld [vmem:[%s5420_s1 + $0x1e8] sm:$0xff] }
  0x45   :  { %581 = vmatmul.f32.gmra.mxu1 %v48_v42  ;;  %v341_v29 = vld [vmem:[%s5420_s1 + $0x530] sm:$0xff]  ;;  %796 = vmatpush.msrb.mxu0 %v309_v27  ;;  %v371_v34 = vld [vmem:[%s5420_s1 + $0x620] sm:$0xff]  ;;  %v162_v27 = vld [vmem:[%s5419_s0 + $0x498] sm:$0xff] }
  0x46   :  { %735 = vmatmul.f32.gmra.mxu3 %v50_v43  ;;  %v113_v31 = vld [vmem:[%s5419_s0 + $0x310] sm:$0xff]  ;;  %873 = vmatpush.msrb.mxu1 %v341_v29  ;;  %v307_v35 = vld [vmem:[%s5420_s1 + $0x420] sm:$0xff] }
  0x47   :  { %1029 = vmatpush.msrb.mxu3 %v401_v28  ;;  %951 = vmatpush.msrb.mxu2 %v371_v34  ;;  %v119_v36 = vld [vmem:[%s5419_s0 + $0x340] sm:$0xff]  ;;  %v121_v37 = vld [vmem:[%s5419_s0 + $0x350] sm:$0xff] }
  0x48   :  { %797 = vmatpush.msrb.mxu0 %v307_v35  ;;  %v339_v39 = vld [vmem:[%s5420_s1 + $0x520] sm:$0xff]  ;;  %v369_v41 = vld [vmem:[%s5420_s1 + $0x610] sm:$0xff] }
  0x49   :  { %874 = vmatpush.msrb.mxu1 %v339_v39  ;;  %v127_v42 = vld [vmem:[%s5419_s0 + $0x380] sm:$0xff]  ;;  %v129_v43 = vld [vmem:[%s5419_s0 + $0x390] sm:$0xff]  ;;  %952 = vmatpush.msrb.mxu2 %v369_v41  ;;  %v202_v39 = vld [vmem:[%s5420_s1 + $0xd8] sm:$0xff] }
  0x4a   :  { %v305_v45 = vld [vmem:[%s5420_s1 + $0x410] sm:$0xff]  ;;  %v143_v57 = vld [vmem:[%s5419_s0 + $0x400] sm:$0xff]  ;;  %v170_v41 = vld [vmem:[%s5419_s0 + $0x4d8] sm:$0xff] }
  0x4b   :  { %507 = vmatmul.f32.gmra.mxu0 %v55_v46  ;;  %661 = vmatmul.f32.gmra.mxu2 %v57_v47  ;;  %v399_v46 = vld [vmem:[%s5420_s1 + $0x700] sm:$0xff]  ;;  %v130_v47 = vld [vmem:[%s5419_s0 + $0x398] sm:$0xff]  ;;  %v137_v50 = vld [vmem:[%s5419_s0 + $0x3d0] sm:$0xff] }
  0x4c   :  { %798 = vmatpush.msrb.mxu0 %v305_v45  ;;  %1030 = vmatpush.msrb.mxu3 %v399_v46  ;;  %v145_v58 = vld [vmem:[%s5419_s0 + $0x410] sm:$0xff]  ;;  %v159_v20 = vld [vmem:[%s5419_s0 + $0x480] sm:$0xff] }
  0x4d   :  { %584 = vmatmul.f32.gmra.mxu1 %v56_v48  ;;  %v337_v48 = vld [vmem:[%s5420_s1 + $0x510] sm:$0xff] }
  0x4e   :  { %738 = vmatmul.f32.gmra.mxu3 %v58_v49  ;;  %875 = vmatpush.msrb.mxu1 %v337_v48  ;;  %v135_v49 = vld [vmem:[%s5419_s0 + $0x3c0] sm:$0xff]  ;;  %v153_v7 = vld [vmem:[%s5419_s0 + $0x450] sm:$0xff] }
  0x4f   :  { %1323 = vmatpush.msra.mxu3 %v302_v2  ;;  %v161_v21 = vld [vmem:[%s5419_s0 + $0x490] sm:$0xff] }
  0x50   :  { %v169_v34 = vld [vmem:[%s5419_s0 + $0x4d0] sm:$0xff] }
  0x51   :  { %v21_v48 = vld [vmem:[%s5419_s0 + $0x30] sm:$0xff] }
  0x53   :  { %510 = vmatmul.f32.gmra.mxu0 %v63_v52  ;;  %664 = vmatmul.f32.gmra.mxu2 %v65_v53  ;;  %v367_v52 = vld [vmem:[%s5420_s1 + $0x600] sm:$0xff]  ;;  %v138_v53 = vld [vmem:[%s5419_s0 + $0x3d8] sm:$0xff] }
  0x54   :  { %953 = vmatpush.msrb.mxu2 %v367_v52  ;;  %v20_v52 = vld [vmem:[%s5419_s0 + $0x28] sm:$0xff] }
  0x55   :  { %587 = vmatmul.f32.gmra.mxu1 %v64_v54  ;;  %v303_v54 = vld [vmem:[%s5420_s1 + $0x400] sm:$0xff] }
  0x56   :  { %741 = vmatmul.f32.gmra.mxu3 %v66_v55  ;;  %799 = vmatpush.msrb.mxu0 %v303_v54  ;;  %v335_v55 = vld [vmem:[%s5420_s1 + $0x500] sm:$0xff]  ;;  %v22_v54 = vld [vmem:[%s5419_s0 + $0x38] sm:$0xff] }
  0x57   :  { %876 = vmatpush.msrb.mxu1 %v335_v55  ;;  %v200_v55 = vld [vmem:[%s5420_s1 + $0xc8] sm:$0xff] }
  0x58   :  { %1092 = vmatpush.msra.mxu0 %v206_v1 }
  0x5b   :  { %513 = vmatmul.f32.gmra.mxu0 %v71_v60  ;;  %667 = vmatmul.f32.gmra.mxu2 %v73_v61  ;;  %v144_v60 = vld [vmem:[%s5419_s0 + $0x408] sm:$0xff]  ;;  %v146_v61 = vld [vmem:[%s5419_s0 + $0x418] sm:$0xff] }
  0x5d   :  { %590 = vmatmul.f32.gmra.mxu1 %v72_v62  ;;  %v270_v62 = vld [vmem:[%s5420_s1 + $0x2f8] sm:$0xff] }
  0x5e   :  { %744 = vmatmul.f32.gmra.mxu3 %v74_v63  ;;  %1246 = vmatpush.msra.mxu2 %v270_v62  ;;  %v27_v62 = vld [vmem:[%s5419_s0 + $0x60] sm:$0xff] }
  0x60   :  { %1247 = vmatpush.msra.mxu2 %v268_v15  ;;  %v37_v15 = vld [vmem:[%s5419_s0 + $0xb0] sm:$0xff] }
  0x63   :  { %516 = vmatmul.f32.gmra.mxu0 %v79_v3  ;;  %670 = vmatmul.f32.gmra.mxu2 %v81_v4  ;;  %v238_v4 = vld [vmem:[%s5420_s1 + $0x1f8] sm:$0xff] }
  0x64   :  { %1169 = vmatpush.msra.mxu1 %v238_v4  ;;  %v30_v4 = vld [vmem:[%s5419_s0 + $0x78] sm:$0xff] }
  0x65   :  { %593 = vmatmul.f32.gmra.mxu1 %v80_v5 }
  0x66   :  { %747 = vmatmul.f32.gmra.mxu3 %v82_v6  ;;  %v151_v6 = vld [vmem:[%s5419_s0 + $0x440] sm:$0xff]  ;;  %1170 = vmatpush.msra.mxu1 %v236_v26  ;;  %v196_v26 = vld [vmem:[%s5420_s1 + $0xa8] sm:$0xff] }
  0x6b   :  { %519 = vmatmul.f32.gmra.mxu0 %v87_v10  ;;  %673 = vmatmul.f32.gmra.mxu2 %v89_v11  ;;  %v152_v11 = vld [vmem:[%s5419_s0 + $0x448] sm:$0xff] }
  0x6d   :  { %596 = vmatmul.f32.gmra.mxu1 %v88_v12  ;;  %v154_v12 = vld [vmem:[%s5419_s0 + $0x458] sm:$0xff] }
  0x6e   :  { %750 = vmatmul.f32.gmra.mxu3 %v90_v13 }
  0x73   :  { %522 = vmatmul.f32.gmra.mxu0 %v95_v16  ;;  %676 = vmatmul.f32.gmra.mxu2 %v97_v17  ;;  %v204_v17 = vld [vmem:[%s5420_s1 + $0xe8] sm:$0xff] }
  0x74   :  { %1093 = vmatpush.msra.mxu0 %v204_v17 }
  0x75   :  { %599 = vmatmul.f32.gmra.mxu1 %v96_v18  ;;  %v300_v18 = vld [vmem:[%s5420_s1 + $0x3e8] sm:$0xff] }
  0x76   :  { %753 = vmatmul.f32.gmra.mxu3 %v98_v19  ;;  %1094 = vmatpush.msra.mxu0 %v202_v39 }
  0x77   :  { %1324 = vmatpush.msra.mxu3 %v300_v18 }
  0x78   :  { %1095 = vmatpush.msra.mxu0 %v200_v55 }
  0x7b   :  { %525 = vmatmul.f32.gmra.mxu0 %v103_v22  ;;  %679 = vmatmul.f32.gmra.mxu2 %v105_v23 }
  0x7d   :  { %602 = vmatmul.f32.gmra.mxu1 %v104_v24 }
  0x7e   :  { %756 = vmatmul.f32.gmra.mxu3 %v106_v25  ;;  %v160_v25 = vld [vmem:[%s5419_s0 + $0x488] sm:$0xff] }
  0x83   :  { %528 = vmatmul.f32.gmra.mxu0 %v111_v30  ;;  %682 = vmatmul.f32.gmra.mxu2 %v113_v31  ;;  %v266_v31 = vld [vmem:[%s5420_s1 + $0x2d8] sm:$0xff] }
  0x84   :  { %1248 = vmatpush.msra.mxu2 %v266_v31 }
  0x85   :  { %605 = vmatmul.f32.gmra.mxu1 %v112_v32 }
  0x86   :  { %759 = vmatmul.f32.gmra.mxu3 %v114_v33  ;;  %v167_v33 = vld [vmem:[%s5419_s0 + $0x4c0] sm:$0xff] }
  0x8b   :  { %531 = vmatmul.f32.gmra.mxu0 %v119_v36  ;;  %685 = vmatmul.f32.gmra.mxu2 %v121_v37 }
  0x8d   :  { %608 = vmatmul.f32.gmra.mxu1 %v120_v38  ;;  %v168_v38 = vld [vmem:[%s5419_s0 + $0x4c8] sm:$0xff] }
  0x8e   :  { %762 = vmatmul.f32.gmra.mxu3 %v122_v40  ;;  %v298_v40 = vld [vmem:[%s5420_s1 + $0x3d8] sm:$0xff] }
  0x8f   :  { %1325 = vmatpush.msra.mxu3 %v298_v40 }
  0x93   :  { %534 = vmatmul.f32.gmra.mxu0 %v127_v42  ;;  %688 = vmatmul.f32.gmra.mxu2 %v129_v43  ;;  %v234_v42 = vld [vmem:[%s5420_s1 + $0x1d8] sm:$0xff] }
  0x94   :  { %1171 = vmatpush.msra.mxu1 %v234_v42 }
  0x95   :  { %611 = vmatmul.f32.gmra.mxu1 %v128_v44 }
  0x96   :  { %765 = vmatmul.f32.gmra.mxu3 %v130_v47  ;;  %v19_v47 = vld [vmem:[%s5419_s0 + $0x20] sm:$0xff] }
  0x9b   :  { %537 = vmatmul.f32.gmra.mxu0 %v135_v49  ;;  %691 = vmatmul.f32.gmra.mxu2 %v137_v50 }
  0x9d   :  { %614 = vmatmul.f32.gmra.mxu1 %v136_v51 }
  0x9e   :  { %768 = vmatmul.f32.gmra.mxu3 %v138_v53  ;;  %v264_v53 = vld [vmem:[%s5420_s1 + $0x2c8] sm:$0xff] }
  0x9f   :  { %1249 = vmatpush.msra.mxu2 %v264_v53  ;;  %v226_v53 = vld [vmem:[%s5420_s1 + $0x198] sm:$0xff] }
  0xa0   :  { %v493_v56 = vpop.f32.mrf.mxu0 }
  0xa2   :  { %v570_v59 = vpop.f32.mrf.mxu1 }
  0xa3   :  { %540 = vmatmul.f32.gmra.mxu0 %v143_v57  ;;  %694 = vmatmul.f32.gmra.mxu2 %v145_v58  ;;  %v571_v63 = vadd.f32 %v570_v59, %v493_v56  ;;  %v296_v56 = vld [vmem:[%s5420_s1 + $0x3c8] sm:$0xff] }
  0xa4   :  { %1326 = vmatpush.msra.mxu3 %v296_v56  ;;  %v232_v59 = vld [vmem:[%s5420_s1 + $0x1c8] sm:$0xff] }
  0xa5   :  { %617 = vmatmul.f32.gmra.mxu1 %v144_v60 }
  0xa6   :  { %771 = vmatmul.f32.gmra.mxu3 %v146_v61  ;;  %v647_v0 = vpop.f32.mrf.mxu2  ;;  %1172 = vmatpush.msra.mxu1 %v232_v59  ;;  %v61_v59 = vld [vmem:[%s5419_s0 + $0x170] sm:$0xff] }
  0xa7   :  { %v648_v3 = vadd.f32 %v647_v0, %v571_v63  ;;  %v29_v63 = vld [vmem:[%s5419_s0 + $0x70] sm:$0xff] }
  0xa8   :  { %v496_v5 = vpop.f32.mrf.mxu0 }
  0xa9   :  { %v724_v8 = vpop.f32.mrf.mxu3 }
  0xaa   :  { %v3491_v9 = vadd.f32 %v724_v8, %v648_v3  ;;  %v573_v10 = vpop.f32.mrf.mxu1  ;;  %v28_v3 = vld [vmem:[%s5419_s0 + $0x68] sm:$0xff]  ;;  %v198_v8 = vld [vmem:[%s5420_s1 + $0xb8] sm:$0xff] }
  0xab   :  { %543 = vmatmul.f32.gmra.mxu0 %v151_v6  ;;  %697 = vmatmul.f32.gmra.mxu2 %v153_v7  ;;  %v574_v13 = vadd.f32 %v573_v10, %v496_v5  ;;  %v262_v5 = vld [vmem:[%s5420_s1 + $0x2b8] sm:$0xff] }
  0xac   :  { %1250 = vmatpush.msra.mxu2 %v262_v5  ;;  %v294_v10 = vld [vmem:[%s5420_s1 + $0x3b8] sm:$0xff]  ;;  %1096 = vmatpush.msra.mxu0 %v198_v8 }
  0xad   :  { %620 = vmatmul.f32.gmra.mxu1 %v152_v11  ;;  %1327 = vmatpush.msra.mxu3 %v294_v10 }
  0xae   :  { %774 = vmatmul.f32.gmra.mxu3 %v154_v12  ;;  %v650_v14 = vpop.f32.mrf.mxu2  ;;  %v230_v12 = vld [vmem:[%s5420_s1 + $0x1b8] sm:$0xff]  ;;  %1097 = vmatpush.msra.mxu0 %v196_v26 }
  0xaf   :  { %v651_v16 = vadd.f32 %v650_v14, %v574_v13  ;;  %v35_v14 = vld [vmem:[%s5419_s0 + $0xa0] sm:$0xff]  ;;  %1173 = vmatpush.msra.mxu1 %v230_v12  ;;  %v69_v12 = vld [vmem:[%s5419_s0 + $0x1b0] sm:$0xff]  ;;  %v222_v26 = vld [vmem:[%s5420_s1 + $0x178] sm:$0xff] }
  0xb0   :  { %v499_v19 = vpop.f32.mrf.mxu0 }
  0xb1   :  { %v727_v22 = vpop.f32.mrf.mxu3 }
  0xb2   :  { %v3514_v23 = vadd.f32 %v727_v22, %v651_v16  ;;  %v576_v24 = vpop.f32.mrf.mxu1 }
  0xb3   :  { %546 = vmatmul.f32.gmra.mxu0 %v159_v20  ;;  %700 = vmatmul.f32.gmra.mxu2 %v161_v21  ;;  %v577_v28 = vadd.f32 %v576_v24, %v499_v19  ;;  %v36_v19 = vld [vmem:[%s5419_s0 + $0xa8] sm:$0xff]  ;;  %v38_v20 = vld [vmem:[%s5419_s0 + $0xb8] sm:$0xff] }
  0xb4   :  { %v260_v24 = vld [vmem:[%s5420_s1 + $0x2a8] sm:$0xff] }
  0xb5   :  { %623 = vmatmul.f32.gmra.mxu1 %v160_v25  ;;  %1251 = vmatpush.msra.mxu2 %v260_v24  ;;  %v286_v24 = vld [vmem:[%s5420_s1 + $0x378] sm:$0xff] }
  0xb6   :  { %777 = vmatmul.f32.gmra.mxu3 %v162_v27  ;;  %v653_v29 = vpop.f32.mrf.mxu2  ;;  %v292_v27 = vld [vmem:[%s5420_s1 + $0x3a8] sm:$0xff] }
  0xb7   :  { %v654_v30 = vadd.f32 %v653_v29, %v577_v28  ;;  %v43_v29 = vld [vmem:[%s5419_s0 + $0xe0] sm:$0xff]  ;;  %1328 = vmatpush.msra.mxu3 %v292_v27 }
  0xb8   :  { %v502_v32 = vpop.f32.mrf.mxu0 }
  0xb9   :  { %v730_v35 = vpop.f32.mrf.mxu3 }
  0xba   :  { %v3534_v36 = vadd.f32 %v730_v35, %v654_v30  ;;  %v579_v37 = vpop.f32.mrf.mxu1  ;;  %v45_v30 = vld [vmem:[%s5419_s0 + $0xf0] sm:$0xff]  ;;  %v228_v35 = vld [vmem:[%s5420_s1 + $0x1a8] sm:$0xff] }
  0xbb   :  { %549 = vmatmul.f32.gmra.mxu0 %v167_v33  ;;  %703 = vmatmul.f32.gmra.mxu2 %v169_v34  ;;  %v580_v43 = vadd.f32 %v579_v37, %v502_v32  ;;  %v44_v34 = vld [vmem:[%s5419_s0 + $0xe8] sm:$0xff]  ;;  %v46_v37 = vld [vmem:[%s5419_s0 + $0xf8] sm:$0xff] }
  0xbc   :  { %1174 = vmatpush.msra.mxu1 %v228_v35  ;;  %v78_v35 = vld [vmem:[%s5419_s0 + $0x1f8] sm:$0xff] }
  0xbd   :  { %626 = vmatmul.f32.gmra.mxu1 %v168_v38 }
  0xbe   :  { %780 = vmatmul.f32.gmra.mxu3 %v170_v41  ;;  %v656_v44 = vpop.f32.mrf.mxu2  ;;  %v258_v41 = vld [vmem:[%s5420_s1 + $0x298] sm:$0xff]  ;;  %1175 = vmatpush.msra.mxu1 %v226_v53 }
  0xbf   :  { %v657_v45 = vadd.f32 %v656_v44, %v580_v43  ;;  %v51_v43 = vld [vmem:[%s5419_s0 + $0x120] sm:$0xff]  ;;  %v53_v44 = vld [vmem:[%s5419_s0 + $0x130] sm:$0xff]  ;;  %1252 = vmatpush.msra.mxu2 %v258_v41  ;;  %v188_v41 = vld [vmem:[%s5420_s1 + $0x68] sm:$0xff] }
  0xc0   :  { %v505_v46 = vpop.f32.mrf.mxu0  ;;  %v86_v53 = vld [vmem:[%s5419_s0 + $0x238] sm:$0xff] }
  0xc1   :  { %v733_v49 = vpop.f32.mrf.mxu3 }
  0xc2   :  { %v3557_v50 = vadd.f32 %v733_v49, %v657_v45  ;;  %v582_v51 = vpop.f32.mrf.mxu1  ;;  %v194_v49 = vld [vmem:[%s5420_s1 + $0x98] sm:$0xff] }
  0xc3   :  { %800 = vmatmul.f32.vlgmr.msrb.gmra.mxu0 %v19_v47  ;;  %954 = vmatmul.f32.vlgmr.msrb.gmra.mxu2 %v21_v48  ;;  %v583_v57 = vadd.f32 %v582_v51, %v505_v46  ;;  %v52_v48 = vld [vmem:[%s5419_s0 + $0x128] sm:$0xff]  ;;  %v290_v51 = vld [vmem:[%s5420_s1 + $0x398] sm:$0xff] }
  0xc4   :  { %1098 = vmatpush.msra.mxu0 %v194_v49  ;;  %1329 = vmatpush.msra.mxu3 %v290_v51  ;;  %v84_v51 = vld [vmem:[%s5419_s0 + $0x228] sm:$0xff] }
  0xc5   :  { %877 = vmatmul.f32.vlgmr.msrb.gmra.mxu1 %v20_v52  ;;  %v54_v52 = vld [vmem:[%s5419_s0 + $0x138] sm:$0xff] }
  0xc6   :  { %2587 = vmatmul.msk.f32.vlgmr.msrb.gmra.mxu3 %vm415_vm0, %v22_v54  ;;  %v659_v58 = vpop.f32.mrf.mxu2 }
  0xc7   :  { %v660_v60 = vadd.f32 %v659_v58, %v583_v57  ;;  %v59_v58 = vld [vmem:[%s5419_s0 + $0x160] sm:$0xff] }
  0xc8   :  { %v508_v61 = vpop.f32.mrf.mxu0 }
  0xc9   :  { %v736_v0 = vpop.f32.mrf.mxu3 }
  0xca   :  { %v3584_v1 = vadd.f32 %v736_v0, %v660_v60  ;;  %v585_v2 = vpop.f32.mrf.mxu1  ;;  %v256_v0 = vld [vmem:[%s5420_s1 + $0x288] sm:$0xff] }
  0xcb   :  { %803 = vmatmul.f32.gmra.mxu0 %v27_v62  ;;  %957 = vmatmul.f32.gmra.mxu2 %v29_v63  ;;  %v586_v6 = vadd.f32 %v585_v2, %v508_v61  ;;  %v60_v63 = vld [vmem:[%s5419_s0 + $0x168] sm:$0xff]  ;;  %v62_v2 = vld [vmem:[%s5419_s0 + $0x178] sm:$0xff] }
  0xcc   :  { %1253 = vmatpush.msra.mxu2 %v256_v0 }
  0xcd   :  { %880 = vmatmul.f32.gmra.mxu1 %v28_v3  ;;  %v192_v3 = vld [vmem:[%s5420_s1 + $0x88] sm:$0xff] }
  0xce   :  { %2588 = vmatmul.msk.f32.gmra.mxu3 %vm415_vm0, %v30_v4  ;;  %v662_v7 = vpop.f32.mrf.mxu2  ;;  %1099 = vmatpush.msra.mxu0 %v192_v3  ;;  %v288_v4 = vld [vmem:[%s5420_s1 + $0x388] sm:$0xff]  ;;  %v186_v3 = vld [vmem:[%s5420_s1 + $0x58] sm:$0xff] }
  0xcf   :  { %v663_v11 = vadd.f32 %v662_v7, %v586_v6  ;;  %1330 = vmatpush.msra.mxu3 %v288_v4  ;;  %v224_v7 = vld [vmem:[%s5420_s1 + $0x188] sm:$0xff]  ;;  %v282_v4 = vld [vmem:[%s5420_s1 + $0x358] sm:$0xff] }
  0xd0   :  { %v511_v13 = vpop.f32.mrf.mxu0  ;;  %1176 = vmatpush.msra.mxu1 %v224_v7 }
  0xd1   :  { %v739_v16 = vpop.f32.mrf.mxu3  ;;  %1331 = vmatpush.msra.mxu3 %v286_v24  ;;  %v280_v24 = vld [vmem:[%s5420_s1 + $0x348] sm:$0xff] }
  0xd2   :  { %v3611_v17 = vadd.f32 %v739_v16, %v663_v11  ;;  %v588_v18 = vpop.f32.mrf.mxu1  ;;  %v67_v11 = vld [vmem:[%s5419_s0 + $0x1a0] sm:$0xff]  ;;  %v68_v16 = vld [vmem:[%s5419_s0 + $0x1a8] sm:$0xff]  ;;  %1177 = vmatpush.msra.mxu1 %v222_v26 }
  0xd3   :  { %806 = vmatmul.f32.gmra.mxu0 %v35_v14  ;;  %960 = vmatmul.f32.gmra.mxu2 %v37_v15  ;;  %v589_v21 = vadd.f32 %v588_v18, %v511_v13  ;;  %v70_v18 = vld [vmem:[%s5419_s0 + $0x1b8] sm:$0xff] }
  0xd5   :  { %883 = vmatmul.f32.gmra.mxu1 %v36_v19  ;;  %v254_v19 = vld [vmem:[%s5420_s1 + $0x278] sm:$0xff] }
  0xd6   :  { %2589 = vmatmul.msk.f32.gmra.mxu3 %vm415_vm0, %v38_v20  ;;  %v665_v22 = vpop.f32.mrf.mxu2  ;;  %1254 = vmatpush.msra.mxu2 %v254_v19  ;;  %v100_v19 = vld [vmem:[%s5419_s0 + $0x2a8] sm:$0xff] }
  0xd7   :  { %v666_v25 = vadd.f32 %v665_v22, %v589_v21  ;;  %v190_v22 = vld [vmem:[%s5420_s1 + $0x78] sm:$0xff] }
  0xd8   :  { %v514_v28 = vpop.f32.mrf.mxu0  ;;  %1100 = vmatpush.msra.mxu0 %v190_v22  ;;  %v184_v22 = vld [vmem:[%s5420_s1 + $0x48] sm:$0xff] }
  0xd9   :  { %v742_v31 = vpop.f32.mrf.mxu3 }
  0xda   :  { %v3635_v32 = vadd.f32 %v742_v31, %v666_v25  ;;  %v591_v33 = vpop.f32.mrf.mxu1  ;;  %1101 = vmatpush.msra.mxu0 %v188_v41 }
  0xdb   :  { %809 = vmatmul.f32.gmra.mxu0 %v43_v29  ;;  %963 = vmatmul.f32.gmra.mxu2 %v45_v30  ;;  %v592_v38 = vadd.f32 %v591_v33, %v514_v28  ;;  %v75_v28 = vld [vmem:[%s5419_s0 + $0x1e0] sm:$0xff]  ;;  %v77_v29 = vld [vmem:[%s5419_s0 + $0x1f0] sm:$0xff] }
  0xdc   :  { %1102 = vmatpush.msra.mxu0 %v186_v3 }
  0xdd   :  { %886 = vmatmul.f32.gmra.mxu1 %v44_v34  ;;  %v76_v34 = vld [vmem:[%s5419_s0 + $0x1e8] sm:$0xff] }
  0xde   :  { %2590 = vmatmul.msk.f32.gmra.mxu3 %vm415_vm0, %v46_v37  ;;  %v668_v39 = vpop.f32.mrf.mxu2  ;;  %1103 = vmatpush.msra.mxu0 %v184_v22  ;;  %v133_v22 = vld [vmem:[%s5419_s0 + $0x3b0] sm:$0xff] }
  0xdf   :  { %v669_v40 = vadd.f32 %v668_v39, %v592_v38  ;;  %v252_v39 = vld [vmem:[%s5420_s1 + $0x268] sm:$0xff] }
  0xe0   :  { %v517_v42 = vpop.f32.mrf.mxu0  ;;  %1255 = vmatpush.msra.mxu2 %v252_v39  ;;  %v110_v39 = vld [vmem:[%s5419_s0 + $0x2f8] sm:$0xff] }
  0xe1   :  { %v745_v45 = vpop.f32.mrf.mxu3 }
  0xe2   :  { %v3656_v46 = vadd.f32 %v745_v45, %v669_v40  ;;  %v594_v47 = vpop.f32.mrf.mxu1  ;;  %v85_v45 = vld [vmem:[%s5419_s0 + $0x230] sm:$0xff] }
  0xe3   :  { %812 = vmatmul.f32.gmra.mxu0 %v51_v43  ;;  %966 = vmatmul.f32.gmra.mxu2 %v53_v44  ;;  %v595_v54 = vadd.f32 %v594_v47, %v517_v42  ;;  %v284_v42 = vld [vmem:[%s5420_s1 + $0x368] sm:$0xff]  ;;  %v83_v44 = vld [vmem:[%s5419_s0 + $0x220] sm:$0xff] }
  0xe4   :  { %1332 = vmatpush.msra.mxu3 %v284_v42 }
  0xe5   :  { %889 = vmatmul.f32.gmra.mxu1 %v52_v48 }
  0xe6   :  { %2591 = vmatmul.msk.f32.gmra.mxu3 %vm415_vm0, %v54_v52  ;;  %v671_v55 = vpop.f32.mrf.mxu2  ;;  %v220_v52 = vld [vmem:[%s5420_s1 + $0x168] sm:$0xff] }
  0xe7   :  { %v672_v56 = vadd.f32 %v671_v55, %v595_v54  ;;  %1178 = vmatpush.msra.mxu1 %v220_v52  ;;  %1333 = vmatpush.msra.mxu3 %v282_v4  ;;  %v117_v52 = vld [vmem:[%s5419_s0 + $0x330] sm:$0xff]  ;;  %v123_v4 = vld [vmem:[%s5419_s0 + $0x360] sm:$0xff] }
  0xe8   :  { %v520_v57 = vpop.f32.mrf.mxu0 }
  0xe9   :  { %v748_v60 = vpop.f32.mrf.mxu3  ;;  %1334 = vmatpush.msra.mxu3 %v280_v24 }
  0xea   :  { %v3680_v61 = vadd.f32 %v748_v60, %v672_v56  ;;  %v597_v62 = vpop.f32.mrf.mxu1  ;;  %v93_v60 = vld [vmem:[%s5419_s0 + $0x270] sm:$0xff] }
  0xeb   :  { %815 = vmatmul.f32.gmra.mxu0 %v59_v58  ;;  %969 = vmatmul.f32.gmra.mxu2 %v61_v59  ;;  %v598_v5 = vadd.f32 %v597_v62, %v520_v57  ;;  %v250_v57 = vld [vmem:[%s5420_s1 + $0x258] sm:$0xff]  ;;  %v91_v59 = vld [vmem:[%s5419_s0 + $0x260] sm:$0xff] }
  0xec   :  { %1256 = vmatpush.msra.mxu2 %v250_v57  ;;  %v118_v57 = vld [vmem:[%s5419_s0 + $0x338] sm:$0xff] }
  0xed   :  { %892 = vmatmul.f32.gmra.mxu1 %v60_v63 }
  0xee   :  { %2592 = vmatmul.msk.f32.gmra.mxu3 %vm415_vm0, %v62_v2  ;;  %v674_v6 = vpop.f32.mrf.mxu2  ;;  %v92_v2 = vld [vmem:[%s5419_s0 + $0x268] sm:$0xff] }
  0xef   :  { %v675_v8 = vadd.f32 %v674_v6, %v598_v5  ;;  %v94_v5 = vld [vmem:[%s5419_s0 + $0x278] sm:$0xff] }
  0xf0   :  { %v523_v10 = vpop.f32.mrf.mxu0  ;;  %v218_v6 = vld [vmem:[%s5420_s1 + $0x158] sm:$0xff] }
  0xf1   :  { %v751_v13 = vpop.f32.mrf.mxu3  ;;  %1179 = vmatpush.msra.mxu1 %v218_v6 }
  0xf2   :  { %v3707_v14 = vadd.f32 %v751_v13, %v675_v8  ;;  %v600_v15 = vpop.f32.mrf.mxu1  ;;  %v101_v13 = vld [vmem:[%s5419_s0 + $0x2b0] sm:$0xff] }
  0xf3   :  { %818 = vmatmul.f32.gmra.mxu0 %v67_v11  ;;  %972 = vmatmul.f32.gmra.mxu2 %v69_v12  ;;  %v601_v20 = vadd.f32 %v600_v15, %v523_v10  ;;  %v99_v12 = vld [vmem:[%s5419_s0 + $0x2a0] sm:$0xff] }
  0xf5   :  { %895 = vmatmul.f32.gmra.mxu1 %v68_v16 }
  0xf6   :  { %2593 = vmatmul.msk.f32.gmra.mxu3 %vm415_vm0, %v70_v18  ;;  %v677_v21 = vpop.f32.mrf.mxu2 }
  0xf7   :  { %v678_v25 = vadd.f32 %v677_v21, %v601_v20  ;;  %v248_v20 = vld [vmem:[%s5420_s1 + $0x248] sm:$0xff]  ;;  %v102_v21 = vld [vmem:[%s5419_s0 + $0x2b8] sm:$0xff] }
  0xf8   :  { %v526_v27 = vpop.f32.mrf.mxu0  ;;  %1257 = vmatpush.msra.mxu2 %v248_v20 }
  0xf9   :  { %v754_v30 = vpop.f32.mrf.mxu3 }
  0xfa   :  { %v3734_v31 = vadd.f32 %v754_v30, %v678_v25  ;;  %v603_v33 = vpop.f32.mrf.mxu1  ;;  %v107_v30 = vld [vmem:[%s5419_s0 + $0x2e0] sm:$0xff] }
  0xfb   :  { %821 = vmatmul.f32.gmra.mxu0 %v75_v28  ;;  %975 = vmatmul.f32.gmra.mxu2 %v77_v29  ;;  %v604_v37 = vadd.f32 %v603_v33, %v526_v27  ;;  %v216_v27 = vld [vmem:[%s5420_s1 + $0x148] sm:$0xff]  ;;  %v109_v33 = vld [vmem:[%s5419_s0 + $0x2f0] sm:$0xff] }
  0xfc   :  { %1180 = vmatpush.msra.mxu1 %v216_v27  ;;  %v132_v27 = vld [vmem:[%s5419_s0 + $0x3a8] sm:$0xff] }
  0xfd   :  { %898 = vmatmul.f32.gmra.mxu1 %v76_v34 }
  0xfe   :  { %2594 = vmatmul.msk.f32.gmra.mxu3 %vm415_vm0, %v78_v35  ;;  %v680_v38 = vpop.f32.mrf.mxu2 }
  0xff   :  { %v681_v40 = vadd.f32 %v680_v38, %v604_v37  ;;  %v108_v38 = vld [vmem:[%s5419_s0 + $0x2e8] sm:$0xff] }
 0x100   :  { %v529_v43 = vpop.f32.mrf.mxu0 }
 0x101   :  { %v757_v47 = vpop.f32.mrf.mxu3 }
 0x102   :  { %v3758_v48 = vadd.f32 %v757_v47, %v681_v40  ;;  %v606_v49 = vpop.f32.mrf.mxu1  ;;  %v246_v40 = vld [vmem:[%s5420_s1 + $0x238] sm:$0xff] }
 0x103   :  { %824 = vmatmul.f32.gmra.mxu0 %v83_v44  ;;  %978 = vmatmul.f32.gmra.mxu2 %v85_v45  ;;  %v607_v54 = vadd.f32 %v606_v49, %v529_v43  ;;  %v182_v43 = vld [vmem:[%s5420_s1 + $0x38] sm:$0xff] }
 0x104   :  { %1258 = vmatpush.msra.mxu2 %v246_v40  ;;  %v278_v44 = vld [vmem:[%s5420_s1 + $0x338] sm:$0xff]  ;;  %1104 = vmatpush.msra.mxu0 %v182_v43  ;;  %v139_v40 = vld [vmem:[%s5419_s0 + $0x3e0] sm:$0xff] }
 0x105   :  { %901 = vmatmul.f32.gmra.mxu1 %v84_v51  ;;  %1335 = vmatpush.msra.mxu3 %v278_v44  ;;  %v214_v47 = vld [vmem:[%s5420_s1 + $0x138] sm:$0xff]  ;;  %v115_v51 = vld [vmem:[%s5419_s0 + $0x320] sm:$0xff] }
 0x106   :  { %2595 = vmatmul.msk.f32.gmra.mxu3 %vm415_vm0, %v86_v53  ;;  %v683_v55 = vpop.f32.mrf.mxu2  ;;  %1181 = vmatpush.msra.mxu1 %v214_v47  ;;  %v240_v47 = vld [vmem:[%s5420_s1 + $0x208] sm:$0xff] }
 0x107   :  { %v684_v56 = vadd.f32 %v683_v55, %v607_v54 }
 0x108   :  { %v532_v58 = vpop.f32.mrf.mxu0 }
 0x109   :  { %v760_v62 = vpop.f32.mrf.mxu3 }
 0x10a   :  { %v3779_v63 = vadd.f32 %v760_v62, %v684_v56  ;;  %v609_v0 = vpop.f32.mrf.mxu1  ;;  %v116_v56 = vld [vmem:[%s5419_s0 + $0x328] sm:$0xff] }
 0x10b   :  { %827 = vmatmul.f32.gmra.mxu0 %v91_v59  ;;  %981 = vmatmul.f32.gmra.mxu2 %v93_v60  ;;  %v610_v7 = vadd.f32 %v609_v0, %v532_v58  ;;  %v244_v60 = vld [vmem:[%s5420_s1 + $0x228] sm:$0xff] }
 0x10c   :  { %1259 = vmatpush.msra.mxu2 %v244_v60  ;;  %v180_v0 = vld [vmem:[%s5420_s1 + $0x28] sm:$0xff]  ;;  %v149_v60 = vld [vmem:[%s5419_s0 + $0x430] sm:$0xff] }
 0x10d   :  { %904 = vmatmul.f32.gmra.mxu1 %v92_v2  ;;  %v276_v2 = vld [vmem:[%s5420_s1 + $0x328] sm:$0xff]  ;;  %1105 = vmatpush.msra.mxu0 %v180_v0 }
 0x10e   :  { %2596 = vmatmul.msk.f32.gmra.mxu3 %vm415_vm0, %v94_v5  ;;  %v686_v8 = vpop.f32.mrf.mxu2  ;;  %v125_v5 = vld [vmem:[%s5419_s0 + $0x370] sm:$0xff] }
 0x10f   :  { %v687_v10 = vadd.f32 %v686_v8, %v610_v7  ;;  %1336 = vmatpush.msra.mxu3 %v276_v2 }
 0x110   :  { %v535_v11 = vpop.f32.mrf.mxu0 }
 0x111   :  { %v763_v15 = vpop.f32.mrf.mxu3 }
 0x112   :  { %v3803_v16 = vadd.f32 %v763_v15, %v687_v10  ;;  %v612_v18 = vpop.f32.mrf.mxu1  ;;  %v124_v10 = vld [vmem:[%s5419_s0 + $0x368] sm:$0xff] }
 0x113   :  { %830 = vmatmul.f32.gmra.mxu0 %v99_v12  ;;  %984 = vmatmul.f32.gmra.mxu2 %v101_v13  ;;  %v613_v25 = vadd.f32 %v612_v18, %v535_v11  ;;  %v212_v11 = vld [vmem:[%s5420_s1 + $0x128] sm:$0xff]  ;;  %v126_v12 = vld [vmem:[%s5419_s0 + $0x378] sm:$0xff] }
 0x114   :  { %1182 = vmatpush.msra.mxu1 %v212_v11  ;;  %v414_v11 = vld [vmem:[%s5420_s1 + $0x778] sm:$0xff] }
 0x115   :  { %907 = vmatmul.f32.gmra.mxu1 %v100_v19  ;;  %v242_v19 = vld [vmem:[%s5420_s1 + $0x218] sm:$0xff] }
 0x116   :  { %2597 = vmatmul.msk.f32.gmra.mxu3 %vm415_vm0, %v102_v21  ;;  %v689_v26 = vpop.f32.mrf.mxu2  ;;  %v131_v21 = vld [vmem:[%s5419_s0 + $0x3a0] sm:$0xff]  ;;  %1260 = vmatpush.msra.mxu2 %v242_v19  ;;  %v157_v19 = vld [vmem:[%s5419_s0 + $0x470] sm:$0xff] }
 0x117   :  { %v690_v28 = vadd.f32 %v689_v26, %v613_v25 }
 0x118   :  { %v538_v29 = vpop.f32.mrf.mxu0  ;;  %1261 = vmatpush.msra.mxu2 %v240_v47  ;;  %v166_v47 = vld [vmem:[%s5419_s0 + $0x4b8] sm:$0xff] }
 0x119   :  { %v766_v34 = vpop.f32.mrf.mxu3 }
 0x11a   :  { %v3830_v35 = vadd.f32 %v766_v34, %v690_v28  ;;  %v615_v37 = vpop.f32.mrf.mxu1  ;;  %v178_v28 = vld [vmem:[%s5420_s1 + $0x18] sm:$0xff] }
 0x11b   :  { %833 = vmatmul.f32.gmra.mxu0 %v107_v30  ;;  %987 = vmatmul.f32.gmra.mxu2 %v109_v33  ;;  %v616_v41 = vadd.f32 %v615_v37, %v538_v29  ;;  %v274_v29 = vld [vmem:[%s5420_s1 + $0x318] sm:$0xff] }
 0x11c   :  { %v134_v30 = vld [vmem:[%s5419_s0 + $0x3b8] sm:$0xff]  ;;  %1106 = vmatpush.msra.mxu0 %v178_v28  ;;  %1337 = vmatpush.msra.mxu3 %v274_v29 }
 0x11d   :  { %910 = vmatmul.f32.gmra.mxu1 %v108_v38  ;;  %v210_v33 = vld [vmem:[%s5420_s1 + $0x118] sm:$0xff] }
 0x11e   :  { %2598 = vmatmul.msk.f32.gmra.mxu3 %vm415_vm0, %v110_v39  ;;  %v692_v42 = vpop.f32.mrf.mxu2  ;;  %1183 = vmatpush.msra.mxu1 %v210_v33  ;;  %v332_v33 = vld [vmem:[%s5420_s1 + $0x4e8] sm:$0xff] }
 0x11f   :  { %v693_v45 = vadd.f32 %v692_v42, %v616_v41  ;;  %v141_v41 = vld [vmem:[%s5419_s0 + $0x3f0] sm:$0xff] }
 0x120   :  { %v541_v49 = vpop.f32.mrf.mxu0 }
 0x121   :  { %v769_v53 = vpop.f32.mrf.mxu3 }
 0x122   :  { %v3857_v54 = vadd.f32 %v769_v53, %v693_v45  ;;  %v618_v55 = vpop.f32.mrf.mxu1  ;;  %v140_v45 = vld [vmem:[%s5419_s0 + $0x3e8] sm:$0xff] }
 0x123   :  { %836 = vmatmul.f32.gmra.mxu0 %v115_v51  ;;  %990 = vmatmul.f32.gmra.mxu2 %v117_v52  ;;  %v619_v58 = vadd.f32 %v618_v55, %v541_v49  ;;  %v142_v49 = vld [vmem:[%s5419_s0 + $0x3f8] sm:$0xff]  ;;  %v176_v51 = vld [vmem:[%s5420_s1 + $0x8] sm:$0xff] }
 0x124   :  { %1107 = vmatpush.msra.mxu0 %v176_v51  ;;  %v272_v52 = vld [vmem:[%s5420_s1 + $0x308] sm:$0xff] }
 0x125   :  { %913 = vmatmul.f32.gmra.mxu1 %v116_v56  ;;  %1338 = vmatpush.msra.mxu3 %v272_v52  ;;  %v208_v56 = vld [vmem:[%s5420_s1 + $0x108] sm:$0xff]  ;;  %v394_v52 = vld [vmem:[%s5420_s1 + $0x6d8] sm:$0xff] }
 0x126   :  { %2599 = vmatmul.msk.f32.gmra.mxu3 %vm415_vm0, %v118_v57  ;;  %v695_v59 = vpop.f32.mrf.mxu2  ;;  %1184 = vmatpush.msra.mxu1 %v208_v56  ;;  %v173_v56 = vld [vmem:[%s5419_s0 + $0x4f0] sm:$0xff] }
 0x127   :  { %v696_v62 = vadd.f32 %v695_v59, %v619_v58  ;;  %v147_v59 = vld [vmem:[%s5419_s0 + $0x420] sm:$0xff]  ;;  %1639 = vmatpush.msrb.mxu3 %v414_v11 }
 0x128   :  { %v544_v3 = vpop.f32.mrf.mxu0 }
 0x129   :  { %v772_v6 = vpop.f32.mrf.mxu3 }
 0x12a   :  { %v3881_v7 = vadd.f32 %v772_v6, %v696_v62  ;;  %v621_v8 = vpop.f32.mrf.mxu1  ;;  %v398_v6 = vld [vmem:[%s5420_s1 + $0x6f8] sm:$0xff] }
 0x12b   :  { %839 = vmatmul.f32.gmra.mxu0 %v123_v4  ;;  %993 = vmatmul.f32.gmra.mxu2 %v125_v5  ;;  %v622_v13 = vadd.f32 %v621_v8, %v544_v3  ;;  %v148_v4 = vld [vmem:[%s5419_s0 + $0x428] sm:$0xff]  ;;  %v150_v5 = vld [vmem:[%s5419_s0 + $0x438] sm:$0xff] }
 0x12c   :  { %1554 = vmatpush.msrb.mxu2 %v398_v6 }
 0x12d   :  { %916 = vmatmul.f32.gmra.mxu1 %v124_v10  ;;  %v334_v10 = vld [vmem:[%s5420_s1 + $0x4f8] sm:$0xff] }
 0x12e   :  { %2600 = vmatmul.msk.f32.gmra.mxu3 %vm415_vm0, %v126_v12  ;;  %v698_v15 = vpop.f32.mrf.mxu2  ;;  %1400 = vmatpush.msrb.mxu0 %v334_v10 }
 0x12f   :  { %v699_v18 = vadd.f32 %v698_v15, %v622_v13  ;;  %v366_v13 = vld [vmem:[%s5420_s1 + $0x5f8] sm:$0xff] }
 0x130   :  { %v547_v20 = vpop.f32.mrf.mxu0  ;;  %1477 = vmatpush.msrb.mxu1 %v366_v13  ;;  %1401 = vmatpush.msrb.mxu0 %v332_v33 }
 0x131   :  { %v775_v24 = vpop.f32.mrf.mxu3 }
 0x132   :  { %v3902_v25 = vadd.f32 %v775_v24, %v699_v18  ;;  %v624_v26 = vpop.f32.mrf.mxu1  ;;  %v155_v18 = vld [vmem:[%s5419_s0 + $0x460] sm:$0xff] }
 0x133   :  { %842 = vmatmul.f32.gmra.mxu0 %v131_v21  ;;  %996 = vmatmul.f32.gmra.mxu2 %v133_v22  ;;  %v625_v34 = vadd.f32 %v624_v26, %v547_v20  ;;  %v156_v26 = vld [vmem:[%s5419_s0 + $0x468] sm:$0xff] }
 0x135   :  { %919 = vmatmul.f32.gmra.mxu1 %v132_v27  ;;  %v158_v27 = vld [vmem:[%s5419_s0 + $0x478] sm:$0xff] }
 0x136   :  { %2601 = vmatmul.msk.f32.gmra.mxu3 %vm415_vm0, %v134_v30  ;;  %v701_v37 = vpop.f32.mrf.mxu2 }
 0x137   :  { %v702_v38 = vadd.f32 %v701_v37, %v625_v34  ;;  %v163_v37 = vld [vmem:[%s5419_s0 + $0x4a0] sm:$0xff] }
 0x138   :  { %v550_v39 = vpop.f32.mrf.mxu0 }
 0x139   :  { %v778_v42 = vpop.f32.mrf.mxu3 }
 0x13a   :  { %v3926_v43 = vadd.f32 %v778_v42, %v702_v38  ;;  %v627_v44 = vpop.f32.mrf.mxu1  ;;  %v165_v38 = vld [vmem:[%s5419_s0 + $0x4b0] sm:$0xff] }
 0x13b   :  { %845 = vmatmul.f32.gmra.mxu0 %v139_v40  ;;  %999 = vmatmul.f32.gmra.mxu2 %v141_v41  ;;  %v628_v53 = vadd.f32 %v627_v44, %v550_v39  ;;  %v164_v44 = vld [vmem:[%s5419_s0 + $0x4a8] sm:$0xff] }
 0x13d   :  { %922 = vmatmul.f32.gmra.mxu1 %v140_v45  ;;  %v364_v45 = vld [vmem:[%s5420_s1 + $0x5e8] sm:$0xff] }
 0x13e   :  { %2602 = vmatmul.msk.f32.gmra.mxu3 %vm415_vm0, %v142_v49  ;;  %v704_v55 = vpop.f32.mrf.mxu2  ;;  %1478 = vmatpush.msrb.mxu1 %v364_v45  ;;  %v326_v45 = vld [vmem:[%s5420_s1 + $0x4b8] sm:$0xff] }
 0x13f   :  { %v705_v57 = vadd.f32 %v704_v55, %v628_v53  ;;  %v171_v55 = vld [vmem:[%s5419_s0 + $0x4e0] sm:$0xff] }
 0x140   :  { %v801_v58 = vpop.f32.mrf.mxu0 }
 0x141   :  { %v781_v62 = vpop.f32.mrf.mxu3  ;;  %v802_v0 = vadd.f32 %v801_v58, %v3491_v9 }
 0x142   :  { %v3954_v2 = vadd.f32 %v781_v62, %v705_v57  ;;  %v878_v3 = vpop.f32.mrf.mxu1  ;;  %v172_v62 = vld [vmem:[%s5419_s0 + $0x4e8] sm:$0xff] }
 0x143   :  { %848 = vmatmul.f32.gmra.mxu0 %v147_v59  ;;  %1002 = vmatmul.f32.gmra.mxu2 %v149_v60  ;;  %v879_v8 = vadd.f32 %v878_v3, %v802_v0  ;;  %v330_v0 = vld [vmem:[%s5420_s1 + $0x4d8] sm:$0xff]  ;;  %v412_v3 = vld [vmem:[%s5420_s1 + $0x768] sm:$0xff] }
 0x144   :  { %1402 = vmatpush.msrb.mxu0 %v330_v0  ;;  %1640 = vmatpush.msrb.mxu3 %v412_v3  ;;  %v388_v3 = vld [vmem:[%s5420_s1 + $0x6a8] sm:$0xff] }
 0x145   :  { %925 = vmatmul.f32.gmra.mxu1 %v148_v4  ;;  %v362_v4 = vld [vmem:[%s5420_s1 + $0x5d8] sm:$0xff] }
 0x146   :  { %2603 = vmatmul.msk.f32.gmra.mxu3 %vm415_vm0, %v150_v5  ;;  %v955_v9 = vpop.f32.mrf.mxu2  ;;  %1479 = vmatpush.msrb.mxu1 %v362_v4  ;;  %v324_v4 = vld [vmem:[%s5420_s1 + $0x4a8] sm:$0xff] }
 0x147   :  { %v956_v12 = vadd.f32 %v955_v9, %v879_v8 }
 0x148   :  { %v804_v15 = vpop.f32.mrf.mxu0 }
 0x149   :  { %v805_v20 = vadd.f32 %v804_v15, %v3514_v23  ;;  %v1032_v21 = vpop.f32.mrf.mxu3  ;;  %v396_v23 = vld [vmem:[%s5420_s1 + $0x6e8] sm:$0xff] }
 0x14a   :  { %v3982_v22 = vadd.f32 %v1032_v21, %v956_v12  ;;  %v881_v24 = vpop.f32.mrf.mxu1  ;;  %1555 = vmatpush.msrb.mxu2 %v396_v23  ;;  %v392_v15 = vld [vmem:[%s5420_s1 + $0x6c8] sm:$0xff] }
 0x14b   :  { %851 = vmatmul.f32.gmra.mxu0 %v155_v18  ;;  %1005 = vmatmul.f32.gmra.mxu2 %v157_v19  ;;  %v882_v28 = vadd.f32 %v881_v24, %v805_v20  ;;  %v2681_v18 = vld [vmem:[%s5419_s0] sm:$0xff]  ;;  %v2682_v19 = vld [vmem:[%s5419_s0 + $0x10] sm:$0xff]  ;;  %v2683_v21 = vld [vmem:[%s5419_s0 + $0x8] sm:$0xff] }
 0x14c   :  { %1556 = vmatpush.msrb.mxu2 %v394_v52  ;;  %v2684_v24 = vld [vmem:[%s5419_s0 + $0x18] sm:$0xff] }
 0x14d   :  { %928 = vmatmul.f32.gmra.mxu1 %v156_v26 }
 0x14e   :  { %2604 = vmatmul.msk.f32.gmra.mxu3 %vm415_vm0, %v158_v27  ;;  %v958_v29 = vpop.f32.mrf.mxu2  ;;  %1557 = vmatpush.msrb.mxu2 %v392_v15  ;;  %v360_v27 = vld [vmem:[%s5420_s1 + $0x5c8] sm:$0xff]  ;;  %v2694_v15 = vld [vmem:[%s5419_s0 + $0xd0] sm:$0xff] }
 0x14f   :  { %v959_v30 = vadd.f32 %v958_v29, %v882_v28  ;;  %1480 = vmatpush.msrb.mxu1 %v360_v27 }
 0x150   :  { %v807_v34 = vpop.f32.mrf.mxu0 }
 0x151   :  { %v808_v39 = vadd.f32 %v807_v34, %v3534_v36  ;;  %v1035_v40 = vpop.f32.mrf.mxu3 }
 0x152   :  { %v4004_v41 = vadd.f32 %v1035_v40, %v959_v30  ;;  %v884_v42 = vpop.f32.mrf.mxu1  ;;  %v2687_v40 = vld [vmem:[%s5419_s0 + $0x48] sm:$0xff] }
 0x153   :  { %854 = vmatmul.f32.gmra.mxu0 %v163_v37  ;;  %1008 = vmatmul.f32.gmra.mxu2 %v165_v38  ;;  %v885_v36 = vadd.f32 %v884_v42, %v808_v39  ;;  %v2685_v37 = vld [vmem:[%s5419_s0 + $0x40] sm:$0xff]  ;;  %v2686_v38 = vld [vmem:[%s5419_s0 + $0x50] sm:$0xff]  ;;  %v390_v39 = vld [vmem:[%s5420_s1 + $0x6b8] sm:$0xff] }
 0x154   :  { %1558 = vmatpush.msrb.mxu2 %v390_v39  ;;  %v2688_v42 = vld [vmem:[%s5419_s0 + $0x58] sm:$0xff]  ;;  %v2699_v39 = vld [vmem:[%s5419_s0 + $0x108] sm:$0xff] }
 0x155   :  { %931 = vmatmul.f32.gmra.mxu1 %v164_v44 }
 0x156   :  { %2605 = vmatmul.msk.f32.gmra.mxu3 %vm415_vm0, %v166_v47  ;;  %v961_v49 = vpop.f32.mrf.mxu2  ;;  %v410_v47 = vld [vmem:[%s5420_s1 + $0x758] sm:$0xff]  ;;  %1559 = vmatpush.msrb.mxu2 %v388_v3 }
 0x157   :  { %v962_v51 = vadd.f32 %v961_v49, %v885_v36  ;;  %1641 = vmatpush.msrb.mxu3 %v410_v47  ;;  %v358_v49 = vld [vmem:[%s5420_s1 + $0x5b8] sm:$0xff] }
 0x158   :  { %v810_v53 = vpop.f32.mrf.mxu0  ;;  %1481 = vmatpush.msrb.mxu1 %v358_v49 }
 0x159   :  { %v811_v57 = vadd.f32 %v810_v53, %v3557_v50  ;;  %v1038_v58 = vpop.f32.mrf.mxu3  ;;  %v174_v50 = vld [vmem:[%s5419_s0 + $0x4f8] sm:$0xff] }
 0x15a   :  { %v4026_v59 = vadd.f32 %v1038_v58, %v962_v51  ;;  %v887_v60 = vpop.f32.mrf.mxu1  ;;  %v2690_v58 = vld [vmem:[%s5419_s0 + $0x90] sm:$0xff] }
 0x15b   :  { %857 = vmatmul.f32.gmra.mxu0 %v171_v55  ;;  %1011 = vmatmul.f32.gmra.mxu2 %v173_v56  ;;  %v888_v5 = vadd.f32 %v887_v60, %v811_v57  ;;  %v2689_v57 = vld [vmem:[%s5419_s0 + $0x80] sm:$0xff] }
 0x15d   :  { %934 = vmatmul.f32.gmra.mxu1 %v172_v62  ;;  %v2691_v62 = vld [vmem:[%s5419_s0 + $0x88] sm:$0xff] }
 0x15e   :  { %2606 = vmatmul.msk.f32.gmra.mxu3 %vm415_vm0, %v174_v50  ;;  %v964_v6 = vpop.f32.mrf.mxu2 }
 0x15f   :  { %v965_v8 = vadd.f32 %v964_v6, %v888_v5 }
 0x160   :  { %v813_v9 = vpop.f32.mrf.mxu0 }
 0x161   :  { %v814_v10 = vadd.f32 %v813_v9, %v3584_v1  ;;  %v1041_v11 = vpop.f32.mrf.mxu3  ;;  %v328_v1 = vld [vmem:[%s5420_s1 + $0x4c8] sm:$0xff] }
 0x162   :  { %v4045_v12 = vadd.f32 %v1041_v11, %v965_v8  ;;  %v890_v13 = vpop.f32.mrf.mxu1  ;;  %1403 = vmatpush.msrb.mxu0 %v328_v1  ;;  %v356_v11 = vld [vmem:[%s5420_s1 + $0x5a8] sm:$0xff] }
 0x163   :  { %1108 = vmatmul.f32.vlgmr.msra.gmra.mxu0 %v2681_v18  ;;  %1262 = vmatmul.f32.vlgmr.msra.gmra.mxu2 %v2682_v19  ;;  %v891_v20 = vadd.f32 %v890_v13, %v814_v10  ;;  %v2693_v13 = vld [vmem:[%s5419_s0 + $0xc0] sm:$0xff]  ;;  %v2695_v18 = vld [vmem:[%s5419_s0 + $0xc8] sm:$0xff]  ;;  %v2696_v19 = vld [vmem:[%s5419_s0 + $0xd8] sm:$0xff] }
 0x164   :  { %1404 = vmatpush.msrb.mxu0 %v326_v45  ;;  %1482 = vmatpush.msrb.mxu1 %v356_v11  ;;  %v2707_v11 = vld [vmem:[%s5419_s0 + $0x188] sm:$0xff] }
 0x165   :  { %1185 = vmatmul.f32.vlgmr.msra.gmra.mxu1 %v2683_v21  ;;  %v386_v21 = vld [vmem:[%s5420_s1 + $0x698] sm:$0xff] }
 0x166   :  { %1339 = vmatmul.f32.vlgmr.msra.gmra.mxu3 %v2684_v24  ;;  %v967_v26 = vpop.f32.mrf.mxu2  ;;  %1405 = vmatpush.msrb.mxu0 %v324_v4 }
 0x167   :  { %v968_v28 = vadd.f32 %v967_v26, %v891_v20  ;;  %1560 = vmatpush.msrb.mxu2 %v386_v21 }
 0x168   :  { %v816_v29 = vpop.f32.mrf.mxu0 }
 0x169   :  { %v817_v23 = vadd.f32 %v816_v29, %v3611_v17  ;;  %v1044_v30 = vpop.f32.mrf.mxu3 }
 0x16a   :  { %v4069_v33 = vadd.f32 %v1044_v30, %v968_v28  ;;  %v893_v34 = vpop.f32.mrf.mxu1  ;;  %v408_v30 = vld [vmem:[%s5420_s1 + $0x748] sm:$0xff] }
 0x16b   :  { %1111 = vmatmul.f32.gmra.mxu0 %v2685_v37  ;;  %1265 = vmatmul.f32.gmra.mxu2 %v2686_v38  ;;  %v894_v17 = vadd.f32 %v893_v34, %v817_v23  ;;  %v322_v23 = vld [vmem:[%s5420_s1 + $0x498] sm:$0xff]  ;;  %v2697_v34 = vld [vmem:[%s5419_s0 + $0x100] sm:$0xff] }
 0x16c   :  { %v354_v37 = vld [vmem:[%s5420_s1 + $0x598] sm:$0xff]  ;;  %1406 = vmatpush.msrb.mxu0 %v322_v23  ;;  %1642 = vmatpush.msrb.mxu3 %v408_v30  ;;  %v2710_v23 = vld [vmem:[%s5419_s0 + $0x1d0] sm:$0xff] }
 0x16d   :  { %1188 = vmatmul.f32.gmra.mxu1 %v2687_v40 }
 0x16e   :  { %1342 = vmatmul.f32.gmra.mxu3 %v2688_v42  ;;  %v970_v44 = vpop.f32.mrf.mxu2  ;;  %1483 = vmatpush.msrb.mxu1 %v354_v37  ;;  %v380_v37 = vld [vmem:[%s5420_s1 + $0x668] sm:$0xff] }
 0x16f   :  { %v971_v36 = vadd.f32 %v970_v44, %v894_v17  ;;  %v2700_v17 = vld [vmem:[%s5419_s0 + $0x118] sm:$0xff] }
 0x170   :  { %v819_v51 = vpop.f32.mrf.mxu0 }
 0x171   :  { %v820_v52 = vadd.f32 %v819_v51, %v3635_v32  ;;  %v1047_v53 = vpop.f32.mrf.mxu3  ;;  %v2692_v32 = vld [vmem:[%s5419_s0 + $0x98] sm:$0xff]  ;;  %v384_v51 = vld [vmem:[%s5420_s1 + $0x688] sm:$0xff] }
 0x172   :  { %v4096_v55 = vadd.f32 %v1047_v53, %v971_v36  ;;  %v896_v56 = vpop.f32.mrf.mxu1  ;;  %v2702_v53 = vld [vmem:[%s5419_s0 + $0x150] sm:$0xff]  ;;  %1561 = vmatpush.msrb.mxu2 %v384_v51 }
 0x173   :  { %1114 = vmatmul.f32.gmra.mxu0 %v2689_v57  ;;  %1268 = vmatmul.f32.gmra.mxu2 %v2690_v58  ;;  %v897_v60 = vadd.f32 %v896_v56, %v820_v52  ;;  %v2701_v52 = vld [vmem:[%s5419_s0 + $0x140] sm:$0xff]  ;;  %v2703_v57 = vld [vmem:[%s5419_s0 + $0x148] sm:$0xff]  ;;  %v2704_v58 = vld [vmem:[%s5419_s0 + $0x158] sm:$0xff] }
 0x174   :  { %v2714_v51 = vld [vmem:[%s5419_s0 + $0x210] sm:$0xff] }
 0x175   :  { %1191 = vmatmul.f32.gmra.mxu1 %v2691_v62  ;;  %v352_v62 = vld [vmem:[%s5420_s1 + $0x588] sm:$0xff] }
 0x176   :  { %1345 = vmatmul.f32.gmra.mxu3 %v2692_v32  ;;  %v973_v0 = vpop.f32.mrf.mxu2  ;;  %1484 = vmatpush.msrb.mxu1 %v352_v62 }
 0x177   :  { %v974_v50 = vadd.f32 %v973_v0, %v897_v60 }
 0x178   :  { %v822_v5 = vpop.f32.mrf.mxu0 }
 0x179   :  { %v823_v6 = vadd.f32 %v822_v5, %v3656_v46  ;;  %v1050_v8 = vpop.f32.mrf.mxu3 }
 0x17a   :  { %v4117_v9 = vadd.f32 %v1050_v8, %v974_v50  ;;  %v899_v10 = vpop.f32.mrf.mxu1  ;;  %v2706_v8 = vld [vmem:[%s5419_s0 + $0x190] sm:$0xff] }
 0x17b   :  { %1117 = vmatmul.f32.gmra.mxu0 %v2693_v13  ;;  %1271 = vmatmul.f32.gmra.mxu2 %v2694_v15  ;;  %v900_v46 = vadd.f32 %v899_v10, %v823_v6  ;;  %v2705_v6 = vld [vmem:[%s5419_s0 + $0x180] sm:$0xff]  ;;  %v382_v10 = vld [vmem:[%s5420_s1 + $0x678] sm:$0xff] }
 0x17c   :  { %1562 = vmatpush.msrb.mxu2 %v382_v10  ;;  %v2708_v13 = vld [vmem:[%s5419_s0 + $0x198] sm:$0xff]  ;;  %v2719_v10 = vld [vmem:[%s5419_s0 + $0x248] sm:$0xff] }
 0x17d   :  { %1194 = vmatmul.f32.gmra.mxu1 %v2695_v18  ;;  %v406_v18 = vld [vmem:[%s5420_s1 + $0x738] sm:$0xff] }
 0x17e   :  { %1348 = vmatmul.f32.gmra.mxu3 %v2696_v19  ;;  %v976_v1 = vpop.f32.mrf.mxu2  ;;  %1563 = vmatpush.msrb.mxu2 %v380_v37 }
 0x17f   :  { %v977_v20 = vadd.f32 %v976_v1, %v900_v46  ;;  %v318_v46 = vld [vmem:[%s5420_s1 + $0x478] sm:$0xff]  ;;  %1643 = vmatpush.msrb.mxu3 %v406_v18 }
 0x180   :  { %v825_v24 = vpop.f32.mrf.mxu0  ;;  %v350_v1 = vld [vmem:[%s5420_s1 + $0x578] sm:$0xff] }
 0x181   :  { %v826_v26 = vadd.f32 %v825_v24, %v3680_v61  ;;  %v1053_v27 = vpop.f32.mrf.mxu3  ;;  %v2698_v61 = vld [vmem:[%s5419_s0 + $0x110] sm:$0xff]  ;;  %1485 = vmatpush.msrb.mxu1 %v350_v1 }
 0x182   :  { %v4138_v28 = vadd.f32 %v1053_v27, %v977_v20  ;;  %v902_v29 = vpop.f32.mrf.mxu1 }
 0x183   :  { %1120 = vmatmul.f32.gmra.mxu0 %v2697_v34  ;;  %1274 = vmatmul.f32.gmra.mxu2 %v2698_v61  ;;  %v903_v38 = vadd.f32 %v902_v29, %v826_v26  ;;  %v2709_v29 = vld [vmem:[%s5419_s0 + $0x1c0] sm:$0xff]  ;;  %v2711_v34 = vld [vmem:[%s5419_s0 + $0x1c8] sm:$0xff] }
 0x185   :  { %1197 = vmatmul.f32.gmra.mxu1 %v2699_v39  ;;  %v316_v39 = vld [vmem:[%s5420_s1 + $0x468] sm:$0xff] }
 0x186   :  { %1351 = vmatmul.f32.gmra.mxu3 %v2700_v17  ;;  %v979_v40 = vpop.f32.mrf.mxu2 }
 0x187   :  { %v980_v42 = vadd.f32 %v979_v40, %v903_v38 }
 0x188   :  { %v828_v44 = vpop.f32.mrf.mxu0 }
 0x189   :  { %v829_v45 = vadd.f32 %v828_v44, %v3707_v14  ;;  %v1056_v47 = vpop.f32.mrf.mxu3  ;;  %v320_v14 = vld [vmem:[%s5420_s1 + $0x488] sm:$0xff] }
 0x18a   :  { %v4162_v36 = vadd.f32 %v1056_v47, %v980_v42  ;;  %v905_v49 = vpop.f32.mrf.mxu1  ;;  %1407 = vmatpush.msrb.mxu0 %v320_v14  ;;  %v348_v47 = vld [vmem:[%s5420_s1 + $0x568] sm:$0xff] }
 0x18b   :  { %1123 = vmatmul.f32.gmra.mxu0 %v2701_v52  ;;  %1277 = vmatmul.f32.gmra.mxu2 %v2702_v53  ;;  %v906_v56 = vadd.f32 %v905_v49, %v829_v45  ;;  %v2713_v49 = vld [vmem:[%s5419_s0 + $0x200] sm:$0xff]  ;;  %v2715_v52 = vld [vmem:[%s5419_s0 + $0x208] sm:$0xff]  ;;  %v2716_v53 = vld [vmem:[%s5419_s0 + $0x218] sm:$0xff] }
 0x18c   :  { %1408 = vmatpush.msrb.mxu0 %v318_v46  ;;  %1486 = vmatpush.msrb.mxu1 %v348_v47  ;;  %v2727_v47 = vld [vmem:[%s5419_s0 + $0x2c8] sm:$0xff] }
 0x18d   :  { %1200 = vmatmul.f32.gmra.mxu1 %v2703_v57  ;;  %v378_v57 = vld [vmem:[%s5420_s1 + $0x658] sm:$0xff] }
 0x18e   :  { %1354 = vmatmul.f32.gmra.mxu3 %v2704_v58  ;;  %v982_v60 = vpop.f32.mrf.mxu2  ;;  %1409 = vmatpush.msrb.mxu0 %v316_v39 }
 0x18f   :  { %v983_v32 = vadd.f32 %v982_v60, %v906_v56  ;;  %1564 = vmatpush.msrb.mxu2 %v378_v57 }
 0x190   :  { %v831_v0 = vpop.f32.mrf.mxu0 }
 0x191   :  { %v832_v3 = vadd.f32 %v831_v0, %v3734_v31  ;;  %v1059_v50 = vpop.f32.mrf.mxu3 }
 0x192   :  { %v4186_v4 = vadd.f32 %v1059_v50, %v983_v32  ;;  %v908_v5 = vpop.f32.mrf.mxu1  ;;  %v404_v50 = vld [vmem:[%s5420_s1 + $0x728] sm:$0xff] }
 0x193   :  { %1126 = vmatmul.f32.gmra.mxu0 %v2705_v6  ;;  %1280 = vmatmul.f32.gmra.mxu2 %v2706_v8  ;;  %v909_v31 = vadd.f32 %v908_v5, %v832_v3  ;;  %v314_v3 = vld [vmem:[%s5420_s1 + $0x458] sm:$0xff]  ;;  %v2717_v5 = vld [vmem:[%s5419_s0 + $0x240] sm:$0xff] }
 0x194   :  { %v346_v6 = vld [vmem:[%s5420_s1 + $0x558] sm:$0xff]  ;;  %1410 = vmatpush.msrb.mxu0 %v314_v3  ;;  %1644 = vmatpush.msrb.mxu3 %v404_v50  ;;  %v2730_v3 = vld [vmem:[%s5419_s0 + $0x310] sm:$0xff] }
 0x195   :  { %1203 = vmatmul.f32.gmra.mxu1 %v2707_v11 }
 0x196   :  { %1357 = vmatmul.f32.gmra.mxu3 %v2708_v13  ;;  %v985_v15 = vpop.f32.mrf.mxu2  ;;  %1487 = vmatpush.msrb.mxu1 %v346_v6  ;;  %v372_v6 = vld [vmem:[%s5420_s1 + $0x628] sm:$0xff] }
 0x197   :  { %v986_v19 = vadd.f32 %v985_v15, %v909_v31  ;;  %v2720_v31 = vld [vmem:[%s5419_s0 + $0x258] sm:$0xff] }
 0x198   :  { %v834_v20 = vpop.f32.mrf.mxu0 }
 0x199   :  { %v835_v21 = vadd.f32 %v834_v20, %v3758_v48  ;;  %v1062_v24 = vpop.f32.mrf.mxu3  ;;  %v2712_v48 = vld [vmem:[%s5419_s0 + $0x1d8] sm:$0xff]  ;;  %v376_v20 = vld [vmem:[%s5420_s1 + $0x648] sm:$0xff] }
 0x19a   :  { %v4213_v26 = vadd.f32 %v1062_v24, %v986_v19  ;;  %v911_v27 = vpop.f32.mrf.mxu1  ;;  %v2722_v24 = vld [vmem:[%s5419_s0 + $0x290] sm:$0xff]  ;;  %1565 = vmatpush.msrb.mxu2 %v376_v20 }
 0x19b   :  { %1129 = vmatmul.f32.gmra.mxu0 %v2709_v29  ;;  %1283 = vmatmul.f32.gmra.mxu2 %v2710_v23  ;;  %v912_v30 = vadd.f32 %v911_v27, %v835_v21  ;;  %v2721_v21 = vld [vmem:[%s5419_s0 + $0x280] sm:$0xff]  ;;  %v2723_v29 = vld [vmem:[%s5419_s0 + $0x288] sm:$0xff]  ;;  %v2724_v23 = vld [vmem:[%s5419_s0 + $0x298] sm:$0xff] }
 0x19c   :  { %v2734_v20 = vld [vmem:[%s5419_s0 + $0x350] sm:$0xff] }
 0x19d   :  { %1206 = vmatmul.f32.gmra.mxu1 %v2711_v34  ;;  %v344_v34 = vld [vmem:[%s5420_s1 + $0x548] sm:$0xff] }
 0x19e   :  { %1360 = vmatmul.f32.gmra.mxu3 %v2712_v48  ;;  %v988_v61 = vpop.f32.mrf.mxu2  ;;  %1488 = vmatpush.msrb.mxu1 %v344_v34 }
 0x19f   :  { %v989_v38 = vadd.f32 %v988_v61, %v912_v30 }
 0x1a0   :  { %v837_v17 = vpop.f32.mrf.mxu0 }
 0x1a1   :  { %v838_v40 = vadd.f32 %v837_v17, %v3779_v63  ;;  %v1065_v42 = vpop.f32.mrf.mxu3 }
 0x1a2   :  { %v4234_v44 = vadd.f32 %v1065_v42, %v989_v38  ;;  %v914_v45 = vpop.f32.mrf.mxu1  ;;  %v2726_v42 = vld [vmem:[%s5419_s0 + $0x2d0] sm:$0xff] }
 0x1a3   :  { %1132 = vmatmul.f32.gmra.mxu0 %v2713_v49  ;;  %1286 = vmatmul.f32.gmra.mxu2 %v2714_v51  ;;  %v915_v63 = vadd.f32 %v914_v45, %v838_v40  ;;  %v2725_v40 = vld [vmem:[%s5419_s0 + $0x2c0] sm:$0xff]  ;;  %v374_v45 = vld [vmem:[%s5420_s1 + $0x638] sm:$0xff] }
 0x1a4   :  { %1566 = vmatpush.msrb.mxu2 %v374_v45  ;;  %v2728_v49 = vld [vmem:[%s5419_s0 + $0x2d8] sm:$0xff]  ;;  %v2739_v45 = vld [vmem:[%s5419_s0 + $0x388] sm:$0xff] }
 0x1a5   :  { %1209 = vmatmul.f32.gmra.mxu1 %v2715_v52  ;;  %v402_v52 = vld [vmem:[%s5420_s1 + $0x718] sm:$0xff] }
 0x1a6   :  { %1363 = vmatmul.f32.gmra.mxu3 %v2716_v53  ;;  %v991_v14 = vpop.f32.mrf.mxu2  ;;  %1567 = vmatpush.msrb.mxu2 %v372_v6 }
 0x1a7   :  { %v992_v56 = vadd.f32 %v991_v14, %v915_v63  ;;  %v310_v63 = vld [vmem:[%s5420_s1 + $0x438] sm:$0xff]  ;;  %1645 = vmatpush.msrb.mxu3 %v402_v52 }
 0x1a8   :  { %v840_v58 = vpop.f32.mrf.mxu0  ;;  %v342_v14 = vld [vmem:[%s5420_s1 + $0x538] sm:$0xff] }
 0x1a9   :  { %v841_v60 = vadd.f32 %v840_v58, %v3803_v16  ;;  %v1068_v62 = vpop.f32.mrf.mxu3  ;;  %v2718_v16 = vld [vmem:[%s5419_s0 + $0x250] sm:$0xff]  ;;  %1489 = vmatpush.msrb.mxu1 %v342_v14 }
 0x1aa   :  { %v4255_v32 = vadd.f32 %v1068_v62, %v992_v56  ;;  %v917_v0 = vpop.f32.mrf.mxu1 }
 0x1ab   :  { %1135 = vmatmul.f32.gmra.mxu0 %v2717_v5  ;;  %1289 = vmatmul.f32.gmra.mxu2 %v2718_v16  ;;  %v918_v8 = vadd.f32 %v917_v0, %v841_v60  ;;  %v2729_v0 = vld [vmem:[%s5419_s0 + $0x300] sm:$0xff]  ;;  %v2731_v5 = vld [vmem:[%s5419_s0 + $0x308] sm:$0xff] }
 0x1ad   :  { %1212 = vmatmul.f32.gmra.mxu1 %v2719_v10  ;;  %v308_v10 = vld [vmem:[%s5420_s1 + $0x428] sm:$0xff] }
 0x1ae   :  { %1366 = vmatmul.f32.gmra.mxu3 %v2720_v31  ;;  %v994_v11 = vpop.f32.mrf.mxu2 }
 0x1af   :  { %v995_v13 = vadd.f32 %v994_v11, %v918_v8 }
 0x1b0   :  { %v843_v15 = vpop.f32.mrf.mxu0 }
 0x1b1   :  { %v844_v46 = vadd.f32 %v843_v15, %v3830_v35  ;;  %v1071_v18 = vpop.f32.mrf.mxu3  ;;  %v312_v35 = vld [vmem:[%s5420_s1 + $0x448] sm:$0xff] }
 0x1b2   :  { %v4279_v19 = vadd.f32 %v1071_v18, %v995_v13  ;;  %v920_v1 = vpop.f32.mrf.mxu1  ;;  %1411 = vmatpush.msrb.mxu0 %v312_v35  ;;  %v340_v18 = vld [vmem:[%s5420_s1 + $0x528] sm:$0xff] }
 0x1b3   :  { %1138 = vmatmul.f32.gmra.mxu0 %v2721_v21  ;;  %1292 = vmatmul.f32.gmra.mxu2 %v2722_v24  ;;  %v921_v27 = vadd.f32 %v920_v1, %v844_v46  ;;  %v2733_v1 = vld [vmem:[%s5419_s0 + $0x340] sm:$0xff]  ;;  %v2735_v21 = vld [vmem:[%s5419_s0 + $0x348] sm:$0xff]  ;;  %v2736_v24 = vld [vmem:[%s5419_s0 + $0x358] sm:$0xff] }
 0x1b4   :  { %1412 = vmatpush.msrb.mxu0 %v310_v63  ;;  %1490 = vmatpush.msrb.mxu1 %v340_v18  ;;  %v2748_v18 = vld [vmem:[%s5419_s0 + $0x418] sm:$0xff] }
 0x1b5   :  { %1215 = vmatmul.f32.gmra.mxu1 %v2723_v29  ;;  %v370_v29 = vld [vmem:[%s5420_s1 + $0x618] sm:$0xff] }
 0x1b6   :  { %1369 = vmatmul.f32.gmra.mxu3 %v2724_v23  ;;  %v997_v30 = vpop.f32.mrf.mxu2  ;;  %1413 = vmatpush.msrb.mxu0 %v308_v10 }
 0x1b7   :  { %v998_v48 = vadd.f32 %v997_v30, %v921_v27  ;;  %1568 = vmatpush.msrb.mxu2 %v370_v29  ;;  %v2750_v29 = vld [vmem:[%s5419_s0 + $0x450] sm:$0xff] }
 0x1b8   :  { %v846_v61 = vpop.f32.mrf.mxu0 }
 0x1b9   :  { %v847_v37 = vadd.f32 %v846_v61, %v3857_v54  ;;  %v1074_v38 = vpop.f32.mrf.mxu3 }
 0x1ba   :  { %v4303_v39 = vadd.f32 %v1074_v38, %v998_v48  ;;  %v923_v17 = vpop.f32.mrf.mxu1  ;;  %v400_v38 = vld [vmem:[%s5420_s1 + $0x708] sm:$0xff] }
 0x1bb   :  { %1141 = vmatmul.f32.gmra.mxu0 %v2725_v40  ;;  %1295 = vmatmul.f32.gmra.mxu2 %v2726_v42  ;;  %v924_v54 = vadd.f32 %v923_v17, %v847_v37  ;;  %v306_v37 = vld [vmem:[%s5420_s1 + $0x418] sm:$0xff]  ;;  %v2737_v17 = vld [vmem:[%s5419_s0 + $0x380] sm:$0xff] }
 0x1bc   :  { %v338_v40 = vld [vmem:[%s5420_s1 + $0x518] sm:$0xff]  ;;  %1414 = vmatpush.msrb.mxu0 %v306_v37  ;;  %1646 = vmatpush.msrb.mxu3 %v400_v38 }
 0x1bd   :  { %1218 = vmatmul.f32.gmra.mxu1 %v2727_v47 }
 0x1be   :  { %1372 = vmatmul.f32.gmra.mxu3 %v2728_v49  ;;  %v1000_v51 = vpop.f32.mrf.mxu2  ;;  %1491 = vmatpush.msrb.mxu1 %v338_v40 }
 0x1bf   :  { %v1001_v53 = vadd.f32 %v1000_v51, %v924_v54  ;;  %v2740_v54 = vld [vmem:[%s5419_s0 + $0x398] sm:$0xff] }
 0x1c0   :  { %v849_v56 = vpop.f32.mrf.mxu0 }
 0x1c1   :  { %v850_v57 = vadd.f32 %v849_v56, %v3881_v7  ;;  %v1077_v58 = vpop.f32.mrf.mxu3  ;;  %v2732_v7 = vld [vmem:[%s5419_s0 + $0x318] sm:$0xff]  ;;  %v368_v56 = vld [vmem:[%s5420_s1 + $0x608] sm:$0xff] }
 0x1c2   :  { %v4330_v60 = vadd.f32 %v1077_v58, %v1001_v53  ;;  %v926_v62 = vpop.f32.mrf.mxu1  ;;  %v2742_v58 = vld [vmem:[%s5419_s0 + $0x3d0] sm:$0xff]  ;;  %1569 = vmatpush.msrb.mxu2 %v368_v56 }
 0x1c3   :  { %1144 = vmatmul.f32.gmra.mxu0 %v2729_v0  ;;  %1298 = vmatmul.f32.gmra.mxu2 %v2730_v3  ;;  %v927_v50 = vadd.f32 %v926_v62, %v850_v57  ;;  %v2741_v57 = vld [vmem:[%s5419_s0 + $0x3c0] sm:$0xff]  ;;  %v2743_v0 = vld [vmem:[%s5419_s0 + $0x3c8] sm:$0xff]  ;;  %v2744_v3 = vld [vmem:[%s5419_s0 + $0x3d8] sm:$0xff] }
 0x1c5   :  { %1221 = vmatmul.f32.gmra.mxu1 %v2731_v5  ;;  %v336_v5 = vld [vmem:[%s5420_s1 + $0x508] sm:$0xff] }
 0x1c6   :  { %1375 = vmatmul.f32.gmra.mxu3 %v2732_v7  ;;  %v1003_v16 = vpop.f32.mrf.mxu2  ;;  %1492 = vmatpush.msrb.mxu1 %v336_v5 }
 0x1c7   :  { %v1004_v8 = vadd.f32 %v1003_v16, %v927_v50 }
 0x1c8   :  { %v852_v31 = vpop.f32.mrf.mxu0 }
 0x1c9   :  { %v853_v11 = vadd.f32 %v852_v31, %v3902_v25  ;;  %v1080_v13 = vpop.f32.mrf.mxu3  ;;  %v2745_v31 = vld [vmem:[%s5419_s0 + $0x400] sm:$0xff] }
 0x1ca   :  { %v4351_v15 = vadd.f32 %v1080_v13, %v1004_v8  ;;  %v929_v46 = vpop.f32.mrf.mxu1 }
 0x1cb   :  { %1147 = vmatmul.f32.gmra.mxu0 %v2733_v1  ;;  %1301 = vmatmul.f32.gmra.mxu2 %v2734_v20  ;;  %v930_v25 = vadd.f32 %v929_v46, %v853_v11  ;;  %v2746_v11 = vld [vmem:[%s5419_s0 + $0x410] sm:$0xff]  ;;  %v2747_v46 = vld [vmem:[%s5419_s0 + $0x408] sm:$0xff] }
 0x1cd   :  { %1224 = vmatmul.f32.gmra.mxu1 %v2735_v21 }
 0x1ce   :  { %1378 = vmatmul.f32.gmra.mxu3 %v2736_v24  ;;  %v1006_v35 = vpop.f32.mrf.mxu2 }
 0x1cf   :  { %v1007_v27 = vadd.f32 %v1006_v35, %v930_v25 }
 0x1d0   :  { %v855_v23 = vpop.f32.mrf.mxu0 }
 0x1d1   :  { %v856_v30 = vadd.f32 %v855_v23, %v3926_v43  ;;  %v1083_v34 = vpop.f32.mrf.mxu3  ;;  %v2738_v43 = vld [vmem:[%s5419_s0 + $0x390] sm:$0xff] }
 0x1d2   :  { %v4372_v48 = vadd.f32 %v1083_v34, %v1007_v27  ;;  %v932_v61 = vpop.f32.mrf.mxu1  ;;  %v2749_v27 = vld [vmem:[%s5419_s0 + $0x440] sm:$0xff]  ;;  %v2752_v34 = vld [vmem:[%s5419_s0 + $0x458] sm:$0xff] }
 0x1d3   :  { %1150 = vmatmul.f32.gmra.mxu0 %v2737_v17  ;;  %1304 = vmatmul.f32.gmra.mxu2 %v2738_v43  ;;  %v933_v42 = vadd.f32 %v932_v61, %v856_v30  ;;  %v2751_v30 = vld [vmem:[%s5419_s0 + $0x448] sm:$0xff] }
 0x1d5   :  { %1227 = vmatmul.f32.gmra.mxu1 %v2739_v45  ;;  %v2754_v45 = vld [vmem:[%s5419_s0 + $0x490] sm:$0xff] }
 0x1d6   :  { %1381 = vmatmul.f32.gmra.mxu3 %v2740_v54  ;;  %v1009_v47 = vpop.f32.mrf.mxu2 }
 0x1d7   :  { %v1010_v49 = vadd.f32 %v1009_v47, %v933_v42  ;;  %v2753_v42 = vld [vmem:[%s5419_s0 + $0x480] sm:$0xff]  ;;  %v2755_v47 = vld [vmem:[%s5419_s0 + $0x488] sm:$0xff] }
 0x1d8   :  { %v858_v51 = vpop.f32.mrf.mxu0 }
 0x1d9   :  { %v859_v63 = vadd.f32 %v858_v51, %v3954_v2  ;;  %v1086_v52 = vpop.f32.mrf.mxu3  ;;  %v304_v2 = vld [vmem:[%s5420_s1 + $0x408] sm:$0xff] }
 0x1da   :  { %v4396_v53 = vadd.f32 %v1086_v52, %v1010_v49  ;;  %v935_v14 = vpop.f32.mrf.mxu1  ;;  %1415 = vmatpush.msrb.mxu0 %v304_v2  ;;  %v2756_v49 = vld [vmem:[%s5419_s0 + $0x498] sm:$0xff]  ;;  %v2758_v2 = vld [vmem:[%s5419_s0 + $0x4d0] sm:$0xff] }
 0x1db   :  { %1153 = vmatmul.f32.gmra.mxu0 %v2741_v57  ;;  %1307 = vmatmul.f32.gmra.mxu2 %v2742_v58  ;;  %v936_v62 = vadd.f32 %v935_v14, %v859_v63  ;;  %v2757_v58 = vld [vmem:[%s5419_s0 + $0x4c0] sm:$0xff] }
 0x1dd   :  { %1230 = vmatmul.f32.gmra.mxu1 %v2743_v0  ;;  %v2759_v0 = vld [vmem:[%s5419_s0 + $0x4c8] sm:$0xff] }
 0x1de   :  { %1384 = vmatmul.f32.gmra.mxu3 %v2744_v3  ;;  %v1012_v50 = vpop.f32.mrf.mxu2  ;;  %v2760_v3 = vld [vmem:[%s5419_s0 + $0x4d8] sm:$0xff] }
 0x1df   :  { %v1013_v7 = vadd.f32 %v1012_v50, %v936_v62 }
 0x1e0   :  { %v1109_v16 = vpop.f32.mrf.mxu0 }
 0x1e1   :  { %v1089_v6 = vpop.f32.mrf.mxu3 }
 0x1e2   :  { %v4419_v8 = vadd.f32 %v1089_v6, %v1013_v7  ;;  %v1186_v10 = vpop.f32.mrf.mxu1 }
 0x1e3   :  { %1156 = vmatmul.f32.gmra.mxu0 %v2745_v31  ;;  %1310 = vmatmul.f32.gmra.mxu2 %v2746_v11  ;;  %v1187_v13 = vadd.f32 %v1186_v10, %v1109_v16  ;;  %v2761_v31 = vld [vmem:[%s5419_s0 + $0x20] sm:$0xff]  ;;  %v2762_v11 = vld [vmem:[%s5419_s0 + $0x30] sm:$0xff] }
 0x1e5   :  { %1233 = vmatmul.f32.gmra.mxu1 %v2747_v46  ;;  %v2763_v46 = vld [vmem:[%s5419_s0 + $0x28] sm:$0xff] }
 0x1e6   :  { %1387 = vmatmul.f32.gmra.mxu3 %v2748_v18  ;;  %v1263_v1 = vpop.f32.mrf.mxu2  ;;  %v2764_v18 = vld [vmem:[%s5419_s0 + $0x38] sm:$0xff] }
 0x1e7   :  { %v1264_v20 = vadd.f32 %v1263_v1, %v1187_v13 }
 0x1e8   :  { %v1112_v25 = vpop.f32.mrf.mxu0 }
 0x1e9   :  { %v1340_v21 = vpop.f32.mrf.mxu3 }
 0x1ea   :  { %v4433_v24 = vadd.f32 %v1340_v21, %v1264_v20  ;;  %v1189_v35 = vpop.f32.mrf.mxu1  ;;  %v2210_v21 = vld [vmem:[%s5421_s2 + $0x8] sm:$0xff] }
 0x1eb   :  { %1159 = vmatmul.f32.gmra.mxu0 %v2749_v27  ;;  %1313 = vmatmul.f32.gmra.mxu2 %v2750_v29  ;;  %v1190_v23 = vadd.f32 %v1189_v35, %v1112_v25  ;;  %v5423_v25 = vmov 1  }
 0x1ec   :  { %2633 = vset.pattern.permute.xlu0 %v5423_v25  ;;  %2632 = vset.pattern.permute.xlu1 %v5423_v25 }
 0x1ed   :  { %1236 = vmatmul.f32.gmra.mxu1 %v2751_v30  ;;  %2396 = vperm.xlu0 %2633, %v2210_v21   ;;  %v2765_v30 = vld [vmem:[%s5419_s0 + $0x60] sm:$0xff] }
 0x1ee   :  { %1390 = vmatmul.f32.gmra.mxu3 %v2752_v34  ;;  %v1266_v61 = vpop.f32.mrf.mxu2  ;;  %2634 = vset.pattern.permute.xlu2 %v5423_v25  ;;  %v2766_v34 = vld [vmem:[%s5419_s0 + $0x70] sm:$0xff] }
 0x1ef   :  { %v1267_v37 = vadd.f32 %v1266_v61, %v1190_v23 }
 0x1f0   :  { %v1115_v38 = vpop.f32.mrf.mxu0 }
 0x1f1   :  { %v1343_v17 = vpop.f32.mrf.mxu3 }
 0x1f2   :  { %v4447_v43 = vadd.f32 %v1343_v17, %v1267_v37  ;;  %v1192_v40 = vpop.f32.mrf.mxu1  ;;  %v2767_v37 = vld [vmem:[%s5419_s0 + $0x68] sm:$0xff] }
 0x1f3   :  { %1162 = vmatmul.f32.gmra.mxu0 %v2753_v42  ;;  %1316 = vmatmul.f32.gmra.mxu2 %v2754_v45  ;;  %v1193_v54 = vadd.f32 %v1192_v40, %v1115_v38  ;;  %v2768_v38 = vld [vmem:[%s5419_s0 + $0x78] sm:$0xff]  ;;  %v2215_v42 = vld [vmem:[%s5421_s2 + $0x30] sm:$0xff] }
 0x1f5   :  { %1239 = vmatmul.f32.gmra.mxu1 %v2755_v47  ;;  %2421 = vperm.xlu0 %2633, %v2215_v42   ;;  %v2224_v42 = vld [vmem:[%s5421_s2 + $0x78] sm:$0xff] }
 0x1f6   :  { %1393 = vmatmul.f32.gmra.mxu3 %v2756_v49  ;;  %v1269_v51 = vpop.f32.mrf.mxu2 }
 0x1f7   :  { %v1270_v63 = vadd.f32 %v1269_v51, %v1193_v54  ;;  %v2769_v51 = vld [vmem:[%s5419_s0 + $0xa0] sm:$0xff] }
 0x1f8   :  { %v1118_v52 = vpop.f32.mrf.mxu0 }
 0x1f9   :  { %v1346_v14 = vpop.f32.mrf.mxu3 }
 0x1fa   :  { %v4461_v56 = vadd.f32 %v1346_v14, %v1270_v63  ;;  %v1195_v57 = vpop.f32.mrf.mxu1  ;;  %v2770_v63 = vld [vmem:[%s5419_s0 + $0xb0] sm:$0xff]  ;;  %v2771_v14 = vld [vmem:[%s5419_s0 + $0xa8] sm:$0xff] }
 0x1fb   :  { %1165 = vmatmul.f32.gmra.mxu0 %v2757_v58  ;;  %1319 = vmatmul.f32.gmra.mxu2 %v2758_v2  ;;  %v1196_v62 = vadd.f32 %v1195_v57, %v1118_v52  ;;  %v2772_v57 = vld [vmem:[%s5419_s0 + $0xb8] sm:$0xff] }
 0x1fd   :  { %1242 = vmatmul.f32.gmra.mxu1 %v2759_v0  ;;  %v2209_v0 = vld [vmem:[%s5421_s2] sm:$0xff] }
 0x1fe   :  { %1396 = vmatmul.f32.gmra.mxu3 %v2760_v3  ;;  %v1272_v50 = vpop.f32.mrf.mxu2  ;;  %2391 = vperm.xlu1 %2632, %v2209_v0  }
 0x1ff   :  { %v1273_v5 = vadd.f32 %v1272_v50, %v1196_v62  ;;  %v2218_v62 = vld [vmem:[%s5421_s2 + $0x48] sm:$0xff] }
 0x200   :  { %v1121_v7 = vpop.f32.mrf.mxu0  ;;  %2436 = vperm.xlu0 %2633, %v2218_v62  }
 0x201   :  { %v1349_v16 = vpop.f32.mrf.mxu3 }
 0x202   :  { %v4475_v6 = vadd.f32 %v1349_v16, %v1273_v5  ;;  %v1198_v10 = vpop.f32.mrf.mxu1  ;;  %v2773_v16 = vld [vmem:[%s5419_s0 + $0xe0] sm:$0xff] }
 0x203   :  { %1416 = vmatmul.f32.vlgmr.msrb.gmra.mxu0 %v2761_v31  ;;  %1570 = vmatmul.f32.vlgmr.msrb.gmra.mxu2 %v2762_v11  ;;  %v1199_v13 = vadd.f32 %v1198_v10, %v1121_v7  ;;  %v2774_v10 = vld [vmem:[%s5419_s0 + $0xf0] sm:$0xff]  ;;  %v2775_v11 = vld [vmem:[%s5419_s0 + $0xe8] sm:$0xff] }
 0x205   :  { %1493 = vmatmul.f32.vlgmr.msrb.gmra.mxu1 %v2763_v46 }
 0x206   :  { %2607 = vmatmul.msk.f32.vlgmr.msrb.gmra.mxu3 %vm415_vm0, %v2764_v18  ;;  %v1275_v1 = vpop.f32.mrf.mxu2 }
 0x207   :  { %v1276_v20 = vadd.f32 %v1275_v1, %v1199_v13  ;;  %v2776_v13 = vld [vmem:[%s5419_s0 + $0xf8] sm:$0xff]  ;;  %v2221_v1 = vld [vmem:[%s5421_s2 + $0x60] sm:$0xff] }
 0x208   :  { %v1124_v35 = vpop.f32.mrf.mxu0  ;;  %2451 = vperm.xlu0 %2633, %v2221_v1  }
 0x209   :  { %v1352_v27 = vpop.f32.mrf.mxu3 }
 0x20a   :  { %v4496_v29 = vadd.f32 %v1352_v27, %v1276_v20  ;;  %v1201_v23 = vpop.f32.mrf.mxu1  ;;  %v2212_v20 = vld [vmem:[%s5421_s2 + $0x18] sm:$0xff] }
 0x20b   :  { %1419 = vmatmul.f32.gmra.mxu0 %v2765_v30  ;;  %1573 = vmatmul.f32.gmra.mxu2 %v2766_v34  ;;  %v1202_v61 = vadd.f32 %v1201_v23, %v1124_v35  ;;  %v2777_v30 = vld [vmem:[%s5419_s0 + $0x120] sm:$0xff]  ;;  %v2778_v34 = vld [vmem:[%s5419_s0 + $0x130] sm:$0xff] }
 0x20c   :  { %2406 = vperm.xlu1 %2632, %v2212_v20  }
 0x20d   :  { %1496 = vmatmul.f32.gmra.mxu1 %v2767_v37  ;;  %v2779_v37 = vld [vmem:[%s5419_s0 + $0x128] sm:$0xff] }
 0x20e   :  { %2608 = vmatmul.msk.f32.gmra.mxu3 %vm415_vm0, %v2768_v38  ;;  %v1278_v17 = vpop.f32.mrf.mxu2  ;;  %v2780_v38 = vld [vmem:[%s5419_s0 + $0x138] sm:$0xff] }
 0x20f   :  { %v1279_v40 = vadd.f32 %v1278_v17, %v1202_v61 }
 0x210   :  { %v1127_v45 = vpop.f32.mrf.mxu0  ;;  %2466 = vperm.xlu0 %2633, %v2224_v42   ;;  %v2792_v42 = vld [vmem:[%s5419_s0 + $0x1f8] sm:$0xff] }
 0x211   :  { %v1355_v54 = vpop.f32.mrf.mxu3 }
 0x212   :  { %v4514_v47 = vadd.f32 %v1355_v54, %v1279_v40  ;;  %v1204_v49 = vpop.f32.mrf.mxu1 }
 0x213   :  { %1422 = vmatmul.f32.gmra.mxu0 %v2769_v51  ;;  %1576 = vmatmul.f32.gmra.mxu2 %v2770_v63  ;;  %v1205_v52 = vadd.f32 %v1204_v49, %v1127_v45  ;;  %v2214_v45 = vld [vmem:[%s5421_s2 + $0x28] sm:$0xff] }
 0x214   :  { %2416 = vperm.xlu1 %2632, %v2214_v45  }
 0x215   :  { %1499 = vmatmul.f32.gmra.mxu1 %v2771_v14  ;;  %v2782_v14 = vld [vmem:[%s5419_s0 + $0x170] sm:$0xff] }
 0x216   :  { %2609 = vmatmul.msk.f32.gmra.mxu3 %vm415_vm0, %v2772_v57  ;;  %v1281_v58 = vpop.f32.mrf.mxu2 }
 0x217   :  { %v1282_v2 = vadd.f32 %v1281_v58, %v1205_v52  ;;  %v2781_v52 = vld [vmem:[%s5419_s0 + $0x160] sm:$0xff]  ;;  %v2783_v58 = vld [vmem:[%s5419_s0 + $0x168] sm:$0xff] }
 0x218   :  { %v1130_v3 = vpop.f32.mrf.mxu0 }
 0x219   :  { %v1358_v50 = vpop.f32.mrf.mxu3 }
 0x21a   :  { %v4535_v5 = vadd.f32 %v1358_v50, %v1282_v2  ;;  %v1207_v7 = vpop.f32.mrf.mxu1  ;;  %v2784_v2 = vld [vmem:[%s5419_s0 + $0x178] sm:$0xff] }
 0x21b   :  { %1425 = vmatmul.f32.gmra.mxu0 %v2773_v16  ;;  %1579 = vmatmul.f32.gmra.mxu2 %v2774_v10  ;;  %v1208_v31 = vadd.f32 %v1207_v7, %v1130_v3  ;;  %v2217_v3 = vld [vmem:[%s5421_s2 + $0x40] sm:$0xff] }
 0x21c   :  { %2431 = vperm.xlu1 %2632, %v2217_v3   ;;  %v2795_v3 = vld [vmem:[%s5419_s0 + $0x228] sm:$0xff] }
 0x21d   :  { %1502 = vmatmul.f32.gmra.mxu1 %v2775_v11  ;;  %v2786_v11 = vld [vmem:[%s5419_s0 + $0x1b0] sm:$0xff] }
 0x21e   :  { %2610 = vmatmul.msk.f32.gmra.mxu3 %vm415_vm0, %v2776_v13  ;;  %v1284_v46 = vpop.f32.mrf.mxu2 }
 0x21f   :  { %v1285_v18 = vadd.f32 %v1284_v46, %v1208_v31  ;;  %v2785_v31 = vld [vmem:[%s5419_s0 + $0x1a0] sm:$0xff]  ;;  %v2787_v46 = vld [vmem:[%s5419_s0 + $0x1a8] sm:$0xff] }
 0x220   :  { %v1133_v21 = vpop.f32.mrf.mxu0 }
 0x221   :  { %v1361_v35 = vpop.f32.mrf.mxu3 }
 0x222   :  { %v4556_v27 = vadd.f32 %v1361_v35, %v1285_v18  ;;  %v1210_v23 = vpop.f32.mrf.mxu1  ;;  %v2788_v18 = vld [vmem:[%s5419_s0 + $0x1b8] sm:$0xff] }
 0x223   :  { %1428 = vmatmul.f32.gmra.mxu0 %v2777_v30  ;;  %1582 = vmatmul.f32.gmra.mxu2 %v2778_v34  ;;  %v1211_v61 = vadd.f32 %v1210_v23, %v1133_v21  ;;  %v2220_v21 = vld [vmem:[%s5421_s2 + $0x58] sm:$0xff] }
 0x224   :  { %2446 = vperm.xlu1 %2632, %v2220_v21  }
 0x225   :  { %1505 = vmatmul.f32.gmra.mxu1 %v2779_v37  ;;  %v2790_v37 = vld [vmem:[%s5419_s0 + $0x1f0] sm:$0xff] }
 0x226   :  { %2611 = vmatmul.msk.f32.gmra.mxu3 %vm415_vm0, %v2780_v38  ;;  %v1287_v17 = vpop.f32.mrf.mxu2  ;;  %v2211_v38 = vld [vmem:[%s5421_s2 + $0x10] sm:$0xff] }
 0x227   :  { %v1288_v40 = vadd.f32 %v1287_v17, %v1211_v61  ;;  %v2789_v61 = vld [vmem:[%s5419_s0 + $0x1e0] sm:$0xff]  ;;  %2401 = vperm.xlu2 %2634, %v2211_v38  }
 0x228   :  { %v1136_v54 = vpop.f32.mrf.mxu0 }
 0x229   :  { %v1364_v49 = vpop.f32.mrf.mxu3 }
 0x22a   :  { %v4577_v51 = vadd.f32 %v1364_v49, %v1288_v40  ;;  %v1213_v63 = vpop.f32.mrf.mxu1  ;;  %v2791_v40 = vld [vmem:[%s5419_s0 + $0x1e8] sm:$0xff]  ;;  %v2223_v49 = vld [vmem:[%s5421_s2 + $0x70] sm:$0xff] }
 0x22b   :  { %1431 = vmatmul.f32.gmra.mxu0 %v2781_v52  ;;  %1585 = vmatmul.f32.gmra.mxu2 %v2782_v14  ;;  %v1214_v57 = vadd.f32 %v1213_v63, %v1136_v54 }
 0x22c   :  { %2461 = vperm.xlu1 %2632, %v2223_v49  }
 0x22d   :  { %1508 = vmatmul.f32.gmra.mxu1 %v2783_v58  ;;  %v2793_v58 = vld [vmem:[%s5419_s0 + $0x220] sm:$0xff] }
 0x22e   :  { %2612 = vmatmul.msk.f32.gmra.mxu3 %vm415_vm0, %v2784_v2  ;;  %v1290_v62 = vpop.f32.mrf.mxu2  ;;  %v2794_v2 = vld [vmem:[%s5419_s0 + $0x230] sm:$0xff] }
 0x22f   :  { %v1291_v0 = vadd.f32 %v1290_v62, %v1214_v57  ;;  %v2213_v62 = vld [vmem:[%s5421_s2 + $0x20] sm:$0xff] }
 0x230   :  { %v1139_v50 = vpop.f32.mrf.mxu0  ;;  %2411 = vperm.xlu2 %2634, %v2213_v62  }
 0x231   :  { %v1367_v7 = vpop.f32.mrf.mxu3 }
 0x232   :  { %v4595_v16 = vadd.f32 %v1367_v7, %v1291_v0  ;;  %v1216_v10 = vpop.f32.mrf.mxu1 }
 0x233   :  { %1434 = vmatmul.f32.gmra.mxu0 %v2785_v31  ;;  %1588 = vmatmul.f32.gmra.mxu2 %v2786_v11  ;;  %v1217_v13 = vadd.f32 %v1216_v10, %v1139_v50  ;;  %v2796_v50 = vld [vmem:[%s5419_s0 + $0x238] sm:$0xff] }
 0x235   :  { %1511 = vmatmul.f32.gmra.mxu1 %v2787_v46 }
 0x236   :  { %2613 = vmatmul.msk.f32.gmra.mxu3 %vm415_vm0, %v2788_v18  ;;  %v1293_v1 = vpop.f32.mrf.mxu2  ;;  %v2797_v18 = vld [vmem:[%s5419_s0 + $0x260] sm:$0xff] }
 0x237   :  { %v1294_v20 = vadd.f32 %v1293_v1, %v1217_v13  ;;  %v2798_v1 = vld [vmem:[%s5419_s0 + $0x270] sm:$0xff] }
 0x238   :  { %v1142_v35 = vpop.f32.mrf.mxu0 }
 0x239   :  { %v1370_v23 = vpop.f32.mrf.mxu3 }
 0x23a   :  { %v4613_v30 = vadd.f32 %v1370_v23, %v1294_v20  ;;  %v1219_v34 = vpop.f32.mrf.mxu1  ;;  %v2216_v20 = vld [vmem:[%s5421_s2 + $0x38] sm:$0xff] }
 0x23b   :  { %1437 = vmatmul.f32.gmra.mxu0 %v2789_v61  ;;  %1591 = vmatmul.f32.gmra.mxu2 %v2790_v37  ;;  %v1220_v17 = vadd.f32 %v1219_v34, %v1142_v35  ;;  %v2799_v35 = vld [vmem:[%s5419_s0 + $0x268] sm:$0xff]  ;;  %v2800_v23 = vld [vmem:[%s5419_s0 + $0x278] sm:$0xff] }
 0x23c   :  { %2426 = vperm.xlu2 %2634, %v2216_v20  }
 0x23d   :  { %1514 = vmatmul.f32.gmra.mxu1 %v2791_v40 }
 0x23e   :  { %2614 = vmatmul.msk.f32.gmra.mxu3 %vm415_vm0, %v2792_v42  ;;  %v1296_v45 = vpop.f32.mrf.mxu2  ;;  %v2801_v42 = vld [vmem:[%s5419_s0 + $0x2a0] sm:$0xff] }
 0x23f   :  { %v1297_v54 = vadd.f32 %v1296_v45, %v1220_v17  ;;  %v2802_v45 = vld [vmem:[%s5419_s0 + $0x2b0] sm:$0xff] }
 0x240   :  { %v1145_v63 = vpop.f32.mrf.mxu0 }
 0x241   :  { %v1373_v52 = vpop.f32.mrf.mxu3 }
 0x242   :  { %v4634_v14 = vadd.f32 %v1373_v52, %v1297_v54  ;;  %v1222_v57 = vpop.f32.mrf.mxu1  ;;  %v2219_v54 = vld [vmem:[%s5421_s2 + $0x50] sm:$0xff]  ;;  %v2804_v52 = vld [vmem:[%s5419_s0 + $0x2b8] sm:$0xff] }
 0x243   :  { %1440 = vmatmul.f32.gmra.mxu0 %v2793_v58  ;;  %1594 = vmatmul.f32.gmra.mxu2 %v2794_v2  ;;  %v1223_v0 = vadd.f32 %v1222_v57, %v1145_v63  ;;  %v2803_v63 = vld [vmem:[%s5419_s0 + $0x2a8] sm:$0xff] }
 0x244   :  { %2441 = vperm.xlu2 %2634, %v2219_v54  }
 0x245   :  { %1517 = vmatmul.f32.gmra.mxu1 %v2795_v3 }
 0x246   :  { %2615 = vmatmul.msk.f32.gmra.mxu3 %vm415_vm0, %v2796_v50  ;;  %v1299_v7 = vpop.f32.mrf.mxu2  ;;  %v2805_v50 = vld [vmem:[%s5419_s0 + $0x2e0] sm:$0xff] }
 0x247   :  { %v1300_v10 = vadd.f32 %v1299_v7, %v1223_v0  ;;  %v2806_v7 = vld [vmem:[%s5419_s0 + $0x2f0] sm:$0xff] }
 0x248   :  { %v1148_v31 = vpop.f32.mrf.mxu0 }
 0x249   :  { %v1376_v11 = vpop.f32.mrf.mxu3 }
 0x24a   :  { %v4652_v13 = vadd.f32 %v1376_v11, %v1300_v10  ;;  %v1225_v46 = vpop.f32.mrf.mxu1  ;;  %v2222_v10 = vld [vmem:[%s5421_s2 + $0x68] sm:$0xff] }
 0x24b   :  { %1443 = vmatmul.f32.gmra.mxu0 %v2797_v18  ;;  %1597 = vmatmul.f32.gmra.mxu2 %v2798_v1  ;;  %v1226_v21 = vadd.f32 %v1225_v46, %v1148_v31  ;;  %v2807_v11 = vld [vmem:[%s5419_s0 + $0x2e8] sm:$0xff]  ;;  %v2808_v46 = vld [vmem:[%s5419_s0 + $0x2f8] sm:$0xff] }
 0x24c   :  { %2456 = vperm.xlu2 %2634, %v2222_v10  }
 0x24d   :  { %1520 = vmatmul.f32.gmra.mxu1 %v2799_v35 }
 0x24e   :  { %2616 = vmatmul.msk.f32.gmra.mxu3 %vm415_vm0, %v2800_v23  ;;  %v1302_v34 = vpop.f32.mrf.mxu2 }
 0x24f   :  { %v1303_v61 = vadd.f32 %v1302_v34, %v1226_v21 }
 0x250   :  { %v1151_v37 = vpop.f32.mrf.mxu0 }
 0x251   :  { %v1379_v38 = vpop.f32.mrf.mxu3 }
 0x252   :  { %v4670_v17 = vadd.f32 %v1379_v38, %v1303_v61  ;;  %v1228_v40 = vpop.f32.mrf.mxu1  ;;  %v2809_v61 = vld [vmem:[%s5419_s0 + $0x320] sm:$0xff] }
 0x253   :  { %1446 = vmatmul.f32.gmra.mxu0 %v2801_v42  ;;  %1600 = vmatmul.f32.gmra.mxu2 %v2802_v45  ;;  %v1229_v49 = vadd.f32 %v1228_v40, %v1151_v37  ;;  %v2810_v37 = vld [vmem:[%s5419_s0 + $0x330] sm:$0xff]  ;;  %v2225_v38 = vld [vmem:[%s5421_s2 + $0x80] sm:$0xff]  ;;  %v2811_v40 = vld [vmem:[%s5419_s0 + $0x328] sm:$0xff] }
 0x254   :  { %2471 = vperm.xlu2 %2634, %v2225_v38   ;;  %v2812_v42 = vld [vmem:[%s5419_s0 + $0x338] sm:$0xff] }
 0x255   :  { %1523 = vmatmul.f32.gmra.mxu1 %v2803_v63 }
 0x256   :  { %2617 = vmatmul.msk.f32.gmra.mxu3 %vm415_vm0, %v2804_v52  ;;  %v1305_v57 = vpop.f32.mrf.mxu2 }
 0x257   :  { %v1306_v58 = vadd.f32 %v1305_v57, %v1229_v49 }
 0x258   :  { %v1154_v2 = vpop.f32.mrf.mxu0 }
 0x259   :  { %v1382_v62 = vpop.f32.mrf.mxu3 }
 0x25a   :  { %v4688_v0 = vadd.f32 %v1382_v62, %v1306_v58  ;;  %v1231_v3 = vpop.f32.mrf.mxu1  ;;  %v2814_v62 = vld [vmem:[%s5419_s0 + $0x370] sm:$0xff] }
 0x25b   :  { %1449 = vmatmul.f32.gmra.mxu0 %v2805_v50  ;;  %1603 = vmatmul.f32.gmra.mxu2 %v2806_v7  ;;  %v1232_v31 = vadd.f32 %v1231_v3, %v1154_v2  ;;  %v2813_v2 = vld [vmem:[%s5419_s0 + $0x360] sm:$0xff]  ;;  %v2815_v3 = vld [vmem:[%s5419_s0 + $0x368] sm:$0xff]  ;;  %v2816_v50 = vld [vmem:[%s5419_s0 + $0x378] sm:$0xff] }
 0x25d   :  { %1526 = vmatmul.f32.gmra.mxu1 %v2807_v11 }
 0x25e   :  { %2618 = vmatmul.msk.f32.gmra.mxu3 %vm415_vm0, %v2808_v46  ;;  %v1308_v18 = vpop.f32.mrf.mxu2 }
 0x25f   :  { %v1309_v1 = vadd.f32 %v1308_v18, %v1232_v31 }
 0x260   :  { %v1157_v20 = vpop.f32.mrf.mxu0 }
 0x261   :  { %v1385_v21 = vpop.f32.mrf.mxu3 }
 0x262   :  { %v4706_v35 = vadd.f32 %v1385_v21, %v1309_v1  ;;  %v1234_v23 = vpop.f32.mrf.mxu1  ;;  %v2818_v21 = vld [vmem:[%s5419_s0 + $0x3b0] sm:$0xff] }
 0x263   :  { %v1235_v34 = vadd.f32 %v1234_v23, %v1157_v20  ;;  %1452 = vmatmul.f32.gmra.mxu0 %v2809_v61  ;;  %1606 = vmatmul.f32.gmra.mxu2 %v2810_v37  ;;  %v2817_v20 = vld [vmem:[%s5419_s0 + $0x3a0] sm:$0xff]  ;;  %v2819_v23 = vld [vmem:[%s5419_s0 + $0x3a8] sm:$0xff] }
 0x265   :  { %1529 = vmatmul.f32.gmra.mxu1 %v2811_v40 }
 0x266   :  { %2619 = vmatmul.msk.f32.gmra.mxu3 %vm415_vm0, %v2812_v42  ;;  %v1311_v45 = vpop.f32.mrf.mxu2 }
 0x267   :  { %v1312_v54 = vadd.f32 %v1311_v45, %v1235_v34  ;;  %v2820_v34 = vld [vmem:[%s5419_s0 + $0x3b8] sm:$0xff] }
 0x268   :  { %v1160_v49 = vpop.f32.mrf.mxu0 }
 0x269   :  { %v1388_v63 = vpop.f32.mrf.mxu3 }
 0x26a   :  { %v4724_v52 = vadd.f32 %v1388_v63, %v1312_v54  ;;  %v1237_v57 = vpop.f32.mrf.mxu1  ;;  %v2822_v63 = vld [vmem:[%s5419_s0 + $0x3f0] sm:$0xff] }
 0x26b   :  { %v1238_v58 = vadd.f32 %v1237_v57, %v1160_v49  ;;  %1455 = vmatmul.f32.gmra.mxu0 %v2813_v2  ;;  %1609 = vmatmul.f32.gmra.mxu2 %v2814_v62  ;;  %v2821_v49 = vld [vmem:[%s5419_s0 + $0x3e0] sm:$0xff]  ;;  %v2823_v57 = vld [vmem:[%s5419_s0 + $0x3e8] sm:$0xff] }
 0x26d   :  { %1532 = vmatmul.f32.gmra.mxu1 %v2815_v3 }
 0x26e   :  { %2620 = vmatmul.msk.f32.gmra.mxu3 %vm415_vm0, %v2816_v50  ;;  %v1314_v7 = vpop.f32.mrf.mxu2 }
 0x26f   :  { %v1315_v10 = vadd.f32 %v1314_v7, %v1238_v58  ;;  %v2824_v58 = vld [vmem:[%s5419_s0 + $0x3f8] sm:$0xff] }
 0x270   :  { %v1163_v31 = vpop.f32.mrf.mxu0 }
 0x271   :  { %v1391_v11 = vpop.f32.mrf.mxu3 }
 0x272   :  { %v4739_v46 = vadd.f32 %v1391_v11, %v1315_v10  ;;  %v1240_v18 = vpop.f32.mrf.mxu1  ;;  %v2825_v11 = vld [vmem:[%s5419_s0 + $0x420] sm:$0xff] }
 0x273   :  { %v1241_v1 = vadd.f32 %v1240_v18, %v1163_v31  ;;  %1458 = vmatmul.f32.gmra.mxu0 %v2817_v20  ;;  %1612 = vmatmul.f32.gmra.mxu2 %v2818_v21  ;;  %v2826_v18 = vld [vmem:[%s5419_s0 + $0x430] sm:$0xff]  ;;  %v2827_v20 = vld [vmem:[%s5419_s0 + $0x428] sm:$0xff] }
 0x275   :  { %1535 = vmatmul.f32.gmra.mxu1 %v2819_v23 }
 0x276   :  { %2621 = vmatmul.msk.f32.gmra.mxu3 %vm415_vm0, %v2820_v34  ;;  %v1317_v61 = vpop.f32.mrf.mxu2 }
 0x277   :  { %v1318_v37 = vadd.f32 %v1317_v61, %v1241_v1 }
 0x278   :  { %v1166_v38 = vpop.f32.mrf.mxu0 }
 0x279   :  { %v1394_v40 = vpop.f32.mrf.mxu3 }
 0x27a   :  { %v4754_v42 = vadd.f32 %v1394_v40, %v1318_v37  ;;  %v1243_v45 = vpop.f32.mrf.mxu1 }
 0x27b   :  { %v1244_v54 = vadd.f32 %v1243_v45, %v1166_v38  ;;  %1461 = vmatmul.f32.gmra.mxu0 %v2821_v49  ;;  %1615 = vmatmul.f32.gmra.mxu2 %v2822_v63  ;;  %v2829_v45 = vld [vmem:[%s5419_s0 + $0x460] sm:$0xff] }
 0x27d   :  { %1538 = vmatmul.f32.gmra.mxu1 %v2823_v57 }
 0x27e   :  { %2622 = vmatmul.msk.f32.gmra.mxu3 %vm415_vm0, %v2824_v58  ;;  %v1320_v2 = vpop.f32.mrf.mxu2  ;;  %v2832_v58 = vld [vmem:[%s5419_s0 + $0x478] sm:$0xff] }
 0x27f   :  { %v1321_v62 = vadd.f32 %v1320_v2, %v1244_v54  ;;  %v2830_v54 = vld [vmem:[%s5419_s0 + $0x470] sm:$0xff] }
 0x280   :  { %v1417_v3 = vpop.f32.mrf.mxu0 }
 0x281   :  { %v1397_v50 = vpop.f32.mrf.mxu3  ;;  %v1418_v7 = vadd.f32 %v1417_v3, %v4433_v24  ;;  %v2828_v24 = vld [vmem:[%s5419_s0 + $0x438] sm:$0xff] }
 0x282   :  { %v4770_v10 = vadd.f32 %v1397_v50, %v1321_v62  ;;  %v1494_v31 = vpop.f32.mrf.mxu1 }
 0x283   :  { %1464 = vmatmul.f32.gmra.mxu0 %v2825_v11  ;;  %1618 = vmatmul.f32.gmra.mxu2 %v2826_v18  ;;  %v1495_v1 = vadd.f32 %v1494_v31, %v1418_v7  ;;  %v2833_v18 = vld [vmem:[%s5419_s0 + $0x4a0] sm:$0xff] }
 0x285   :  { %1541 = vmatmul.f32.gmra.mxu1 %v2827_v20 }
 0x286   :  { %2623 = vmatmul.msk.f32.gmra.mxu3 %vm415_vm0, %v2828_v24  ;;  %v1571_v21 = vpop.f32.mrf.mxu2 }
 0x287   :  { %v1572_v23 = vadd.f32 %v1571_v21, %v1495_v1  ;;  %v2834_v1 = vld [vmem:[%s5419_s0 + $0x4b0] sm:$0xff] }
 0x288   :  { %v1420_v34 = vpop.f32.mrf.mxu0 }
 0x289   :  { %v1421_v61 = vadd.f32 %v1420_v34, %v4447_v43  ;;  %v1648_v37 = vpop.f32.mrf.mxu3  ;;  %v2831_v43 = vld [vmem:[%s5419_s0 + $0x468] sm:$0xff] }
 0x28a   :  { %v4786_v38 = vadd.f32 %v1648_v37, %v1572_v23  ;;  %v1497_v40 = vpop.f32.mrf.mxu1  ;;  %v2836_v23 = vld [vmem:[%s5419_s0 + $0x4b8] sm:$0xff] }
 0x28b   :  { %1467 = vmatmul.f32.gmra.mxu0 %v2829_v45  ;;  %1621 = vmatmul.f32.gmra.mxu2 %v2830_v54  ;;  %v1498_v63 = vadd.f32 %v1497_v40, %v1421_v61 }
 0x28c   :  { %v1709_v49 = vsel %vm1708_vm1, %v4786_v38, 0.0 }
 0x28d   :  { %1544 = vmatmul.f32.gmra.mxu1 %v2831_v43  ;;  %v1710_v57 = vadd.f32 %v1709_v49, %v3982_v22  ;;  %v2838_v43 = vld [vmem:[%s5419_s0 + $0x4f0] sm:$0xff] }
 0x28e   :  { %2624 = vmatmul.msk.f32.gmra.mxu3 %vm415_vm0, %v2832_v58  ;;  %v1574_v2 = vpop.f32.mrf.mxu2 }
 0x28f   :  { %v1575_v62 = vadd.f32 %v1574_v2, %v1498_v63  ;;  %1711 = vadd.xlane.f32.xlu0 %v1710_v57  ;;  %v2837_v63 = vld [vmem:[%s5419_s0 + $0x4e0] sm:$0xff] }
 0x290   :  { %v1423_v3 = vpop.f32.mrf.mxu0 }
 0x291   :  { %v1424_v50 = vadd.f32 %v1423_v3, %v4461_v56  ;;  %v1651_v7 = vpop.f32.mrf.mxu3  ;;  %v2835_v56 = vld [vmem:[%s5419_s0 + $0x4a8] sm:$0xff] }
 0x292   :  { %v4805_v31 = vadd.f32 %v1651_v7, %v1575_v62  ;;  %v1500_v11 = vpop.f32.mrf.mxu1  ;;  %v2840_v62 = vld [vmem:[%s5419_s0 + $0x4f8] sm:$0xff] }
 0x293   :  { %1470 = vmatmul.f32.gmra.mxu0 %v2833_v18  ;;  %1624 = vmatmul.f32.gmra.mxu2 %v2834_v1  ;;  %v1501_v24 = vadd.f32 %v1500_v11, %v1424_v50 }
 0x294   :  { %v1713_v20 = vsel %vm1708_vm1, %v4805_v31, 0.0 }
 0x295   :  { %1547 = vmatmul.f32.gmra.mxu1 %v2835_v56  ;;  %v1714_v21 = vadd.f32 %v1713_v20, %v4004_v41 }
 0x296   :  { %2625 = vmatmul.msk.f32.gmra.mxu3 %vm415_vm0, %v2836_v23  ;;  %v1577_v34 = vpop.f32.mrf.mxu2 }
 0x297   :  { %v1578_v61 = vadd.f32 %v1577_v34, %v1501_v24  ;;  %1715 = vadd.xlane.f32.xlu0 %v1714_v21 }
 0x298   :  { %v1426_v37 = vpop.f32.mrf.mxu0 }
 0x299   :  { %v1427_v40 = vadd.f32 %v1426_v37, %v4475_v6  ;;  %v1654_v45 = vpop.f32.mrf.mxu3  ;;  %v2839_v6 = vld [vmem:[%s5419_s0 + $0x4e8] sm:$0xff] }
 0x29a   :  { %v4824_v54 = vadd.f32 %v1654_v45, %v1578_v61  ;;  %v1503_v49 = vpop.f32.mrf.mxu1 }
 0x29b   :  { %1473 = vmatmul.f32.gmra.mxu0 %v2837_v63  ;;  %1627 = vmatmul.f32.gmra.mxu2 %v2838_v43  ;;  %v1504_v58 = vadd.f32 %v1503_v49, %v1427_v40 }
 0x29c   :  { %v1717_v57 = vsel %vm1708_vm1, %v4824_v54, 0.0 }
 0x29d   :  { %1550 = vmatmul.f32.gmra.mxu1 %v2839_v6  ;;  %v1718_v2 = vadd.f32 %v1717_v57, %v4026_v59 }
 0x29e   :  { %2626 = vmatmul.msk.f32.gmra.mxu3 %vm415_vm0, %v2840_v62  ;;  %v1580_v3 = vpop.f32.mrf.mxu2 }
 0x29f   :  { %v1581_v50 = vadd.f32 %v1580_v3, %v1504_v58  ;;  %1719 = vadd.xlane.f32.xlu1 %v1718_v2 }
 0x2a0   :  { %v1429_v7 = vpop.f32.mrf.mxu0 }
 0x2a1   :  { %v1430_v11 = vadd.f32 %v1429_v7, %v4496_v29  ;;  %v1657_v18 = vpop.f32.mrf.mxu3 }
 0x2a2   :  { %v4843_v1 = vadd.f32 %v1657_v18, %v1581_v50  ;;  %v1506_v20 = vpop.f32.mrf.mxu1 }
 0x2a3   :  { %v1507_v56 = vadd.f32 %v1506_v20, %v1430_v11 }
 0x2a4   :  { %v1721_v24 = vsel %vm1708_vm1, %v4843_v1, 0.0 }
 0x2a5   :  { %v1722_v21 = vadd.f32 %v1721_v24, %v4045_v12 }
 0x2a6   :  { %v1583_v23 = vpop.f32.mrf.mxu2 }
 0x2a7   :  { %v1584_v34 = vadd.f32 %v1583_v23, %v1507_v56  ;;  %1723 = vadd.xlane.f32.xlu1 %v1722_v21 }
 0x2a8   :  { %v1432_v61 = vpop.f32.mrf.mxu0 }
 0x2a9   :  { %v1433_v37 = vadd.f32 %v1432_v61, %v4514_v47  ;;  %v1660_v40 = vpop.f32.mrf.mxu3 }
 0x2aa   :  { %v4849_v45 = vadd.f32 %v1660_v40, %v1584_v34  ;;  %v1509_v29 = vpop.f32.mrf.mxu1 }
 0x2ab   :  { %v1510_v63 = vadd.f32 %v1509_v29, %v1433_v37 }
 0x2ac   :  { %v1725_v49 = vsel %vm1708_vm1, %v4849_v45, 0.0 }
 0x2ad   :  { %v1726_v43 = vadd.f32 %v1725_v49, %v4069_v33 }
 0x2ae   :  { %v1586_v57 = vpop.f32.mrf.mxu2 }
 0x2af   :  { %v1587_v58 = vadd.f32 %v1586_v57, %v1510_v63  ;;  %1727 = vadd.xlane.f32.xlu2 %v1726_v43 }
 0x2b0   :  { %v1435_v6 = vpop.f32.mrf.mxu0 }
 0x2b1   :  { %v1436_v2 = vadd.f32 %v1435_v6, %v4535_v5  ;;  %v1663_v62 = vpop.f32.mrf.mxu3 }
 0x2b2   :  { %v4855_v3 = vadd.f32 %v1663_v62, %v1587_v58  ;;  %v1512_v47 = vpop.f32.mrf.mxu1 }
 0x2b3   :  { %v1513_v7 = vadd.f32 %v1512_v47, %v1436_v2 }
 0x2b4   :  { %v1729_v50 = vsel %vm1708_vm1, %v4855_v3, 0.0 }
 0x2b5   :  { %v1730_v11 = vadd.f32 %v1729_v50, %v4096_v55 }
 0x2b6   :  { %v1589_v18 = vpop.f32.mrf.mxu2 }
 0x2b7   :  { %v1590_v20 = vadd.f32 %v1589_v18, %v1513_v7  ;;  %1731 = vadd.xlane.f32.xlu2 %v1730_v11 }
 0x2b8   :  { %v1438_v24 = vpop.f32.mrf.mxu0 }
 0x2b9   :  { %v1439_v56 = vadd.f32 %v1438_v24, %v4556_v27  ;;  %v1666_v21 = vpop.f32.mrf.mxu3 }
 0x2ba   :  { %v4861_v23 = vadd.f32 %v1666_v21, %v1590_v20  ;;  %v1515_v5 = vpop.f32.mrf.mxu1 }
 0x2bb   :  { %v1516_v61 = vadd.f32 %v1515_v5, %v1439_v56 }
 0x2bc   :  { %v1733_v34 = vsel %vm1708_vm1, %v4861_v23, 0.0 }
 0x2bd   :  { %v1734_v37 = vadd.f32 %v1733_v34, %v4117_v9 }
 0x2be   :  { %v1592_v40 = vpop.f32.mrf.mxu2 }
 0x2bf   :  { %v1593_v29 = vadd.f32 %v1592_v40, %v1516_v61  ;;  %1735 = vadd.xlane.f32.xlu0 %v1734_v37  ;;  %v4879_v40 = vpop.permute.xlu0 %2396 }
 0x2c0   :  { %v1441_v49 = vpop.f32.mrf.mxu0 }
 0x2c1   :  { %v1442_v63 = vadd.f32 %v1441_v49, %v4577_v51  ;;  %v1669_v43 = vpop.f32.mrf.mxu3 }
 0x2c2   :  { %v4867_v57 = vadd.f32 %v1669_v43, %v1593_v29  ;;  %v1518_v27 = vpop.f32.mrf.mxu1 }
 0x2c3   :  { %v1519_v6 = vadd.f32 %v1518_v27, %v1442_v63 }
 0x2c4   :  { %v1737_v58 = vsel %vm1708_vm1, %v4867_v57, 0.0 }
 0x2c5   :  { %v1738_v2 = vadd.f32 %v1737_v58, %v4138_v28  ;;  %v4886_v58 = vpop.permute.xlu1 %2391 }
 0x2c6   :  { %v1595_v62 = vpop.f32.mrf.mxu2 }
 0x2c7   :  { %v1596_v47 = vadd.f32 %v1595_v62, %v1519_v6  ;;  %1739 = vadd.xlane.f32.xlu1 %v1738_v2 }
 0x2c8   :  { %v1444_v50 = vpop.f32.mrf.mxu0 }
 0x2c9   :  { %v1445_v7 = vadd.f32 %v1444_v50, %v4595_v16  ;;  %v1672_v11 = vpop.f32.mrf.mxu3 }
 0x2ca   :  { %v4873_v18 = vadd.f32 %v1672_v11, %v1596_v47  ;;  %v1521_v51 = vpop.f32.mrf.mxu1 }
 0x2cb   :  { %v1522_v24 = vadd.f32 %v1521_v51, %v1445_v7  ;;  %v4891_v7 = vpop.permute.xlu0 %2421 }
 0x2cc   :  { %v1741_v20 = vsel %vm1708_vm1, %v4873_v18, 0.0 }
 0x2cd   :  { %v1742_v56 = vadd.f32 %v1741_v20, %v4162_v36 }
 0x2ce   :  { %v1598_v21 = vpop.f32.mrf.mxu2 }
 0x2cf   :  { %v1599_v5 = vadd.f32 %v1598_v21, %v1522_v24  ;;  %1743 = vadd.xlane.f32.xlu2 %v1742_v56 }
 0x2d0   :  { %v1447_v34 = vpop.f32.mrf.mxu0 }
 0x2d1   :  { %v1448_v61 = vadd.f32 %v1447_v34, %v4613_v30  ;;  %v1675_v37 = vpop.f32.mrf.mxu3 }
 0x2d2   :  { %v4881_v16 = vadd.f32 %v1675_v37, %v1599_v5  ;;  %v1524_v29 = vpop.f32.mrf.mxu1  ;;  %v4896_v5 = vpop.permute.xlu1 %2406 }
 0x2d3   :  { %v1525_v63 = vadd.f32 %v1524_v29, %v1448_v61 }
 0x2d4   :  { %v1745_v49 = vsel %vm1708_vm1, %v4881_v16, 0.0 }
 0x2d5   :  { %v1746_v43 = vadd.f32 %v1745_v49, %v4186_v4 }
 0x2d6   :  { %v1601_v27 = vpop.f32.mrf.mxu2 }
 0x2d7   :  { %v1602_v6 = vadd.f32 %v1601_v27, %v1525_v63  ;;  %1747 = vadd.xlane.f32.xlu0 %v1746_v43  ;;  %v4904_v43 = vpop.permute.xlu0 %2436 }
 0x2d8   :  { %v1450_v2 = vpop.f32.mrf.mxu0  ;;  %5443 = vst [vmem:[#allocation5_spill] sm:$0xff] %v4904_v43 }
 0x2d9   :  { %v1451_v30 = vadd.f32 %v1450_v2, %v4634_v14  ;;  %v1678_v62 = vpop.f32.mrf.mxu3 }
 0x2da   :  { %v4889_v47 = vadd.f32 %v1678_v62, %v1602_v6  ;;  %v1527_v50 = vpop.f32.mrf.mxu1  ;;  %v4906_v6 = vpop.permute.xlu2 %2401 }
 0x2db   :  { %v1528_v51 = vadd.f32 %v1527_v50, %v1451_v30 }
 0x2dc   :  { %v1749_v11 = vsel %vm1708_vm1, %v4889_v47, 0.0 }
 0x2dd   :  { %v1750_v20 = vadd.f32 %v1749_v11, %v4213_v26 }
 0x2de   :  { %v1604_v24 = vpop.f32.mrf.mxu2 }
 0x2df   :  { %v1605_v56 = vadd.f32 %v1604_v24, %v1528_v51  ;;  %1751 = vadd.xlane.f32.xlu1 %v1750_v20  ;;  %v4911_v51 = vpop.permute.xlu1 %2416 }
 0x2e0   :  { %v1453_v21 = vpop.f32.mrf.mxu0 }
 0x2e1   :  { %v1454_v14 = vadd.f32 %v1453_v21, %v4652_v13  ;;  %v1681_v34 = vpop.f32.mrf.mxu3 }
 0x2e2   :  { %v4899_v61 = vadd.f32 %v1681_v34, %v1605_v56  ;;  %v1530_v37 = vpop.f32.mrf.mxu1  ;;  %v4916_v34 = vpop.permute.xlu0 %2451 }
 0x2e3   :  { %v1531_v49 = vadd.f32 %v1530_v37, %v1454_v14  ;;  %5444 = vst [vmem:[#allocation6_spill] sm:$0xff] %v4916_v34 }
 0x2e4   :  { %v1753_v29 = vsel %vm1708_vm1, %v4899_v61, 0.0 }
 0x2e5   :  { %v1754_v63 = vadd.f32 %v1753_v29, %v4234_v44  ;;  %v4918_v29 = vpop.permute.xlu2 %2411 }
 0x2e6   :  { %v1607_v27 = vpop.f32.mrf.mxu2 }
 0x2e7   :  { %v1608_v2 = vadd.f32 %v1607_v27, %v1531_v49  ;;  %1755 = vadd.xlane.f32.xlu2 %v1754_v63 }
 0x2e8   :  { %v1456_v30 = vpop.f32.mrf.mxu0 }
 0x2e9   :  { %v1457_v13 = vadd.f32 %v1456_v30, %v4670_v17  ;;  %v1684_v62 = vpop.f32.mrf.mxu3  ;;  %v4925_v30 = vpop.permute.xlu1 %2431 }
 0x2ea   :  { %v4909_v50 = vadd.f32 %v1684_v62, %v1608_v2  ;;  %v1533_v11 = vpop.f32.mrf.mxu1 }
 0x2eb   :  { %v1534_v24 = vadd.f32 %v1533_v11, %v1457_v13 }
 0x2ec   :  { %v1757_v20 = vsel %vm1708_vm1, %v4909_v50, 0.0 }
 0x2ed   :  { %v1758_v56 = vadd.f32 %v1757_v20, %v4255_v32 }
 0x2ee   :  { %v1610_v21 = vpop.f32.mrf.mxu2 }
 0x2ef   :  { %v1611_v14 = vadd.f32 %v1610_v21, %v1534_v24  ;;  %1759 = vadd.xlane.f32.xlu0 %v1758_v56 }
 0x2f0   :  { %v1459_v37 = vpop.f32.mrf.mxu0 }
 0x2f1   :  { %v1460_v17 = vadd.f32 %v1459_v37, %v4688_v0  ;;  %v1687_v49 = vpop.f32.mrf.mxu3  ;;  %v4929_v0 = vpop.permute.xlu0 %2466 }
 0x2f2   :  { %v4921_v63 = vadd.f32 %v1687_v49, %v1611_v14  ;;  %v1536_v27 = vpop.f32.mrf.mxu1  ;;  %5445 = vst [vmem:[#allocation7_spill] sm:$0xff] %v4929_v0  ;;  %v4933_v49 = vpop.permute.xlu2 %2426 }
 0x2f3   :  { %v1537_v13 = vadd.f32 %v1536_v27, %v1460_v17 }
 0x2f4   :  { %v1761_v2 = vsel %vm1708_vm1, %v4921_v63, 0.0 }
 0x2f5   :  { %v1762_v62 = vadd.f32 %v1761_v2, %v4279_v19 }
 0x2f6   :  { %v1613_v11 = vpop.f32.mrf.mxu2 }
 0x2f7   :  { %v1614_v20 = vadd.f32 %v1613_v11, %v1537_v13  ;;  %1763 = vadd.xlane.f32.xlu1 %v1762_v62  ;;  %v4938_v13 = vpop.permute.xlu1 %2446 }
 0x2f8   :  { %v1462_v24 = vpop.f32.mrf.mxu0  ;;  %5446 = vst [vmem:[#allocation8_spill] sm:$0xff] %v4938_v13 }
 0x2f9   :  { %v1463_v56 = vadd.f32 %v1462_v24, %v4706_v35  ;;  %v1690_v21 = vpop.f32.mrf.mxu3 }
 0x2fa   :  { %v4931_v14 = vadd.f32 %v1690_v21, %v1614_v20  ;;  %v1539_v37 = vpop.f32.mrf.mxu1 }
 0x2fb   :  { %v1540_v17 = vadd.f32 %v1539_v37, %v1463_v56  ;;  %v4945_v56 = vpop.permute.xlu2 %2441 }
 0x2fc   :  { %v1765_v25 = vsel %vm1708_vm1, %v4931_v14, 0.0 }
 0x2fd   :  { %v1766_v27 = vadd.f32 %v1765_v25, %v4303_v39 }
 0x2fe   :  { %v1616_v2 = vpop.f32.mrf.mxu2 }
 0x2ff   :  { %v1617_v62 = vadd.f32 %v1616_v2, %v1540_v17  ;;  %1767 = vadd.xlane.f32.xlu2 %v1766_v27 }
 0x300   :  { %v1465_v35 = vpop.f32.mrf.mxu0 }
 0x301   :  { %v1466_v11 = vadd.f32 %v1465_v35, %v4724_v52  ;;  %v1693_v24 = vpop.f32.mrf.mxu3 }
 0x302   :  { %v4941_v20 = vadd.f32 %v1693_v24, %v1617_v62  ;;  %v1712_v21 = vpop.xlane.xlu0 %1711  ;;  %v1542_v0 = vpop.f32.mrf.mxu1 }
 0x303   :  { %v1789_v34 = vmul.f32 0.0051020407, %v1712_v21  ;;  %v1543_v17 = vadd.f32 %v1542_v0, %v1466_v11  ;;  %v4958_v21 = vpop.permute.xlu1 %2461 }
 0x304   :  { %v1769_v43 = vsel %vm1708_vm1, %v4941_v20, 0.0  ;;  %5447 = vst [vmem:[#allocation9_spill] sm:$0xff] %v4958_v21 }
 0x305   :  { %v4948_v25 = vsub.f32 %v3982_v22, %v1789_v34  ;;  %v4951_v37 = vsub.f32 %v4786_v38, %v1789_v34  ;;  %v1770_v52 = vadd.f32 %v1769_v43, %v4330_v60 }
 0x306   :  { %v1619_v27 = vpop.f32.mrf.mxu2 }
 0x307   :  { %v1620_v2 = vadd.f32 %v1619_v27, %v1543_v17  ;;  %1771 = vadd.xlane.f32.xlu0 %v1770_v52  ;;  %v1849_v62 = vmul.f32 %v4948_v25, %v4948_v25  ;;  %v1850_v35 = vmul.f32 %v4951_v37, %v4951_v37 }
 0x308   :  { %v1468_v24 = vpop.f32.mrf.mxu0 }
 0x309   :  { %v1469_v22 = vadd.f32 %v1468_v24, %v4739_v46  ;;  %v1696_v13 = vpop.f32.mrf.mxu3  ;;  %v1889_v38 = vsel %vm1708_vm1, %v1850_v35, 0.0 }
 0x30a   :  { %v4962_v34 = vadd.f32 %v1696_v13, %v1620_v2  ;;  %v1716_v43 = vpop.xlane.xlu0 %1715  ;;  %v1545_v0 = vpop.f32.mrf.mxu1  ;;  %v1890_v11 = vadd.f32 %v1889_v38, %v1849_v62 }
 0x30b   :  { %v1790_v17 = vmul.f32 0.0051020407, %v1716_v43  ;;  %v1546_v46 = vadd.f32 %v1545_v0, %v1469_v22  ;;  %v4973_v13 = vpop.permute.xlu2 %2456 }
 0x30c   :  { %1891 = vadd.xlane.f32.xlu2 %v1890_v11  ;;  %v1773_v52 = vsel %vm1708_vm1, %v4962_v34, 0.0  ;;  %5448 = vst [vmem:[#allocation10_spill] sm:$0xff] %v4973_v13 }
 0x30d   :  { %v4967_v27 = vsub.f32 %v4004_v41, %v1790_v17  ;;  %v4970_v21 = vsub.f32 %v4805_v31, %v1790_v17  ;;  %v1774_v24 = vadd.f32 %v1773_v52, %v4351_v15 }
 0x30e   :  { %v1622_v35 = vpop.f32.mrf.mxu2 }
 0x30f   :  { %v1623_v2 = vadd.f32 %v1622_v35, %v1546_v46  ;;  %1775 = vadd.xlane.f32.xlu1 %v1774_v24  ;;  %v1851_v62 = vmul.f32 %v4967_v27, %v4967_v27  ;;  %v1852_v38 = vmul.f32 %v4970_v21, %v4970_v21 }
 0x310   :  { %v1471_v43 = vpop.f32.mrf.mxu0 }
 0x311   :  { %v1472_v41 = vadd.f32 %v1471_v43, %v4754_v42  ;;  %v1699_v11 = vpop.f32.mrf.mxu3  ;;  %v1893_v31 = vsel %vm1708_vm1, %v1852_v38, 0.0 }
 0x312   :  { %v4981_v22 = vadd.f32 %v1699_v11, %v1623_v2  ;;  %v1720_v0 = vpop.xlane.xlu1 %1719  ;;  %v1548_v17 = vpop.f32.mrf.mxu1  ;;  %v1894_v52 = vadd.f32 %v1893_v31, %v1851_v62 }
 0x313   :  { %v1791_v13 = vmul.f32 0.0051020407, %v1720_v0  ;;  %v1549_v42 = vadd.f32 %v1548_v17, %v1472_v41  ;;  %v4996_v0 = vpop.permute.xlu2 %2471 }
 0x314   :  { %1895 = vadd.xlane.f32.xlu0 %v1894_v52  ;;  %v1777_v46 = vsel %vm1708_vm1, %v4981_v22, 0.0  ;;  %5449 = vst [vmem:[#allocation11_spill] sm:$0xff] %v4996_v0 }
 0x315   :  { %v4986_v24 = vsub.f32 %v4026_v59, %v1791_v13  ;;  %v4989_v35 = vsub.f32 %v4824_v54, %v1791_v13  ;;  %v1778_v43 = vadd.f32 %v1777_v46, %v4372_v48 }
 0x316   :  { %v1625_v38 = vpop.f32.mrf.mxu2 }
 0x317   :  { %v1626_v2 = vadd.f32 %v1625_v38, %v1549_v42  ;;  %1779 = vadd.xlane.f32.xlu2 %v1778_v43  ;;  %v1853_v62 = vmul.f32 %v4986_v24, %v4986_v24  ;;  %v1854_v11 = vmul.f32 %v4989_v35, %v4989_v35 }
 0x318   :  { %v1474_v31 = vpop.f32.mrf.mxu0 }
 0x319   :  { %v1475_v59 = vadd.f32 %v1474_v31, %v4770_v10  ;;  %v1702_v52 = vpop.f32.mrf.mxu3  ;;  %v1897_v54 = vsel %vm1708_vm1, %v1854_v11, 0.0 }
 0x31a   :  { %v5000_v13 = vadd.f32 %v1702_v52, %v1626_v2  ;;  %v1724_v41 = vpop.xlane.xlu1 %1723  ;;  %v1551_v17 = vpop.f32.mrf.mxu1  ;;  %v1898_v46 = vadd.f32 %v1897_v54, %v1853_v62 }
 0x31b   :  { %v1792_v42 = vmul.f32 0.0051020407, %v1724_v41  ;;  %v1552_v10 = vadd.f32 %v1551_v17, %v1475_v59 }
 0x31c   :  { %1899 = vadd.xlane.f32.xlu1 %v1898_v46  ;;  %v1781_v43 = vsel %vm1708_vm1, %v5000_v13, 0.0 }
 0x31d   :  { %v5005_v38 = vsub.f32 %v4045_v12, %v1792_v42  ;;  %v5008_v0 = vsub.f32 %v4843_v1, %v1792_v42  ;;  %v1782_v31 = vadd.f32 %v1781_v43, %v4396_v53 }
 0x31e   :  { %v1628_v11 = vpop.f32.mrf.mxu2 }
 0x31f   :  { %v1629_v2 = vadd.f32 %v1628_v11, %v1552_v10  ;;  %1783 = vadd.xlane.f32.xlu0 %v1782_v31  ;;  %v1855_v62 = vmul.f32 %v5005_v38, %v5005_v38  ;;  %v1856_v52 = vmul.f32 %v5008_v0, %v5008_v0 }
 0x321   :  { %v1705_v54 = vpop.f32.mrf.mxu3  ;;  %v1901_v41 = vsel %vm1708_vm1, %v1856_v52, 0.0 }
 0x322   :  { %v5016_v12 = vadd.f32 %v1705_v54, %v1629_v2  ;;  %v1728_v46 = vpop.xlane.xlu2 %1727  ;;  %v1902_v1 = vadd.f32 %v1901_v41, %v1855_v62 }
 0x323   :  { %v1793_v42 = vmul.f32 0.0051020407, %v1728_v46 }
 0x324   :  { %1903 = vadd.xlane.f32.xlu2 %v1902_v1  ;;  %v1785_v59 = vsel %vm1708_vm1, %v5016_v12, 0.0 }
 0x325   :  { %v5021_v17 = vsub.f32 %v4069_v33, %v1793_v42  ;;  %v5024_v43 = vsub.f32 %v4849_v45, %v1793_v42  ;;  %v1786_v10 = vadd.f32 %v1785_v59, %v4419_v8 }
 0x327   :  { %1787 = vadd.xlane.f32.xlu1 %v1786_v10  ;;  %v1857_v31 = vmul.f32 %v5021_v17, %v5021_v17  ;;  %v1858_v11 = vmul.f32 %v5024_v43, %v5024_v43 }
 0x329   :  { %v1905_v2 = vsel %vm1708_vm1, %v1858_v11, 0.0 }
 0x32a   :  { %v1732_v62 = vpop.xlane.xlu2 %1731  ;;  %v1906_v52 = vadd.f32 %v1905_v2, %v1857_v31 }
 0x32b   :  { %v1794_v54 = vmul.f32 0.0051020407, %v1732_v62 }
 0x32c   :  { %1907 = vadd.xlane.f32.xlu0 %v1906_v52 }
 0x32d   :  { %v5033_v33 = vsub.f32 %v4096_v55, %v1794_v54  ;;  %v5036_v45 = vsub.f32 %v4855_v3, %v1794_v54 }
 0x32f   :  { %v1859_v41 = vmul.f32 %v5033_v33, %v5033_v33  ;;  %v1860_v46 = vmul.f32 %v5036_v45, %v5036_v45 }
 0x331   :  { %v1909_v1 = vsel %vm1708_vm1, %v1860_v46, 0.0 }
 0x332   :  { %v1736_v42 = vpop.xlane.xlu0 %1735  ;;  %v1910_v59 = vadd.f32 %v1909_v1, %v1859_v41 }
 0x333   :  { %v1795_v10 = vmul.f32 0.0051020407, %v1736_v42 }
 0x334   :  { %1911 = vadd.xlane.f32.xlu1 %v1910_v59 }
 0x335   :  { %v5044_v31 = vsub.f32 %v4117_v9, %v1795_v10  ;;  %v5047_v55 = vsub.f32 %v4861_v23, %v1795_v10 }
 0x337   :  { %v1861_v3 = vmul.f32 %v5044_v31, %v5044_v31  ;;  %v1862_v11 = vmul.f32 %v5047_v55, %v5047_v55 }
 0x339   :  { %v1913_v2 = vsel %vm1708_vm1, %v1862_v11, 0.0 }
 0x33a   :  { %v1740_v62 = vpop.xlane.xlu1 %1739  ;;  %v1914_v52 = vadd.f32 %v1913_v2, %v1861_v3 }
 0x33b   :  { %v1796_v54 = vmul.f32 0.0051020407, %v1740_v62 }
 0x33c   :  { %1915 = vadd.xlane.f32.xlu2 %v1914_v52 }
 0x33d   :  { %v5055_v41 = vsub.f32 %v4138_v28, %v1796_v54  ;;  %v5058_v9 = vsub.f32 %v4867_v57, %v1796_v54 }
 0x33f   :  { %v1863_v23 = vmul.f32 %v5055_v41, %v5055_v41  ;;  %v1864_v46 = vmul.f32 %v5058_v9, %v5058_v9 }
 0x341   :  { %v1917_v1 = vsel %vm1708_vm1, %v1864_v46, 0.0 }
 0x342   :  { %v1744_v42 = vpop.xlane.xlu2 %1743  ;;  %v1918_v59 = vadd.f32 %v1917_v1, %v1863_v23 }
 0x343   :  { %v1797_v10 = vmul.f32 0.0051020407, %v1744_v42 }
 0x344   :  { %1919 = vadd.xlane.f32.xlu0 %v1918_v59 }
 0x345   :  { %v5066_v3 = vsub.f32 %v4162_v36, %v1797_v10  ;;  %v5069_v28 = vsub.f32 %v4873_v18, %v1797_v10 }
 0x347   :  { %v1865_v57 = vmul.f32 %v5066_v3, %v5066_v3  ;;  %v1866_v11 = vmul.f32 %v5069_v28, %v5069_v28 }
 0x349   :  { %v1921_v2 = vsel %vm1708_vm1, %v1866_v11, 0.0 }
 0x34a   :  { %v1748_v62 = vpop.xlane.xlu0 %1747  ;;  %v1922_v52 = vadd.f32 %v1921_v2, %v1865_v57 }
 0x34b   :  { %v1798_v54 = vmul.f32 0.0051020407, %v1748_v62 }
 0x34c   :  { %1923 = vadd.xlane.f32.xlu1 %v1922_v52 }
 0x34d   :  { %v5077_v23 = vsub.f32 %v4186_v4, %v1798_v54  ;;  %v5080_v36 = vsub.f32 %v4881_v16, %v1798_v54 }
 0x34f   :  { %v1867_v18 = vmul.f32 %v5077_v23, %v5077_v23  ;;  %v1868_v46 = vmul.f32 %v5080_v36, %v5080_v36 }
 0x351   :  { %v1925_v1 = vsel %vm1708_vm1, %v1868_v46, 0.0 }
 0x352   :  { %v1752_v42 = vpop.xlane.xlu1 %1751  ;;  %v1926_v59 = vadd.f32 %v1925_v1, %v1867_v18 }
 0x353   :  { %v1799_v10 = vmul.f32 0.0051020407, %v1752_v42 }
 0x354   :  { %1927 = vadd.xlane.f32.xlu2 %v1926_v59 }
 0x355   :  { %v5088_v57 = vsub.f32 %v4213_v26, %v1799_v10  ;;  %v5091_v4 = vsub.f32 %v4889_v47, %v1799_v10 }
 0x357   :  { %v1869_v16 = vmul.f32 %v5088_v57, %v5088_v57  ;;  %v1870_v11 = vmul.f32 %v5091_v4, %v5091_v4 }
 0x359   :  { %v1929_v2 = vsel %vm1708_vm1, %v1870_v11, 0.0 }
 0x35a   :  { %v1756_v62 = vpop.xlane.xlu2 %1755  ;;  %v1930_v52 = vadd.f32 %v1929_v2, %v1869_v16 }
 0x35b   :  { %v1800_v54 = vmul.f32 0.0051020407, %v1756_v62 }
 0x35c   :  { %1931 = vadd.xlane.f32.xlu0 %v1930_v52 }
 0x35d   :  { %v5099_v18 = vsub.f32 %v4234_v44, %v1800_v54  ;;  %v5102_v26 = vsub.f32 %v4899_v61, %v1800_v54 }
 0x35f   :  { %v1871_v47 = vmul.f32 %v5099_v18, %v5099_v18  ;;  %v1872_v46 = vmul.f32 %v5102_v26, %v5102_v26 }
 0x361   :  { %v1933_v1 = vsel %vm1708_vm1, %v1872_v46, 0.0 }
 0x362   :  { %v1760_v42 = vpop.xlane.xlu0 %1759  ;;  %v1934_v59 = vadd.f32 %v1933_v1, %v1871_v47 }
 0x363   :  { %v1801_v10 = vmul.f32 0.0051020407, %v1760_v42 }
 0x364   :  { %1935 = vadd.xlane.f32.xlu1 %v1934_v59 }
 0x365   :  { %v5110_v16 = vsub.f32 %v4255_v32, %v1801_v10  ;;  %v5113_v44 = vsub.f32 %v4909_v50, %v1801_v10 }
 0x367   :  { %v1873_v61 = vmul.f32 %v5110_v16, %v5110_v16  ;;  %v1874_v11 = vmul.f32 %v5113_v44, %v5113_v44 }
 0x369   :  { %v1937_v2 = vsel %vm1708_vm1, %v1874_v11, 0.0 }
 0x36a   :  { %v1764_v62 = vpop.xlane.xlu1 %1763  ;;  %v1938_v52 = vadd.f32 %v1937_v2, %v1873_v61 }
 0x36b   :  { %v1802_v54 = vmul.f32 0.0051020407, %v1764_v62 }
 0x36c   :  { %1939 = vadd.xlane.f32.xlu2 %v1938_v52 }
 0x36d   :  { %v5121_v47 = vsub.f32 %v4279_v19, %v1802_v54  ;;  %v5124_v32 = vsub.f32 %v4921_v63, %v1802_v54 }
 0x36f   :  { %v1875_v50 = vmul.f32 %v5121_v47, %v5121_v47  ;;  %v1876_v46 = vmul.f32 %v5124_v32, %v5124_v32 }
 0x371   :  { %v1941_v1 = vsel %vm1708_vm1, %v1876_v46, 0.0 }
 0x372   :  { %v1768_v42 = vpop.xlane.xlu2 %1767  ;;  %v1942_v59 = vadd.f32 %v1941_v1, %v1875_v50 }
 0x373   :  { %v1803_v10 = vmul.f32 0.0051020407, %v1768_v42 }
 0x374   :  { %1943 = vadd.xlane.f32.xlu0 %v1942_v59 }
 0x375   :  { %v5132_v61 = vsub.f32 %v4303_v39, %v1803_v10  ;;  %v5135_v19 = vsub.f32 %v4931_v14, %v1803_v10 }
 0x377   :  { %5450 = vst [vmem:[#allocation12_spill] sm:$0xff] %v5132_v61  ;;  %v1877_v63 = vmul.f32 %v5132_v61, %v5132_v61  ;;  %v1878_v11 = vmul.f32 %v5135_v19, %v5135_v19 }
 0x378   :  { %5451 = vst [vmem:[#allocation13_spill] sm:$0xff] %v5135_v19 }
 0x379   :  { %v1945_v2 = vsel %vm1708_vm1, %v1878_v11, 0.0 }
 0x37a   :  { %v1772_v62 = vpop.xlane.xlu0 %1771  ;;  %v1946_v52 = vadd.f32 %v1945_v2, %v1877_v63 }
 0x37b   :  { %v1804_v54 = vmul.f32 0.0051020407, %v1772_v62 }
 0x37c   :  { %1947 = vadd.xlane.f32.xlu1 %v1946_v52 }
 0x37d   :  { %v5143_v50 = vsub.f32 %v4330_v60, %v1804_v54  ;;  %v5146_v39 = vsub.f32 %v4941_v20, %v1804_v54 }
 0x37f   :  { %5452 = vst [vmem:[#allocation14_spill] sm:$0xff] %v5143_v50  ;;  %v1892_v14 = vpop.xlane.xlu2 %1891  ;;  %v1879_v46 = vmul.f32 %v5143_v50, %v5143_v50  ;;  %v1880_v1 = vmul.f32 %v5146_v39, %v5146_v39 }
 0x380   :  { %5453 = vst [vmem:[#allocation15_spill] sm:$0xff] %v5146_v39  ;;  %v1969_v42 = vmul.f32 0.0051020407, %v1892_v14 }
 0x381   :  { %v1949_v59 = vsel %vm1708_vm1, %v1880_v1, 0.0 }
 0x382   :  { %v1776_v10 = vpop.xlane.xlu1 %1775  ;;  %v1950_v63 = vadd.f32 %v1949_v59, %v1879_v46  ;;  %v5153_v2 = vadd.f32 1e-05, %v1969_v42 }
 0x383   :  { %v1805_v11 = vmul.f32 0.0051020407, %v1776_v10 }
 0x384   :  { %1951 = vadd.xlane.f32.xlu2 %v1950_v63  ;;  %2641 = vrsqrt.f32 %v5153_v2  ;;  %vm2015_vm3 = vweird.f32 %v5153_v2 }
 0x385   :  { %v5156_v60 = vsub.f32 %v4351_v15, %v1805_v11  ;;  %v5159_v20 = vsub.f32 %v4962_v34, %v1805_v11  ;;  %v2885_v15 = vmov 0  }
 0x386   :  { %2635 = vset.pattern.permute.xlu1 %v2885_v15  ;;  %2636 = vset.pattern.permute.xlu2 %v2885_v15 }
 0x387   :  { %5454 = vst [vmem:[#allocation16_spill] sm:$0xff] %v5159_v20  ;;  %v1896_v62 = vpop.xlane.xlu0 %1895  ;;  %v1881_v52 = vmul.f32 %v5156_v60, %v5156_v60  ;;  %v1882_v54 = vmul.f32 %v5159_v20, %v5159_v20  ;;  %2637 = vset.pattern.permute.xlu0 %v2885_v15 }
 0x388   :  { %v1970_v46 = vmul.f32 0.0051020407, %v1896_v62 }
 0x389   :  { %v1953_v14 = vsel %vm1708_vm1, %v1882_v54, 0.0 }
 0x38a   :  { %v1780_v1 = vpop.xlane.xlu2 %1779  ;;  %v1954_v42 = vadd.f32 %v1953_v14, %v1881_v52  ;;  %v5173_v63 = vadd.f32 1e-05, %v1970_v46  ;;  %v5175_v11 = vpop.eup %2641 }
 0x38b   :  { %v1806_v59 = vmul.f32 0.0051020407, %v1780_v1  ;;  %vm2016_vm2 = vweird.f32 %v5175_v11 }
 0x38c   :  { %1955 = vadd.xlane.f32.xlu0 %v1954_v42  ;;  %2643 = vrsqrt.f32 %v5173_v63  ;;  %vm2017_vm4 = vmor %vm2015_vm3, %vm2016_vm2  ;;  %vm2025_vm6 = vweird.f32 %v5173_v63 }
 0x38d   :  { %v5168_v34 = vsub.f32 %v4372_v48, %v1806_v59  ;;  %v5171_v10 = vsub.f32 %v4981_v22, %v1806_v59  ;;  %v2010_v22 = vmul.f32 %v5175_v11, %v5153_v2 }
 0x38f   :  { %5455 = vst [vmem:[#allocation17_spill] sm:$0xff] %v5168_v34  ;;  %v1900_v54 = vpop.xlane.xlu1 %1899  ;;  %v1883_v62 = vmul.f32 %v5168_v34, %v5168_v34  ;;  %v1884_v52 = vmul.f32 %v5171_v10, %v5171_v10 }
 0x390   :  { %5456 = vst [vmem:[#allocation18_spill] sm:$0xff] %v5171_v10  ;;  %v1971_v14 = vmul.f32 0.0051020407, %v1900_v54  ;;  %v2011_v54 = vmul.f32 %v5175_v11, %v2010_v22 }
 0x391   :  { %v1957_v48 = vsel %vm1708_vm1, %v1884_v52, 0.0 }
 0x392   :  { %v5185_v1 = vadd.f32 1e-05, %v1971_v14  ;;  %v1784_v46 = vpop.xlane.xlu0 %1783  ;;  %v1958_v42 = vadd.f32 %v1957_v48, %v1883_v62  ;;  %v5199_v62 = vpop.eup %2643 }
 0x393   :  { %v1807_v59 = vmul.f32 0.0051020407, %v1784_v46  ;;  %v2012_v46 = vmul.f32 0.5, %v2011_v54  ;;  %v2020_v22 = vmul.f32 %v5199_v62, %v5173_v63  ;;  %vm2026_vm5 = vweird.f32 %v5199_v62 }
 0x394   :  { %1959 = vadd.xlane.f32.xlu1 %v1958_v42  ;;  %2645 = vrsqrt.f32 %v5185_v1  ;;  %vm5239_vm7 = vmor %vm2025_vm6, %vm2026_vm5  ;;  %vm2035_vm9 = vweird.f32 %v5185_v1 }
 0x395   :  { %v5188_v15 = vsub.f32 %v4396_v53, %v1807_v59  ;;  %v5191_v34 = vsub.f32 %v5000_v13, %v1807_v59  ;;  %v2013_v54 = vsub.f32 1.5, %v2012_v46 }
 0x397   :  { %5457 = vst [vmem:[#allocation19_spill] sm:$0xff] %v5188_v15  ;;  %v1904_v52 = vpop.xlane.xlu2 %1903  ;;  %v1885_v10 = vmul.f32 %v5188_v15, %v5188_v15  ;;  %v1886_v14 = vmul.f32 %v5191_v34, %v5191_v34 }
 0x398   :  { %5458 = vst [vmem:[#allocation20_spill] sm:$0xff] %v5191_v34  ;;  %v1972_v48 = vmul.f32 0.0051020407, %v1904_v52 }
 0x399   :  { %v1961_v53 = vsel %vm1708_vm1, %v1886_v14, 0.0  ;;  %v2021_v14 = vmul.f32 %v5199_v62, %v2020_v22 }
 0x39a   :  { %v5202_v42 = vadd.f32 1e-05, %v1972_v48  ;;  %v1788_v13 = vpop.xlane.xlu1 %1787  ;;  %v1962_v59 = vadd.f32 %v1961_v53, %v1885_v10  ;;  %v5206_v50 = vpop.eup %2645 }
 0x39b   :  { %v1808_v39 = vmul.f32 0.0051020407, %v1788_v13  ;;  %v2030_v10 = vmul.f32 %v5206_v50, %v5185_v1  ;;  %v2022_v46 = vmul.f32 0.5, %v2021_v14  ;;  %vm2036_vm8 = vweird.f32 %v5206_v50 }
 0x39c   :  { %2647 = vrsqrt.f32 %v5202_v42  ;;  %1963 = vadd.xlane.f32.xlu2 %v1962_v59  ;;  %vm5249_vm11 = vmor %vm2035_vm9, %vm2036_vm8  ;;  %vm2045_vm15 = vweird.f32 %v5202_v42 }
 0x39d   :  { %v5210_v34 = vsub.f32 %v4419_v8, %v1808_v39  ;;  %v5213_v52 = vsub.f32 %v5016_v12, %v1808_v39  ;;  %v2031_v22 = vmul.f32 %v5206_v50, %v2030_v10 }
 0x39f   :  { %5459 = vst [vmem:[#allocation21_spill] sm:$0xff] %v5210_v34  ;;  %v1908_v48 = vpop.xlane.xlu0 %1907  ;;  %v1887_v53 = vmul.f32 %v5210_v34, %v5210_v34  ;;  %v1888_v13 = vmul.f32 %v5213_v52, %v5213_v52  ;;  %v2014_v34 = vmul.f32 %v5175_v11, %v2013_v54  ;;  %v2841_v54 = vld [vmem:[%s5421_s2] sm:$0xff] }
 0x3a0   :  { %5460 = vst [vmem:[#allocation22_spill] sm:$0xff] %v5213_v52  ;;  %v1973_v59 = vmul.f32 0.0051020407, %v1908_v48  ;;  %v2023_v48 = vsub.f32 1.5, %v2022_v46 }
 0x3a1   :  { %v1965_v8 = vsel %vm1708_vm1, %v1888_v13, 0.0  ;;  %v2032_v13 = vmul.f32 0.5, %v2031_v22 }
 0x3a2   :  { %v5223_v15 = vpop.eup %2647  ;;  %v1993_v12 = vadd.f32 1e-05, %v1973_v59  ;;  %v1966_v39 = vadd.f32 %v1965_v8, %v1887_v53  ;;  %v2018_v53 = vsel %vm2017_vm4, %v5175_v11, %v2014_v34  ;;  %v2024_v46 = vmul.f32 %v5199_v62, %v2023_v48 }
 0x3a3   :  { %v2040_v19 = vmul.f32 %v5223_v15, %v5202_v42  ;;  %v2229_v8 = vmul.f32 %v2841_v54, %v2018_v53  ;;  %vm2046_vm12 = vweird.f32 %v5223_v15 }
 0x3a4   :  { %2649 = vrsqrt.f32 %v1993_v12  ;;  %1967 = vadd.xlane.f32.xlu0 %v1966_v39  ;;  %v2033_v39 = vsub.f32 1.5, %v2032_v13  ;;  %vm2055_vm13 = vweird.f32 %v1993_v12  ;;  %vm2047_vm0 = vmor %vm2045_vm15, %vm2046_vm12 }
 0x3a5   :  { %v2041_v52 = vmul.f32 %v5223_v15, %v2040_v19 }
 0x3a6   :  { %v2034_v48 = vmul.f32 %v5206_v50, %v2033_v39 }
 0x3a7   :  { %v1912_v61 = vpop.xlane.xlu1 %1911  ;;  %v2042_v2 = vmul.f32 0.5, %v2041_v52  ;;  %v2028_v52 = vsel %vm5239_vm7, %v5199_v62, %v2024_v46  ;;  %v2842_v62 = vld [vmem:[%s5421_s2 + $0x8] sm:$0xff] }
 0x3a8   :  { %v1974_v14 = vmul.f32 0.0051020407, %v1912_v61  ;;  %v2230_v54 = vmul.f32 %v2842_v62, %v2028_v52  ;;  %v2038_v1 = vsel %vm5249_vm11, %v5206_v50, %v2034_v48  ;;  %v2844_v50 = vld [vmem:[%s5421_s2 + $0x10] sm:$0xff] }
 0x3a9   :  { %v2043_v34 = vsub.f32 1.5, %v2042_v2 }
 0x3aa   :  { %v2650_v59 = vpop.eup %2649  ;;  %v1994_v10 = vadd.f32 1e-05, %v1974_v14 }
 0x3ab   :  { %v2050_v20 = vmul.f32 %v2650_v59, %v1993_v12  ;;  %vm2056_vm10 = vweird.f32 %v2650_v59  ;;  %v2044_v2 = vmul.f32 %v5223_v15, %v2043_v34  ;;  %v2231_v34 = vmul.f32 %v2844_v50, %v2038_v1 }
 0x3ac   :  { %2651 = vrsqrt.f32 %v1994_v10  ;;  %vm2057_vm14 = vmor %vm2055_vm13, %vm2056_vm10  ;;  %vm2065_vm3 = vweird.f32 %v1994_v10 }
 0x3ad   :  { %v2051_v19 = vmul.f32 %v2650_v59, %v2050_v20  ;;  %2251 = vperm.xlu1 %2635, %v2229_v8   ;;  %v2048_v52 = vsel %vm2047_vm0, %v5223_v15, %v2044_v2 }
 0x3af   :  { %v2052_v11 = vmul.f32 0.5, %v2051_v19  ;;  %v1916_v22 = vpop.xlane.xlu2 %1915  ;;  %v2843_v19 = vld [vmem:[%s5421_s2 + $0x20] sm:$0xff] }
 0x3b0   :  { %v1975_v13 = vmul.f32 0.0051020407, %v1916_v22 }
 0x3b1   :  { %v2053_v20 = vsub.f32 1.5, %v2052_v11 }
 0x3b2   :  { %v2652_v63 = vpop.eup %2651  ;;  %v1995_v14 = vadd.f32 1e-05, %v1975_v13 }
 0x3b3   :  { %v2060_v8 = vmul.f32 %v2652_v63, %v1994_v10  ;;  %v2054_v39 = vmul.f32 %v2650_v59, %v2053_v20  ;;  %v2845_v20 = vld [vmem:[%s5421_s2 + $0x18] sm:$0xff]  ;;  %vm2066_vm2 = vweird.f32 %v2652_v63 }
 0x3b4   :  { %2653 = vrsqrt.f32 %v1995_v14  ;;  %2256 = vperm.xlu2 %2636, %v2230_v54   ;;  %v2232_v53 = vmul.f32 %v2845_v20, %v2048_v52  ;;  %vm2067_vm4 = vmor %vm2065_vm3, %vm2066_vm2  ;;  %vm2075_vm6 = vweird.f32 %v1995_v14 }
 0x3b5   :  { %v2061_v12 = vmul.f32 %v2652_v63, %v2060_v8  ;;  %v2058_v46 = vsel %vm2057_vm14, %v2650_v59, %v2054_v39 }
 0x3b6   :  { %v2233_v61 = vmul.f32 %v2843_v19, %v2058_v46 }
 0x3b7   :  { %v2062_v11 = vmul.f32 0.5, %v2061_v12  ;;  %v1920_v22 = vpop.xlane.xlu0 %1919 }
 0x3b8   :  { %v1976_v42 = vmul.f32 0.0051020407, %v1920_v22  ;;  %2271 = vperm.xlu1 %2635, %v2233_v61   ;;  %2261 = vperm.xlu0 %2637, %v2231_v34   ;;  %v2846_v61 = vld [vmem:[%s5421_s2 + $0x28] sm:$0xff] }
 0x3b9   :  { %v2063_v59 = vsub.f32 1.5, %v2062_v11 }
 0x3ba   :  { %v2654_v48 = vpop.eup %2653  ;;  %v1996_v13 = vadd.f32 1e-05, %v1976_v42 }
 0x3bb   :  { %v2070_v62 = vmul.f32 %v2654_v48, %v1995_v14  ;;  %v2064_v54 = vmul.f32 %v2652_v63, %v2063_v59  ;;  %vm2076_vm5 = vweird.f32 %v2654_v48 }
 0x3bc   :  { %2655 = vrsqrt.f32 %v1996_v13  ;;  %2266 = vperm.xlu2 %2636, %v2232_v53   ;;  %vm2077_vm7 = vmor %vm2075_vm6, %vm2076_vm5  ;;  %vm2085_vm9 = vweird.f32 %v1996_v13 }
 0x3bd   :  { %v2071_v8 = vmul.f32 %v2654_v48, %v2070_v62  ;;  %v2068_v1 = vsel %vm2067_vm4, %v2652_v63, %v2064_v54  ;;  %v2847_v63 = vld [vmem:[%s5421_s2 + $0x30] sm:$0xff] }
 0x3be   :  { %v2234_v50 = vmul.f32 %v2846_v61, %v2068_v1 }
 0x3bf   :  { %v2072_v15 = vmul.f32 0.5, %v2071_v8  ;;  %v1924_v39 = vpop.xlane.xlu1 %1923 }
 0x3c0   :  { %v1977_v2 = vmul.f32 0.0051020407, %v1924_v39  ;;  %v2848_v39 = vld [vmem:[%s5421_s2 + $0x38] sm:$0xff] }
 0x3c1   :  { %v2073_v12 = vsub.f32 1.5, %v2072_v15 }
 0x3c2   :  { %v2656_v46 = vpop.eup %2655  ;;  %v1997_v19 = vadd.f32 1e-05, %v1977_v2 }
 0x3c3   :  { %v2080_v34 = vmul.f32 %v2656_v46, %v1996_v13  ;;  %v2074_v11 = vmul.f32 %v2654_v48, %v2073_v12  ;;  %vm2086_vm8 = vweird.f32 %v2656_v46 }
 0x3c4   :  { %2657 = vrsqrt.f32 %v1997_v19  ;;  %2276 = vperm.xlu2 %2636, %v2234_v50   ;;  %vm2087_vm10 = vmor %vm2085_vm9, %vm2086_vm8  ;;  %vm2095_vm12 = vweird.f32 %v1997_v19 }
 0x3c5   :  { %v2081_v10 = vmul.f32 %v2656_v46, %v2080_v34  ;;  %v2078_v22 = vsel %vm2077_vm7, %v2654_v48, %v2074_v11 }
 0x3c6   :  { %v2235_v52 = vmul.f32 %v2847_v63, %v2078_v22  ;;  %v2849_v63 = vld [vmem:[%s5421_s2 + $0x40] sm:$0xff] }
 0x3c7   :  { %v2082_v42 = vmul.f32 0.5, %v2081_v10  ;;  %v1928_v59 = vpop.xlane.xlu2 %1927 }
 0x3c8   :  { %v1978_v20 = vmul.f32 0.0051020407, %v1928_v59  ;;  %2281 = vperm.xlu1 %2635, %v2235_v52  }
 0x3c9   :  { %v2083_v53 = vsub.f32 1.5, %v2082_v42 }
 0x3ca   :  { %v2658_v62 = vpop.eup %2657  ;;  %v1998_v14 = vadd.f32 1e-05, %v1978_v20 }
 0x3cb   :  { %v2090_v54 = vmul.f32 %v2658_v62, %v1997_v19  ;;  %v2084_v8 = vmul.f32 %v2656_v46, %v2083_v53  ;;  %vm2096_vm11 = vweird.f32 %v2658_v62 }
 0x3cc   :  { %2659 = vrsqrt.f32 %v1998_v14  ;;  %vm2097_vm13 = vmor %vm2095_vm12, %vm2096_vm11  ;;  %vm2105_vm15 = vweird.f32 %v1998_v14 }
 0x3cd   :  { %v2091_v15 = vmul.f32 %v2658_v62, %v2090_v54  ;;  %v2088_v48 = vsel %vm2087_vm10, %v2656_v46, %v2084_v8 }
 0x3ce   :  { %v2236_v1 = vmul.f32 %v2848_v39, %v2088_v48  ;;  %v2850_v39 = vld [vmem:[%s5421_s2 + $0x48] sm:$0xff] }
 0x3cf   :  { %v2092_v2 = vmul.f32 0.5, %v2091_v15  ;;  %v1932_v12 = vpop.xlane.xlu0 %1931 }
 0x3d0   :  { %v1979_v61 = vmul.f32 0.0051020407, %v1932_v12  ;;  %2286 = vperm.xlu2 %2636, %v2236_v1  }
 0x3d1   :  { %v2093_v50 = vsub.f32 1.5, %v2092_v2 }
 0x3d2   :  { %v2660_v34 = vpop.eup %2659  ;;  %v1999_v11 = vadd.f32 1e-05, %v1979_v61 }
 0x3d3   :  { %v2100_v13 = vmul.f32 %v2660_v34, %v1998_v14  ;;  %v2094_v10 = vmul.f32 %v2658_v62, %v2093_v50  ;;  %vm2106_vm14 = vweird.f32 %v2660_v34 }
 0x3d4   :  { %2661 = vrsqrt.f32 %v1999_v11  ;;  %vm2107_vm0 = vmor %vm2105_vm15, %vm2106_vm14  ;;  %vm2115_vm3 = vweird.f32 %v1999_v11 }
 0x3d5   :  { %v2101_v22 = vmul.f32 %v2660_v34, %v2100_v13  ;;  %v2098_v46 = vsel %vm2097_vm13, %v2658_v62, %v2094_v10 }
 0x3d6   :  { %v2237_v52 = vmul.f32 %v2849_v63, %v2098_v46  ;;  %v2851_v63 = vld [vmem:[%s5421_s2 + $0x50] sm:$0xff] }
 0x3d7   :  { %v2102_v42 = vmul.f32 0.5, %v2101_v22  ;;  %v1936_v59 = vpop.xlane.xlu1 %1935 }
 0x3d8   :  { %v1980_v20 = vmul.f32 0.0051020407, %v1936_v59  ;;  %2291 = vperm.xlu1 %2635, %v2237_v52  }
 0x3d9   :  { %v2103_v53 = vsub.f32 1.5, %v2102_v42 }
 0x3da   :  { %v2662_v54 = vpop.eup %2661  ;;  %v2000_v8 = vadd.f32 1e-05, %v1980_v20 }
 0x3db   :  { %v2110_v19 = vmul.f32 %v2662_v54, %v1999_v11  ;;  %v2104_v15 = vmul.f32 %v2660_v34, %v2103_v53  ;;  %vm2116_vm2 = vweird.f32 %v2662_v54 }
 0x3dc   :  { %2663 = vrsqrt.f32 %v2000_v8  ;;  %vm2117_vm4 = vmor %vm2115_vm3, %vm2116_vm2  ;;  %vm2125_vm6 = vweird.f32 %v2000_v8 }
 0x3dd   :  { %v2111_v48 = vmul.f32 %v2662_v54, %v2110_v19  ;;  %v2108_v62 = vsel %vm2107_vm0, %v2660_v34, %v2104_v15 }
 0x3de   :  { %v2238_v1 = vmul.f32 %v2850_v39, %v2108_v62  ;;  %v2852_v39 = vld [vmem:[%s5421_s2 + $0x58] sm:$0xff] }
 0x3df   :  { %v2112_v2 = vmul.f32 0.5, %v2111_v48  ;;  %v1940_v12 = vpop.xlane.xlu2 %1939 }
 0x3e0   :  { %v1981_v61 = vmul.f32 0.0051020407, %v1940_v12  ;;  %2296 = vperm.xlu0 %2637, %v2238_v1  }
 0x3e1   :  { %v2113_v50 = vsub.f32 1.5, %v2112_v2 }
 0x3e2   :  { %v2664_v13 = vpop.eup %2663  ;;  %v2001_v10 = vadd.f32 1e-05, %v1981_v61 }
 0x3e3   :  { %v2120_v14 = vmul.f32 %v2664_v13, %v2000_v8  ;;  %v2114_v22 = vmul.f32 %v2662_v54, %v2113_v50  ;;  %vm2126_vm5 = vweird.f32 %v2664_v13 }
 0x3e4   :  { %2665 = vrsqrt.f32 %v2001_v10  ;;  %vm2127_vm7 = vmor %vm2125_vm6, %vm2126_vm5  ;;  %vm2135_vm9 = vweird.f32 %v2001_v10 }
 0x3e5   :  { %v2121_v46 = vmul.f32 %v2664_v13, %v2120_v14  ;;  %v2118_v34 = vsel %vm2117_vm4, %v2662_v54, %v2114_v22 }
 0x3e6   :  { %v2239_v52 = vmul.f32 %v2851_v63, %v2118_v34  ;;  %v2853_v63 = vld [vmem:[%s5421_s2 + $0x60] sm:$0xff] }
 0x3e7   :  { %v2122_v42 = vmul.f32 0.5, %v2121_v46  ;;  %v1944_v59 = vpop.xlane.xlu0 %1943 }
 0x3e8   :  { %v1982_v20 = vmul.f32 0.0051020407, %v1944_v59  ;;  %2301 = vperm.xlu2 %2636, %v2239_v52  }
 0x3e9   :  { %v2123_v53 = vsub.f32 1.5, %v2122_v42 }
 0x3ea   :  { %v2666_v19 = vpop.eup %2665  ;;  %v2002_v15 = vadd.f32 1e-05, %v1982_v20 }
 0x3eb   :  { %v2130_v11 = vmul.f32 %v2666_v19, %v2001_v10  ;;  %v2124_v48 = vmul.f32 %v2664_v13, %v2123_v53  ;;  %vm2136_vm8 = vweird.f32 %v2666_v19 }
 0x3ec   :  { %2667 = vrsqrt.f32 %v2002_v15  ;;  %vm2137_vm10 = vmor %vm2135_vm9, %vm2136_vm8  ;;  %vm2145_vm12 = vweird.f32 %v2002_v15 }
 0x3ed   :  { %v2131_v62 = vmul.f32 %v2666_v19, %v2130_v11  ;;  %v2128_v54 = vsel %vm2127_vm7, %v2664_v13, %v2124_v48 }
 0x3ee   :  { %v2240_v1 = vmul.f32 %v2852_v39, %v2128_v54  ;;  %v2854_v39 = vld [vmem:[%s5421_s2 + $0x68] sm:$0xff] }
 0x3ef   :  { %v2132_v2 = vmul.f32 0.5, %v2131_v62  ;;  %v1948_v12 = vpop.xlane.xlu1 %1947 }
 0x3f0   :  { %v1983_v61 = vmul.f32 0.0051020407, %v1948_v12  ;;  %2306 = vperm.xlu1 %2635, %v2240_v1  }
 0x3f1   :  { %v2133_v50 = vsub.f32 1.5, %v2132_v2 }
 0x3f2   :  { %v2668_v14 = vpop.eup %2667  ;;  %v2003_v22 = vadd.f32 1e-05, %v1983_v61 }
 0x3f3   :  { %v2140_v8 = vmul.f32 %v2668_v14, %v2002_v15  ;;  %v2134_v46 = vmul.f32 %v2666_v19, %v2133_v50  ;;  %vm2146_vm11 = vweird.f32 %v2668_v14 }
 0x3f4   :  { %2669 = vrsqrt.f32 %v2003_v22  ;;  %vm2147_vm13 = vmor %vm2145_vm12, %vm2146_vm11  ;;  %vm2155_vm15 = vweird.f32 %v2003_v22 }
 0x3f5   :  { %v2141_v34 = vmul.f32 %v2668_v14, %v2140_v8  ;;  %v2138_v13 = vsel %vm2137_vm10, %v2666_v19, %v2134_v46 }
 0x3f6   :  { %v2241_v52 = vmul.f32 %v2853_v63, %v2138_v13  ;;  %v2855_v63 = vld [vmem:[%s5421_s2 + $0x70] sm:$0xff] }
 0x3f7   :  { %v2142_v42 = vmul.f32 0.5, %v2141_v34  ;;  %v1952_v59 = vpop.xlane.xlu2 %1951 }
 0x3f8   :  { %v1984_v20 = vmul.f32 0.0051020407, %v1952_v59  ;;  %2311 = vperm.xlu0 %2637, %v2241_v52  }
 0x3f9   :  { %v2143_v53 = vsub.f32 1.5, %v2142_v42 }
 0x3fa   :  { %v2670_v11 = vpop.eup %2669  ;;  %v2004_v48 = vadd.f32 1e-05, %v1984_v20 }
 0x3fb   :  { %v2150_v10 = vmul.f32 %v2670_v11, %v2003_v22  ;;  %v2144_v62 = vmul.f32 %v2668_v14, %v2143_v53  ;;  %vm2156_vm14 = vweird.f32 %v2670_v11 }
 0x3fc   :  { %2671 = vrsqrt.f32 %v2004_v48  ;;  %vm2157_vm0 = vmor %vm2155_vm15, %vm2156_vm14  ;;  %vm2165_vm3 = vweird.f32 %v2004_v48 }
 0x3fd   :  { %v2151_v54 = vmul.f32 %v2670_v11, %v2150_v10  ;;  %v2148_v19 = vsel %vm2147_vm13, %v2668_v14, %v2144_v62 }
 0x3fe   :  { %v2242_v1 = vmul.f32 %v2854_v39, %v2148_v19  ;;  %v2856_v39 = vld [vmem:[%s5421_s2 + $0x78] sm:$0xff] }
 0x3ff   :  { %v2152_v2 = vmul.f32 0.5, %v2151_v54  ;;  %v1956_v12 = vpop.xlane.xlu0 %1955 }
 0x400   :  { %v1985_v61 = vmul.f32 0.0051020407, %v1956_v12  ;;  %2316 = vperm.xlu2 %2636, %v2242_v1  }
 0x401   :  { %v2153_v50 = vsub.f32 1.5, %v2152_v2 }
 0x402   :  { %v2672_v8 = vpop.eup %2671  ;;  %v2005_v46 = vadd.f32 1e-05, %v1985_v61 }
 0x403   :  { %v2160_v15 = vmul.f32 %v2672_v8, %v2004_v48  ;;  %v2154_v34 = vmul.f32 %v2670_v11, %v2153_v50  ;;  %vm2166_vm2 = vweird.f32 %v2672_v8 }
 0x404   :  { %2673 = vrsqrt.f32 %v2005_v46  ;;  %vm2167_vm4 = vmor %vm2165_vm3, %vm2166_vm2  ;;  %vm2175_vm6 = vweird.f32 %v2005_v46 }
 0x405   :  { %v2161_v13 = vmul.f32 %v2672_v8, %v2160_v15  ;;  %v2158_v14 = vsel %vm2157_vm0, %v2670_v11, %v2154_v34 }
 0x406   :  { %v2243_v52 = vmul.f32 %v2855_v63, %v2158_v14  ;;  %v2857_v63 = vld [vmem:[%s5421_s2 + $0x80] sm:$0xff] }
 0x407   :  { %v2162_v42 = vmul.f32 0.5, %v2161_v13  ;;  %v1960_v59 = vpop.xlane.xlu1 %1959 }
 0x408   :  { %v1986_v20 = vmul.f32 0.0051020407, %v1960_v59  ;;  %2321 = vperm.xlu1 %2635, %v2243_v52  }
 0x409   :  { %v2163_v53 = vsub.f32 1.5, %v2162_v42 }
 0x40a   :  { %v2674_v10 = vpop.eup %2673  ;;  %v2006_v62 = vadd.f32 1e-05, %v1986_v20 }
 0x40b   :  { %v2170_v22 = vmul.f32 %v2674_v10, %v2005_v46  ;;  %v2164_v54 = vmul.f32 %v2672_v8, %v2163_v53  ;;  %vm2176_vm5 = vweird.f32 %v2674_v10 }
 0x40c   :  { %2675 = vrsqrt.f32 %v2006_v62  ;;  %vm2177_vm7 = vmor %vm2175_vm6, %vm2176_vm5  ;;  %vm2185_vm9 = vweird.f32 %v2006_v62 }
 0x40d   :  { %v2171_v19 = vmul.f32 %v2674_v10, %v2170_v22  ;;  %v2168_v11 = vsel %vm2167_vm4, %v2672_v8, %v2164_v54 }
 0x40e   :  { %v2244_v1 = vmul.f32 %v2856_v39, %v2168_v11 }
 0x40f   :  { %v2172_v2 = vmul.f32 0.5, %v2171_v19  ;;  %v1964_v12 = vpop.xlane.xlu2 %1963 }
 0x410   :  { %v1987_v61 = vmul.f32 0.0051020407, %v1964_v12  ;;  %2326 = vperm.xlu0 %2637, %v2244_v1   ;;  %v2226_v12 = vld [vmem:[%s5421_s2 + $0x88] sm:$0xff] }
 0x411   :  { %v2173_v50 = vsub.f32 1.5, %v2172_v2 }
 0x412   :  { %v2676_v15 = vpop.eup %2675  ;;  %v2007_v34 = vadd.f32 1e-05, %v1987_v61 }
 0x413   :  { %v2180_v48 = vmul.f32 %v2676_v15, %v2006_v62  ;;  %v2174_v13 = vmul.f32 %v2674_v10, %v2173_v50  ;;  %vm2186_vm8 = vweird.f32 %v2676_v15 }
 0x414   :  { %2677 = vrsqrt.f32 %v2007_v34  ;;  %vm2187_vm10 = vmor %vm2185_vm9, %vm2186_vm8  ;;  %vm2195_vm12 = vweird.f32 %v2007_v34 }
 0x415   :  { %v2181_v14 = vmul.f32 %v2676_v15, %v2180_v48  ;;  %v2178_v8 = vsel %vm2177_vm7, %v2674_v10, %v2174_v13 }
 0x416   :  { %v2245_v52 = vmul.f32 %v2857_v63, %v2178_v8 }
 0x417   :  { %v2182_v42 = vmul.f32 0.5, %v2181_v14  ;;  %v2257_v59 = vpop.permute.xlu2 %2256  ;;  %v1968_v20 = vpop.xlane.xlu0 %1967 }
 0x418   :  { %v2351_v53 = vmul.f32 %v2257_v59, %v4967_v27  ;;  %v2352_v22 = vmul.f32 %v2257_v59, %v4970_v21  ;;  %v1988_v54 = vmul.f32 0.0051020407, %v1968_v20  ;;  %2331 = vperm.xlu2 %2636, %v2245_v52  }
 0x419   :  { %v2183_v46 = vsub.f32 1.5, %v2182_v42 }
 0x41a   :  { %v2678_v19 = vpop.eup %2677  ;;  %v2491_v11 = vadd.f32 %v4879_v40, %v2351_v53  ;;  %v2492_v10 = vadd.f32 %v4879_v40, %v2352_v22  ;;  %v2008_v39 = vadd.f32 1e-05, %v1988_v54 }
 0x41b   :  { %v2190_v1 = vmul.f32 %v2678_v19, %v2007_v34  ;;  %v2184_v2 = vmul.f32 %v2676_v15, %v2183_v46  ;;  %vm2196_vm11 = vweird.f32 %v2678_v19  ;;  %v5465_v46 = vmov 1  }
 0x41c   :  { %2531 = vst [vmem:[#allocation2 + $0x10] sm:$0xff] %v2491_v11  ;;  %2679 = vrsqrt.f32 %v2008_v39  ;;  %vm2197_vm13 = vmor %vm2195_vm12, %vm2196_vm11  ;;  %vm2205_vm15 = vweird.f32 %v2008_v39 }
 0x41d   :  { %v2191_v21 = vmul.f32 %v2678_v19, %v2190_v1  ;;  %2532 = vst.msk [vmem:[#allocation2 + $0x18] sm:$0xff] %vm1708_vm1, %v2492_v10  ;;  %v2188_v27 = vsel %vm2187_vm10, %v2676_v15, %v2184_v2 }
 0x41e   :  { %v2246_v61 = vmul.f32 %v2226_v12, %v2188_v27 }
 0x41f   :  { %v2192_v50 = vmul.f32 0.5, %v2191_v21  ;;  %v2267_v48 = vpop.permute.xlu2 %2266  ;;  %v2252_v13 = vpop.permute.xlu1 %2251 }
 0x420   :  { %v2355_v40 = vmul.f32 %v2267_v48, %v5005_v38  ;;  %v2356_v62 = vmul.f32 %v2267_v48, %v5008_v0  ;;  %v2349_v14 = vmul.f32 %v2252_v13, %v4948_v25  ;;  %v2350_v8 = vmul.f32 %v2252_v13, %v4951_v37  ;;  %2336 = vperm.xlu1 %2635, %v2246_v61   ;;  %v2227_v25 = vld [vmem:[%s5421_s2 + $0x90] sm:$0xff] }
 0x421   :  { %v2193_v63 = vsub.f32 1.5, %v2192_v50 }
 0x422   :  { %v2680_v52 = vpop.eup %2679  ;;  %v2495_v42 = vadd.f32 %v4896_v5, %v2355_v40  ;;  %v2496_v15 = vadd.f32 %v4896_v5, %v2356_v62  ;;  %v2489_v59 = vadd.f32 %v4886_v58, %v2349_v14  ;;  %v2490_v38 = vadd.f32 %v4886_v58, %v2350_v8 }
 0x423   :  { %v2200_v20 = vmul.f32 %v2680_v52, %v2008_v39  ;;  %v2194_v53 = vmul.f32 %v2678_v19, %v2193_v63  ;;  %vm2206_vm14 = vweird.f32 %v2680_v52 }
 0x424   :  { %2535 = vst [vmem:[#allocation2 + $0x30] sm:$0xff] %v2495_v42  ;;  %vm2207_vm0 = vmor %vm2205_vm15, %vm2206_vm14 }
 0x425   :  { %v2201_v37 = vmul.f32 %v2680_v52, %v2200_v20  ;;  %2536 = vst.msk [vmem:[#allocation2 + $0x38] sm:$0xff] %vm1708_vm1, %v2496_v15  ;;  %v2198_v0 = vsel %vm2197_vm13, %v2678_v19, %v2194_v53  ;;  %v5466_v20 = vld [vmem:[#allocation5_spill] sm:$0xff] }
 0x426   :  { %2529 = vst [vmem:[#allocation2] sm:$0xff] %v2489_v59  ;;  %v2247_v22 = vmul.f32 %v2227_v25, %v2198_v0 }
 0x427   :  { %v2202_v5 = vmul.f32 0.5, %v2201_v37  ;;  %2530 = vst.msk [vmem:[#allocation2 + $0x8] sm:$0xff] %vm1708_vm1, %v2490_v38  ;;  %v2277_v34 = vpop.permute.xlu2 %2276 }
 0x428   :  { %v2359_v54 = vmul.f32 %v2277_v34, %v5033_v33  ;;  %v2360_v58 = vmul.f32 %v2277_v34, %v5036_v45  ;;  %2341 = vperm.xlu0 %2637, %v2247_v22   ;;  %2638 = vset.pattern.permute.xlu1 %v5465_v46 }
 0x429   :  { %v2203_v11 = vsub.f32 1.5, %v2202_v5  ;;  %2476 = vperm.xlu1 %2638, %v2226_v12   ;;  %v2228_v12 = vld [vmem:[%s5421_s2 + $0x98] sm:$0xff]  ;;  %s2886_s2 = smov [#allocation2]  }
 0x42a   :  { %v2499_v10 = vadd.f32 %v4911_v51, %v2359_v54  ;;  %v2500_v19 = vadd.f32 %v4911_v51, %v2360_v58  ;;  %v2262_v1 = vpop.permute.xlu0 %2261  ;;  %v2272_v2 = vpop.permute.xlu1 %2271  ;;  %v5468_v5 = vld [vmem:[#allocation8_spill] sm:$0xff]  ;;  %s2573_s6 = sshll.u32 %s2886_s2, 4  ;;  %s2574_s6 = int_to_ptr.vmem [resolvable:$true] %s2573_s6 }
 0x42b   :  { %v2353_v21 = vmul.f32 %v2262_v1, %v4986_v24  ;;  %v2354_v27 = vmul.f32 %v2262_v1, %v4989_v35  ;;  %v2357_v33 = vmul.f32 %v2272_v2, %v5021_v17  ;;  %v2358_v45 = vmul.f32 %v2272_v2, %v5024_v43  ;;  %v5471_v2 = vld [vmem:[#allocation11_spill] sm:$0xff] }
 0x42c   :  { %2539 = vst [vmem:[#allocation2 + $0x50] sm:$0xff] %v2499_v10  ;;  %v2204_v61 = vmul.f32 %v2680_v52, %v2203_v11 }
 0x42d   :  { %2540 = vst.msk [vmem:[#allocation2 + $0x58] sm:$0xff] %vm1708_vm1, %v2500_v19  ;;  %v2493_v51 = vadd.f32 %v4906_v6, %v2353_v21  ;;  %v2494_v24 = vadd.f32 %v4906_v6, %v2354_v27  ;;  %v2497_v35 = vadd.f32 %v4918_v29, %v2357_v33  ;;  %v2498_v17 = vadd.f32 %v4918_v29, %v2358_v45  ;;  %v5470_v19 = vld [vmem:[#allocation16_spill] sm:$0xff]  ;;  %v5473_v45 = vld [vmem:[#allocation13_spill] sm:$0xff] }
 0x42e   :  { %v2208_v50 = vsel %vm2207_vm0, %v2680_v52, %v2204_v61 }
 0x42f   :  { %2533 = vst [vmem:[#allocation2 + $0x20] sm:$0xff] %v2493_v51  ;;  %v2287_v43 = vpop.permute.xlu2 %2286  ;;  %v2248_v39 = vmul.f32 %v2228_v12, %v2208_v50  ;;  %v5476_v50 = vld [vmem:[#allocation15_spill] sm:$0xff] }
 0x430   :  { %2534 = vst.msk [vmem:[#allocation2 + $0x28] sm:$0xff] %vm1708_vm1, %v2494_v24  ;;  %v2363_v48 = vmul.f32 %v2287_v43, %v5055_v41  ;;  %v2364_v13 = vmul.f32 %v2287_v43, %v5058_v9  ;;  %2639 = vset.pattern.permute.xlu0 %v5465_v46 }
 0x431   :  { %2537 = vst [vmem:[#allocation2 + $0x40] sm:$0xff] %v2497_v35  ;;  %2346 = vperm.xlu2 %2636, %v2248_v39   ;;  %2481 = vperm.xlu0 %2639, %v2227_v25   ;;  %v5467_v25 = vld [vmem:[#allocation10_spill] sm:$0xff]  ;;  %v5477_v39 = vld [vmem:[#allocation7_spill] sm:$0xff] }
 0x432   :  { %2538 = vst.msk [vmem:[#allocation2 + $0x48] sm:$0xff] %vm1708_vm1, %v2498_v17  ;;  %v2503_v6 = vadd.f32 %v4933_v49, %v2363_v48  ;;  %v2504_v29 = vadd.f32 %v4933_v49, %v2364_v13  ;;  %v5475_v35 = vld [vmem:[#allocation14_spill] sm:$0xff] }
 0x434   :  { %2543 = vst [vmem:[#allocation2 + $0x70] sm:$0xff] %v2503_v6 }
 0x435   :  { %2544 = vst.msk [vmem:[#allocation2 + $0x78] sm:$0xff] %vm1708_vm1, %v2504_v29 }
 0x439   :  { %2640 = vset.pattern.permute.xlu2 %v5465_v46  ;;  %v5469_v46 = vld [vmem:[#allocation6_spill] sm:$0xff] }
 0x43a   :  { %2486 = vperm.xlu2 %2640, %v2228_v12   ;;  %v2282_v41 = vpop.permute.xlu1 %2281  ;;  %v5474_v12 = vld [vmem:[#allocation9_spill] sm:$0xff] }
 0x43b   :  { %v2361_v9 = vmul.f32 %v2282_v41, %v5044_v31  ;;  %v2362_v40 = vmul.f32 %v2282_v41, %v5047_v55  ;;  %v5478_v41 = vld [vmem:[#allocation21_spill] sm:$0xff] }
 0x43d   :  { %v2501_v62 = vadd.f32 %v4891_v7, %v2361_v9  ;;  %v2502_v14 = vadd.f32 %v4891_v7, %v2362_v40  ;;  %v5479_v40 = vld [vmem:[#allocation22_spill] sm:$0xff] }
 0x43f   :  { %2541 = vst [vmem:[#allocation2 + $0x60] sm:$0xff] %v2501_v62 }
 0x440   :  { %2542 = vst.msk [vmem:[#allocation2 + $0x68] sm:$0xff] %vm1708_vm1, %v2502_v14 }
 0x442   :  { %v2302_v8 = vpop.permute.xlu2 %2301 }
 0x443   :  { %v2369_v49 = vmul.f32 %v2302_v8, %v5088_v57  ;;  %v2370_v63 = vmul.f32 %v2302_v8, %v5091_v4 }
 0x445   :  { %v2509_v52 = vadd.f32 %v4945_v56, %v2369_v49  ;;  %v2510_v42 = vadd.f32 %v4945_v56, %v2370_v63  ;;  %v5480_v63 = vld [vmem:[#allocation17_spill] sm:$0xff] }
 0x447   :  { %2549 = vst [vmem:[#allocation2 + $0xa0] sm:$0xff] %v2509_v52 }
 0x448   :  { %2550 = vst.msk [vmem:[#allocation2 + $0xa8] sm:$0xff] %vm1708_vm1, %v2510_v42  ;;  %v5481_v42 = vld [vmem:[#allocation18_spill] sm:$0xff] }
 0x44a   :  { %v2292_v31 = vpop.permute.xlu1 %2291 }
 0x44b   :  { %v2365_v55 = vmul.f32 %v2292_v31, %v5066_v3  ;;  %v2366_v7 = vmul.f32 %v2292_v31, %v5069_v28 }
 0x44d   :  { %v2505_v15 = vadd.f32 %v4925_v30, %v2365_v55  ;;  %v2506_v59 = vadd.f32 %v4925_v30, %v2366_v7 }
 0x44f   :  { %2545 = vst [vmem:[#allocation2 + $0x80] sm:$0xff] %v2505_v15 }
 0x450   :  { %2546 = vst.msk [vmem:[#allocation2 + $0x88] sm:$0xff] %vm1708_vm1, %v2506_v59 }
 0x452   :  { %v2297_v57 = vpop.permute.xlu0 %2296 }
 0x453   :  { %v2367_v4 = vmul.f32 %v2297_v57, %v5077_v23  ;;  %v2368_v56 = vmul.f32 %v2297_v57, %v5080_v36  ;;  %v5482_v57 = vld [vmem:[#allocation19_spill] sm:$0xff] }
 0x455   :  { %v2507_v38 = vadd.f32 %v5466_v20, %v2367_v4  ;;  %v2508_v53 = vadd.f32 %v5466_v20, %v2368_v56  ;;  %v5483_v56 = vld [vmem:[#allocation20_spill] sm:$0xff] }
 0x457   :  { %2547 = vst [vmem:[#allocation2 + $0x90] sm:$0xff] %v2507_v38 }
 0x458   :  { %2548 = vst.msk [vmem:[#allocation2 + $0x98] sm:$0xff] %vm1708_vm1, %v2508_v53 }
 0x45a   :  { %v2317_v3 = vpop.permute.xlu2 %2316 }
 0x45b   :  { %v2375_v28 = vmul.f32 %v2317_v3, %v5121_v47  ;;  %v2376_v30 = vmul.f32 %v2317_v3, %v5124_v32 }
 0x45d   :  { %v2515_v37 = vadd.f32 %v5467_v25, %v2375_v28  ;;  %v2516_v0 = vadd.f32 %v5467_v25, %v2376_v30 }
 0x45f   :  { %2555 = vst [vmem:[#allocation2 + $0xd0] sm:$0xff] %v2515_v37 }
 0x460   :  { %2556 = vst.msk [vmem:[#allocation2 + $0xd8] sm:$0xff] %vm1708_vm1, %v2516_v0 }
 0x462   :  { %v2307_v23 = vpop.permute.xlu1 %2306 }
 0x463   :  { %v2371_v36 = vmul.f32 %v2307_v23, %v5099_v18  ;;  %v2372_v22 = vmul.f32 %v2307_v23, %v5102_v26 }
 0x465   :  { %v2511_v34 = vadd.f32 %v5468_v5, %v2371_v36  ;;  %v2512_v54 = vadd.f32 %v5468_v5, %v2372_v22 }
 0x467   :  { %2551 = vst [vmem:[#allocation2 + $0xb0] sm:$0xff] %v2511_v34 }
 0x468   :  { %2552 = vst.msk [vmem:[#allocation2 + $0xb8] sm:$0xff] %vm1708_vm1, %v2512_v54 }
 0x46a   :  { %v2312_v47 = vpop.permute.xlu0 %2311 }
 0x46b   :  { %v2373_v32 = vmul.f32 %v2312_v47, %v5110_v16  ;;  %v2374_v58 = vmul.f32 %v2312_v47, %v5113_v44  ;;  %v5472_v44 = vld [vmem:[#allocation12_spill] sm:$0xff] }
 0x46d   :  { %v2513_v11 = vadd.f32 %v5469_v46, %v2373_v32  ;;  %v2514_v10 = vadd.f32 %v5469_v46, %v2374_v58 }
 0x46f   :  { %2553 = vst [vmem:[#allocation2 + $0xc0] sm:$0xff] %v2513_v11 }
 0x470   :  { %2554 = vst.msk [vmem:[#allocation2 + $0xc8] sm:$0xff] %vm1708_vm1, %v2514_v10 }
 0x472   :  { %v2332_v18 = vpop.permute.xlu2 %2331 }
 0x473   :  { %v2381_v26 = vmul.f32 %v2332_v18, %v5156_v60  ;;  %v2382_v1 = vmul.f32 %v2332_v18, %v5470_v19 }
 0x475   :  { %v2521_v21 = vadd.f32 %v5471_v2, %v2381_v26  ;;  %v2522_v27 = vadd.f32 %v5471_v2, %v2382_v1 }
 0x477   :  { %2561 = vst [vmem:[#allocation2 + $0x100] sm:$0xff] %v2521_v21 }
 0x478   :  { %2562 = vst.msk [vmem:[#allocation2 + $0x108] sm:$0xff] %vm1708_vm1, %v2522_v27 }
 0x47a   :  { %v2322_v16 = vpop.permute.xlu1 %2321 }
 0x47b   :  { %v2377_v33 = vmul.f32 %v2322_v16, %v5472_v44  ;;  %v2378_v61 = vmul.f32 %v2322_v16, %v5473_v45 }
 0x47d   :  { %v2517_v51 = vadd.f32 %v5474_v12, %v2377_v33  ;;  %v2518_v24 = vadd.f32 %v5474_v12, %v2378_v61 }
 0x47f   :  { %2557 = vst [vmem:[#allocation2 + $0xe0] sm:$0xff] %v2517_v51 }
 0x480   :  { %2558 = vst.msk [vmem:[#allocation2 + $0xe8] sm:$0xff] %vm1708_vm1, %v2518_v24 }
 0x482   :  { %v2327_v60 = vpop.permute.xlu0 %2326 }
 0x483   :  { %v2379_v17 = vmul.f32 %v2327_v60, %v5475_v35  ;;  %v2380_v43 = vmul.f32 %v2327_v60, %v5476_v50 }
 0x485   :  { %v2519_v48 = vadd.f32 %v5477_v39, %v2379_v17  ;;  %v2520_v13 = vadd.f32 %v5477_v39, %v2380_v43 }
 0x487   :  { %2559 = vst [vmem:[#allocation2 + $0xf0] sm:$0xff] %v2519_v48 }
 0x488   :  { %2560 = vst.msk [vmem:[#allocation2 + $0xf8] sm:$0xff] %vm1708_vm1, %v2520_v13 }
 0x48b   :  { %v2347_v6 = vpop.permute.xlu2 %2346 }
 0x48c   :  { %v2387_v9 = vmul.f32 %v2347_v6, %v5478_v41  ;;  %v2388_v62 = vmul.f32 %v2347_v6, %v5479_v40 }
 0x492   :  { %v2337_v29 = vpop.permute.xlu1 %2336 }
 0x493   :  { %v2383_v52 = vmul.f32 %v2337_v29, %v5480_v63  ;;  %v2384_v31 = vmul.f32 %v2337_v29, %v5481_v42 }
 0x494   :  { %v2487_v14 = vpop.permute.xlu2 %2486 }
 0x495   :  { %v2527_v8 = vadd.f32 %v2487_v14, %v2387_v9  ;;  %v2528_v49 = vadd.f32 %v2487_v14, %v2388_v62 }
 0x497   :  { %2567 = vst [vmem:[#allocation2 + $0x130] sm:$0xff] %v2527_v8 }
 0x498   :  { %2568 = vst.msk [vmem:[#allocation2 + $0x138] sm:$0xff] %vm1708_vm1, %v2528_v49 }
 0x49a   :  { %v2342_v55 = vpop.permute.xlu0 %2341 }
 0x49b   :  { %v2477_v7 = vpop.permute.xlu1 %2476  ;;  %v2385_v4 = vmul.f32 %v2342_v55, %v5482_v57  ;;  %v2386_v20 = vmul.f32 %v2342_v55, %v5483_v56 }
 0x49c   :  { %v2523_v15 = vadd.f32 %v2477_v7, %v2383_v52  ;;  %v2524_v59 = vadd.f32 %v2477_v7, %v2384_v31 }
 0x49e   :  { %2563 = vst [vmem:[#allocation2 + $0x110] sm:$0xff] %v2523_v15 }
 0x49f   :  { %2564 = vst.msk [vmem:[#allocation2 + $0x118] sm:$0xff] %vm1708_vm1, %v2524_v59 }
 0x4a3   :  { %v2482_v38 = vpop.permute.xlu0 %2481 }
 0x4a4   :  { %v2525_v53 = vadd.f32 %v2482_v38, %v2385_v4  ;;  %v2526_v3 = vadd.f32 %v2482_v38, %v2386_v20 }
 0x4a6   :  { %2565 = vst [vmem:[#allocation2 + $0x120] sm:$0xff] %v2525_v53 }
 0x4a7   :  { %2566 = vst.msk [vmem:[#allocation2 + $0x128] sm:$0xff] %vm1708_vm1, %v2526_v3 }
 0x4a8   :  { %2581 = dma.vmem_to_hbm [thread:$0]  %s2574_s6, 5120, %s2576_s9, [#allocation3], %s2887_s10, %s2887_s10, %s2888_s11  }
 0x4a9   :  { %2882 = dma.done.wait [#allocation3], 5120  }
 0x4aa   :  { %2883 = vsyncadd [#allocation3], 4294962176 }
 0x4ab   :  { %2586 = vsyncpa [#allocation3], 1 }

</bundles_post_ra>
